<compile_context>
chip_gen: v5e
topology: v5e:2x2
jax: 0.10.0
libtpu: 0.0.40
codegen_flags: <defaults>
</compile_context>

<pallas_src>
import numpy as np

import jax
import jax.numpy as jnp
from jax.experimental import pallas as pl
from jax.experimental.pallas import tpu as pltpu

N_QUBITS = 8
N_QNN_PARAMS = 80
BN_EPS = 1e-5
_INV_SQRT2 = 0.7071067811865476
_N_CNN_LAYERS = 6          # conv0..conv3 + fc0 + fc1, all as dense GEMMs
_MAX_BATCH_TILE = 256


def _round_up(n, m):
    return ((n + m - 1) // m) * m


# ----------------------------------------------------------------------------
# Pallas kernels
# ----------------------------------------------------------------------------
def _cnn_head_kernel(x_ref, *refs):
    """conv0..conv3 + adaptive-pool + fc0 + fc1, fully fused.

    Each conv layer was lowered at init (for the fixed spatial size) to a dense
    (flat_in, flat_out) matrix with eval-mode BatchNorm folded in, so the whole CNN
    front-end is a chain of GEMM+bias+ReLU with every intermediate VMEM-resident.
    bf16 MXU operands, f32 accumulation + epilogue.
    """
    o_ref = refs[-1]
    wb = refs[:-1]
    h = x_ref[...]                                               # (tb, H*W*C) bf16
    n_layers = len(wb) // 2
    for li in range(n_layers - 1):
        y = jnp.dot(h, wb[2 * li][...], preferred_element_type=jnp.float32)
        h = jnp.maximum(y + wb[2 * li + 1][...], 0.0).astype(jnp.bfloat16)
    y = jnp.dot(h, wb[-2][...], preferred_element_type=jnp.float32)
    o_ref[...] = jnp.maximum(y + wb[-1][...], 0.0)               # (tb, 8) f32 angles


def _quantum_classifier_kernel(s_ref, bits_ref, mr_ref, mi_ref,
                               w0_ref, b0_ref, w1_ref, b1_ref, w2_ref, b2_ref,
                               w3_ref, b3_ref, w4_ref, b4_ref, o_ref):
    """Product-state kron + Hermitian <Z0Z1Z2Z3> + classifier cl0..cl4, fully fused.

    <Z0Z1Z2Z3> = psi^H M psi with M = Mr + i*Mi (Mr symmetric, Mi antisymmetric):
        E = ar.(Mr ar) + ai.(Mr ai) - 2*ar.(Mi ai)
    evaluated with two matmuls: [ar;ai] @ Mr (single Mr weight pass) and ai @ Mi,
    all in f32 for numerical safety under cancellation.
    """
    tb = s_ref.shape[0]
    s = s_ref[...]                                               # (tb, 32) f32
    v0r, v0i = s[:, 0:8], s[:, 8:16]
    v1r, v1i = s[:, 16:24], s[:, 24:32]
    bits = bits_ref[...]                                         # (8, 256) in {0,1}

    # psi = kron_q v_q (wire 0 = MSB): per-qubit select + complex product, unrolled.
    b0q = bits[0:1, :]
    pr = v0r[:, 0:1] + (v1r[:, 0:1] - v0r[:, 0:1]) * b0q
    pi = v0i[:, 0:1] + (v1i[:, 0:1] - v0i[:, 0:1]) * b0q
    for q in range(1, N_QUBITS):
        bq = bits[q:q + 1, :]
        sr = v0r[:, q:q + 1] + (v1r[:, q:q + 1] - v0r[:, q:q + 1]) * bq
        si = v0i[:, q:q + 1] + (v1i[:, q:q + 1] - v0i[:, q:q + 1]) * bq
        pr, pi = pr * sr - pi * si, pr * si + pi * sr

    stacked = jnp.concatenate([pr, pi], axis=0)                  # (2*tb, 256)
    t = jnp.dot(stacked, mr_ref[...], preferred_element_type=jnp.float32)
    tr, ti = t[:tb, :], t[tb:, :]
    u = jnp.dot(pi, mi_ref[...], preferred_element_type=jnp.float32)
    e = jnp.sum(pr * tr + pi * ti + 2.0 * pr * u, axis=1, keepdims=True)   # (tb, 1)

    # classifier (Linear + folded BN + ReLU chain), lane-padded to 256/128 at init.
    h = jnp.maximum(e * w0_ref[...] + b0_ref[...], 0.0)                    # 1 -> 256p
    h = jnp.maximum(jnp.dot(h.astype(jnp.bfloat16), w1_ref[...],
                            preferred_element_type=jnp.float32) + b1_ref[...], 0.0)
    h = jnp.maximum(jnp.dot(h.astype(jnp.bfloat16), w2_ref[...],
                            preferred_element_type=jnp.float32) + b2_ref[...], 0.0)
    h = jnp.maximum(jnp.dot(h.astype(jnp.bfloat16), w3_ref[...],
                            preferred_element_type=jnp.float32) + b3_ref[...], 0.0)
    o_ref[...] = jnp.sum(h * w4_ref[...], axis=1, keepdims=True) + b4_ref[...]


# ----------------------------------------------------------------------------
# Pallas wrappers (batch-tiled "parallel" grid for v7x megacore)
# ----------------------------------------------------------------------------
def _batch_tiling(B):
    """Pick (tile, padded_B): sublane-aligned tiles, single block when batch is small."""
    Bp = _round_up(max(B, 1), 8)
    if Bp <= _MAX_BATCH_TILE:
        return Bp, Bp
    return _MAX_BATCH_TILE, _round_up(B, _MAX_BATCH_TILE)


def cnn_head(x_flat, params, tb):
    Bp, K = x_flat.shape
    args = [x_flat]
    in_specs = [pl.BlockSpec((tb, K), lambda i: (i, 0))]
    for li in range(_N_CNN_LAYERS):
        w, b = params[f"cnn{li}_w"], params[f"cnn{li}_b"]
        args += [w, b]
        in_specs += [pl.BlockSpec(w.shape, lambda i: (0, 0)),
                     pl.BlockSpec(b.shape, lambda i: (0, 0))]
    return pl.pallas_call(
        _cnn_head_kernel,
        out_shape=jax.ShapeDtypeStruct((Bp, N_QUBITS), jnp.float32),
        grid=(Bp // tb,),
        in_specs=in_specs,
        out_specs=pl.BlockSpec((tb, N_QUBITS), lambda i: (i, 0)),
        compiler_params=pltpu.CompilerParams(dimension_semantics=("parallel",)),
    )(*args)


def quantum_classifier(states, params, tb):
    Bp = states.shape[0]
    consts = [params["bits"], params["Mr"], params["Mi"],
              params["cl0_w"], params["cl0_b"], params["cl1_w"], params["cl1_b"],
              params["cl2_w"], params["cl2_b"], params["cl3_w"], params["cl3_b"],
              params["cl4_w"], params["cl4_b"]]
    in_specs = [pl.BlockSpec((tb, 4 * N_QUBITS), lambda i: (i, 0))]
    in_specs += [pl.BlockSpec(c.shape, lambda i: (0, 0)) for c in consts]
    return pl.pallas_call(
        _quantum_classifier_kernel,
        out_shape=jax.ShapeDtypeStruct((Bp, 1), jnp.float32),
        grid=(Bp // tb,),
        in_specs=in_specs,
        out_specs=pl.BlockSpec((tb, 1), lambda i: (i, 0)),
        compiler_params=pltpu.CompilerParams(dimension_semantics=("parallel",)),
    )(states, *consts)


# ----------------------------------------------------------------------------
# Quantum circuit algebra (runs ONCE at init, float64 NumPy on host)
# ----------------------------------------------------------------------------
def _rx_np(t):
    c, s = np.cos(t / 2.0), np.sin(t / 2.0)
    return np.array([[c, -1j * s], [-1j * s, c]], dtype=np.complex128)


def _ry_np(t):
    c, s = np.cos(t / 2.0), np.sin(t / 2.0)
    return np.array([[c, -s], [s, c]], dtype=np.complex128)


def _rz_np(t):
    return np.array([[np.exp(-1j * t / 2.0), 0.0], [0.0, np.exp(1j * t / 2.0)]],
                    dtype=np.complex128)


_CNOT_NP = np.array([[1, 0, 0, 0], [0, 1, 0, 0], [0, 0, 0, 1], [0, 0, 1, 0]],
                    dtype=np.complex128)


def _build_fixed_unitary(p):
    """Unitary of the parameter-only circuit block (wire 0 = MSB), complex128."""
    n = N_QUBITS
    T = np.eye(2 ** n, dtype=np.complex128).reshape((2,) * n + (2 ** n,))

    def g1(T, g, q):
        T = np.tensordot(g, T, axes=((1,), (q,)))
        return np.moveaxis(T, 0, q)

    def g2(T, c, t):
        g = _CNOT_NP.reshape(2, 2, 2, 2)
        T = np.tensordot(g, T, axes=((2, 3), (c, t)))
        return np.moveaxis(T, (0, 1), (c, t))

    for i in range(n): T = g1(T, _ry_np(2.0 * p[i]), i)
    for i in range(n - 1): T = g2(T, i, i + 1)
    T = g2(T, 7, 0)
    for i in range(n): T = g1(T, _rx_np(2.0 * p[8 + i]), i)
    for i in range(0, n - 1, 2): T = g2(T, i, i + 1)
    for i in range(1, n - 2, 2): T = g2(T, i, i + 2)
    for i in range(n): T = g1(T, _rz_np(2.0 * p[16 + i]), i)
    for i in range(n // 2): T = g2(T, i, i + n // 2)
    for i in range(n): T = g1(T, _ry_np(2.0 * p[24 + i]), i)
    for i in range(n - 2, -1, -1): T = g2(T, i + 1, i)
    for i in range(n): T = g1(T, _rx_np(2.0 * p[32 + i]), i)
    for i in range(0, n - 2, 2): T = g2(T, i, i + 2)
    for i in range(n): T = g1(T, _rz_np(2.0 * p[40 + i]), i)
    for i in range(n // 2): T = g2(T, i, (i + n // 2) % n)
    for i in range(n): T = g1(T, _ry_np(2.0 * p[48 + i]), i)
    for i in range(n): T = g2(T, i, (i + 3) % n)
    for i in range(n): T = g1(T, _rx_np(2.0 * p[56 + i]), i)
    for i in range(1, n): T = g2(T, 0, i)
    for i in range(n): T = g1(T, _rz_np(2.0 * p[64 + i]), i)
    for i in range(n): T = g2(T, i, (i + 1) % n)
    for i in range(n): T = g1(T, _ry_np(2.0 * p[72 + i]), i)
    return T.reshape(2 ** n, 2 ** n)


def build_observable(qnn_params):
    """M = U^H diag(Z0 Z1 Z2 Z3) U -> (Mr symmetric, Mi antisymmetric), float64."""
    U = _build_fixed_unitary(np.asarray(qnn_params, dtype=np.float64))
    idx = np.arange(2 ** N_QUBITS)
    sign = np.ones(2 ** N_QUBITS, dtype=np.float64)
    for q in range(4):
        bit = (idx >> (N_QUBITS - 1 - q)) & 1
        sign *= (1.0 - 2.0 * bit)
    M = np.conj(U).T @ (sign[:, None] * U)
    return np.real(M), np.imag(M)


# ----------------------------------------------------------------------------
# Init-time lowering of the CNN stack to dense GEMMs (host NumPy, float64)
# ----------------------------------------------------------------------------
def _conv_dense(w, b, H, W, stride, pad):
    """Conv2d(w,b) -> dense matrix acting on NHWC-flattened features at fixed H,W."""
    Cout, Cin, kh, kw = w.shape
    OH = (H + 2 * pad - kh) // stride + 1
    OW = (W + 2 * pad - kw) // stride + 1
    A = np.zeros((H * W * Cin, OH * OW * Cout), dtype=np.float64)
    wt = np.transpose(np.asarray(w, np.float64), (2, 3, 1, 0))    # (kh, kw, Cin, Cout)
    for oh in range(OH):
        for ow in range(OW):
            c0 = (oh * OW + ow) * Cout
            for ikh in range(kh):
                ih = oh * stride - pad + ikh
                if ih < 0 or ih >= H:
                    continue
                for ikw in range(kw):
                    iw = ow * stride - pad + ikw
                    if iw < 0 or iw >= W:
                        continue
                    r0 = (ih * W + iw) * Cin
                    A[r0:r0 + Cin, c0:c0 + Cout] += wt[ikh, ikw]
    bvec = np.tile(np.asarray(b, np.float64), OH * OW)
    return A, bvec, OH, OW


def _pool_flatten_matrix(OH, OW, C, out_hw=2):
    """AdaptiveAvgPool2d(out_hw) + NCHW flatten as a dense matrix on NHWC-flat input."""
    P = np.zeros((OH * OW * C, C * out_hw * out_hw), dtype=np.float64)
    for i in range(out_hw):
        h0 = (i * OH) // out_hw
        h1 = -((-(i + 1) * OH) // out_hw)
        for j in range(out_hw):
            w0 = (j * OW) // out_hw
            w1 = -((-(j + 1) * OW) // out_hw)
            scale = 1.0 / float((h1 - h0) * (w1 - w0))
            for c in range(C):
                ocol = c * out_hw * out_hw + i * out_hw + j
                for hh in range(h0, h1):
                    for ww in range(w0, w1):
                        P[(hh * OW + ww) * C + c, ocol] += scale
    return P


def init_params(key, H=16, W=16):
    def nrm(k, shape, s=0.1):
        return np.asarray(jax.random.normal(k, shape, dtype=jnp.float32),
                          dtype=np.float64) * s

    keys = jax.random.split(key, 16)
    # Eval-mode BatchNorm with default stats (gamma=1, beta=0, mean=0, var=1) folds
    # into a single scale on the preceding weight/bias.
    # TODO(synk): a trained checkpoint would need the full gamma/beta/mean/var fold.
    bn_scale = 1.0 / np.sqrt(1.0 + BN_EPS)
    p = {}

    # --- CNN stack -> dense GEMM chain (fixed input spatial size) -------------------
    conv_cfg = [(1, 8, 5, 2, 2), (8, 16, 3, 2, 1), (16, 12, 3, 1, 1), (12, 8, 3, 2, 1)]
    chain = []
    h_sp, w_sp = H, W
    for li, (cin, cout, k, stride, pad) in enumerate(conv_cfg):
        wc = nrm(keys[li], (cout, cin, k, k))
        bc = nrm(jax.random.fold_in(keys[li], 1), (cout,), 0.05)
        A, bvec, h_sp, w_sp = _conv_dense(wc, bc, h_sp, w_sp, stride, pad)
        chain.append((A * bn_scale, bvec * bn_scale))

    # AdaptiveAvgPool2d(2) + Flatten (both linear, applied post-ReLU) folded into fc0.
    P = _pool_flatten_matrix(h_sp, w_sp, 8, 2)
    lk = jax.random.split(keys[8], 4)
    fc0_w, fc0_b = nrm(lk[0], (32, 16)), nrm(lk[1], (16,), 0.05)
    fc1_w, fc1_b = nrm(lk[2], (16, 8)), nrm(lk[3], (8,), 0.05)
    chain.append((P @ (fc0_w * bn_scale), fc0_b * bn_scale))
    chain.append((fc1_w * bn_scale, fc1_b * bn_scale))

    # Lane-pad wide intermediates to multiples of 128 (zero cols/rows -> ReLU(0)=0).
    out_pad = [(_round_up(A.shape[1], 128) if A.shape[1] >= 128 else A.shape[1])
               for A, _ in chain]
    in_dims = [chain[0][0].shape[0]] + out_pad[:-1]
    for li, (A, bvec) in enumerate(chain):
        Ap = np.zeros((in_dims[li], out_pad[li]), np.float64)
        Ap[:A.shape[0], :A.shape[1]] = A
        bp = np.zeros((out_pad[li],), np.float64)
        bp[:bvec.shape[0]] = bvec
        p[f"cnn{li}_w"] = jnp.asarray(Ap, dtype=jnp.bfloat16)
        p[f"cnn{li}_b"] = jnp.asarray(bp.reshape(1, -1), dtype=jnp.float32)

    # --- classifier, lane-padded (150->256, 75/35/15->128) --------------------------
    cl_cfg = [(1, 150, True), (150, 75, True), (75, 35, True), (35, 15, True),
              (15, 1, False)]
    cl_pad = [256, 128, 128, 128, 1]
    ck = jax.random.split(keys[9], 2 * len(cl_cfg))
    prev_pad = 1
    for li, (fin, fout, has_bn) in enumerate(cl_cfg):
        wl = nrm(ck[2 * li], (fin, fout))
        bl = nrm(ck[2 * li + 1], (fout,), 0.05)
        s = bn_scale if has_bn else 1.0
        wp = np.zeros((prev_pad, cl_pad[li]), np.float64)
        wp[:fin, :fout] = wl * s
        bp = np.zeros((cl_pad[li],), np.float64)
        bp[:fout] = bl * s
        if li == 0:
            p["cl0_w"] = jnp.asarray(wp, dtype=jnp.float32)        # (1,256) broadcast row
        elif li == len(cl_cfg) - 1:
            p["cl4_w"] = jnp.asarray(wp.T, dtype=jnp.float32)      # (1,128) lane reduction
        else:
            p[f"cl{li}_w"] = jnp.asarray(wp, dtype=jnp.bfloat16)
        p[f"cl{li}_b"] = jnp.asarray(bp.reshape(1, -1), dtype=jnp.float32)
        prev_pad = cl_pad[li]

    # --- constant quantum observable + bit masks -------------------------------------
    qnn_params = nrm(keys[12], (N_QNN_PARAMS,), 0.1)
    Mr, Mi = build_observable(qnn_params)
    p["Mr"] = jnp.asarray(Mr, dtype=jnp.float32)     # f32: avoids bf16 cancellation drift
    p["Mi"] = jnp.asarray(Mi, dtype=jnp.float32)

    idx = np.arange(2 ** N_QUBITS)
    bits = np.stack([((idx >> (N_QUBITS - 1 - q)) & 1).astype(np.float32)
                     for q in range(N_QUBITS)], axis=0)             # (8, 256)
    p["bits"] = jnp.asarray(bits)
    return p


# ----------------------------------------------------------------------------
# Forward pass glue
# ----------------------------------------------------------------------------
def _single_qubit_states(f):
    """f:(B,8) angles -> (B,32) = [v0r|v0i|v1r|v1i] of RX(f/2) RY(f) RZ(2f) H |0>."""
    c2, s2 = jnp.cos(0.5 * f), jnp.sin(0.5 * f)
    c4, s4 = jnp.cos(0.25 * f), jnp.sin(0.25 * f)
    cx, sx = jnp.cos(f), jnp.sin(f)
    ar = _INV_SQRT2 * (c2 - s2) * cx
    ai = -_INV_SQRT2 * (c2 + s2) * sx
    br = _INV_SQRT2 * (c2 + s2) * cx
    bi = _INV_SQRT2 * (c2 - s2) * sx
    v0r = c4 * ar + s4 * bi
    v0i = c4 * ai - s4 * br
    v1r = s4 * ai + c4 * br
    v1i = -s4 * ar + c4 * bi
    return jnp.concatenate([v0r, v0i, v1r, v1i], axis=1)


def qcnn_forward(params, x_nchw):
    B, C, H, W = x_nchw.shape
    assert H * W * C == params["cnn0_w"].shape[0], "params built for a different H,W"
    # NCHW -> NHWC-flat, matching the row ordering of the dense conv matrices.
    x = jnp.transpose(x_nchw.astype(jnp.float32), (0, 2, 3, 1)).reshape(B, H * W * C)
    x = x.astype(jnp.bfloat16)
    tb, Bp = _batch_tiling(B)
    if Bp != B:
        x = jnp.pad(x, ((0, Bp - B), (0, 0)))
    angles = cnn_head(x, params, tb)                  # (Bp, 8) f32  (Pallas kernel 1)
    states = _single_qubit_states(angles)             # (Bp, 32)     (tiny XLA trig glue)
    out = quantum_classifier(states, params, tb)      # (Bp, 1) f32  (Pallas kernel 2)
    return out[:B]


if __name__ == "__main__":
    key = jax.random.PRNGKey(0)
    pkey, xkey = jax.random.split(key)
    params = init_params(pkey, H=16, W=16)
    x = jax.random.normal(xkey, (4, 1, 16, 16), dtype=jnp.float32)
    fwd = jax.jit(qcnn_forward)
    out = jax.block_until_ready(fwd(params, x))
    assert out.shape == (4, 1)
    assert bool(jnp.all(jnp.isfinite(out)))
    print("KERNEL_OK")
</pallas_src>

<mosaic_0001>
module attributes {stable_mosaic.version = 11 : i64} {
  func.func @_cnn_head_kernel(%arg0: i32, %arg1: memref<8x256xbf16, #tpu.memory_space<vmem>>, %arg2: memref<256x512xbf16, #tpu.memory_space<vmem>>, %arg3: memref<1x512xf32, #tpu.memory_space<vmem>>, %arg4: memref<512x256xbf16, #tpu.memory_space<vmem>>, %arg5: memref<1x256xf32, #tpu.memory_space<vmem>>, %arg6: memref<256x256xbf16, #tpu.memory_space<vmem>>, %arg7: memref<1x256xf32, #tpu.memory_space<vmem>>, %arg8: memref<256x32xbf16, #tpu.memory_space<vmem>>, %arg9: memref<1x32xf32, #tpu.memory_space<vmem>>, %arg10: memref<32x16xbf16, #tpu.memory_space<vmem>>, %arg11: memref<1x16xf32, #tpu.memory_space<vmem>>, %arg12: memref<16x8xbf16, #tpu.memory_space<vmem>>, %arg13: memref<1x8xf32, #tpu.memory_space<vmem>>, %arg14: memref<8x8xf32, #tpu.memory_space<vmem>>) attributes {dimension_semantics = [#tpu.dimension_semantics<parallel>], iteration_bounds = array<i64: 1>, scalar_prefetch = 0 : i64, scratch_operands = 0 : i64, tpu.core_type = #tpu.core_type<tc>, window_params = [{transform_indices = @transform_0, window_bounds = array<i64: 8, 256>}, {pipeline_mode = #tpu.pipeline_mode<synchronous>, transform_indices = @transform_1, window_bounds = array<i64: 256, 512>}, {pipeline_mode = #tpu.pipeline_mode<synchronous>, transform_indices = @transform_2, window_bounds = array<i64: 1, 512>}, {pipeline_mode = #tpu.pipeline_mode<synchronous>, transform_indices = @transform_3, window_bounds = array<i64: 512, 256>}, {pipeline_mode = #tpu.pipeline_mode<synchronous>, transform_indices = @transform_4, window_bounds = array<i64: 1, 256>}, {pipeline_mode = #tpu.pipeline_mode<synchronous>, transform_indices = @transform_5, window_bounds = array<i64: 256, 256>}, {pipeline_mode = #tpu.pipeline_mode<synchronous>, transform_indices = @transform_6, window_bounds = array<i64: 1, 256>}, {pipeline_mode = #tpu.pipeline_mode<synchronous>, transform_indices = @transform_7, window_bounds = array<i64: 256, 32>}, {pipeline_mode = #tpu.pipeline_mode<synchronous>, transform_indices = @transform_8, window_bounds = array<i64: 1, 32>}, {pipeline_mode = #tpu.pipeline_mode<synchronous>, transform_indices = @transform_9, window_bounds = array<i64: 32, 16>}, {pipeline_mode = #tpu.pipeline_mode<synchronous>, transform_indices = @transform_10, window_bounds = array<i64: 1, 16>}, {pipeline_mode = #tpu.pipeline_mode<synchronous>, transform_indices = @transform_11, window_bounds = array<i64: 16, 8>}, {pipeline_mode = #tpu.pipeline_mode<synchronous>, transform_indices = @transform_12, window_bounds = array<i64: 1, 8>}, {transform_indices = @transform_13, window_bounds = array<i64: 8, 8>}]} {
    %c0 = arith.constant 0 : index
    %c0_0 = arith.constant 0 : index
    %0 = vector.load %arg1[%c0, %c0_0] : memref<8x256xbf16, #tpu.memory_space<vmem>>, vector<8x256xbf16>
    %c0_1 = arith.constant 0 : index
    %c0_2 = arith.constant 0 : index
    %1 = vector.load %arg2[%c0_1, %c0_2] : memref<256x512xbf16, #tpu.memory_space<vmem>>, vector<256x512xbf16>
    %cst = arith.constant dense<0.000000e+00> : vector<8x512xf32>
    %2 = tpu.matmul %0, %1, %cst {dimension_numbers = #tpu.dot_dimension_numbers<[1], [0], [0], [1], [0, 0, 1, 1], [], []>} : vector<8x256xbf16>, vector<256x512xbf16>, vector<8x512xf32> -> vector<8x512xf32>
    %c0_3 = arith.constant 0 : index
    %c0_4 = arith.constant 0 : index
    %3 = vector.load %arg3[%c0_3, %c0_4] : memref<1x512xf32, #tpu.memory_space<vmem>>, vector<1x512xf32>
    %4 = vector.broadcast %3 : vector<1x512xf32> to vector<8x512xf32>
    %5 = arith.addf %2, %4 : vector<8x512xf32>
    %cst_5 = arith.constant 0.000000e+00 : f32
    %6 = vector.broadcast %cst_5 : f32 to vector<8x512xf32>
    %7 = arith.maximumf %5, %6 : vector<8x512xf32>
    %8 = arith.truncf %7 : vector<8x512xf32> to vector<8x512xbf16>
    %c0_6 = arith.constant 0 : index
    %c0_7 = arith.constant 0 : index
    %9 = vector.load %arg4[%c0_6, %c0_7] : memref<512x256xbf16, #tpu.memory_space<vmem>>, vector<512x256xbf16>
    %cst_8 = arith.constant dense<0.000000e+00> : vector<8x256xf32>
    %10 = tpu.matmul %8, %9, %cst_8 {dimension_numbers = #tpu.dot_dimension_numbers<[1], [0], [0], [1], [0, 0, 1, 1], [], []>} : vector<8x512xbf16>, vector<512x256xbf16>, vector<8x256xf32> -> vector<8x256xf32>
    %c0_9 = arith.constant 0 : index
    %c0_10 = arith.constant 0 : index
    %11 = vector.load %arg5[%c0_9, %c0_10] : memref<1x256xf32, #tpu.memory_space<vmem>>, vector<1x256xf32>
    %12 = vector.broadcast %11 : vector<1x256xf32> to vector<8x256xf32>
    %13 = arith.addf %10, %12 : vector<8x256xf32>
    %cst_11 = arith.constant 0.000000e+00 : f32
    %14 = vector.broadcast %cst_11 : f32 to vector<8x256xf32>
    %15 = arith.maximumf %13, %14 : vector<8x256xf32>
    %16 = arith.truncf %15 : vector<8x256xf32> to vector<8x256xbf16>
    %c0_12 = arith.constant 0 : index
    %c0_13 = arith.constant 0 : index
    %17 = vector.load %arg6[%c0_12, %c0_13] : memref<256x256xbf16, #tpu.memory_space<vmem>>, vector<256x256xbf16>
    %cst_14 = arith.constant dense<0.000000e+00> : vector<8x256xf32>
    %18 = tpu.matmul %16, %17, %cst_14 {dimension_numbers = #tpu.dot_dimension_numbers<[1], [0], [0], [1], [0, 0, 1, 1], [], []>} : vector<8x256xbf16>, vector<256x256xbf16>, vector<8x256xf32> -> vector<8x256xf32>
    %c0_15 = arith.constant 0 : index
    %c0_16 = arith.constant 0 : index
    %19 = vector.load %arg7[%c0_15, %c0_16] : memref<1x256xf32, #tpu.memory_space<vmem>>, vector<1x256xf32>
    %20 = vector.broadcast %19 : vector<1x256xf32> to vector<8x256xf32>
    %21 = arith.addf %18, %20 : vector<8x256xf32>
    %cst_17 = arith.constant 0.000000e+00 : f32
    %22 = vector.broadcast %cst_17 : f32 to vector<8x256xf32>
    %23 = arith.maximumf %21, %22 : vector<8x256xf32>
    %24 = arith.truncf %23 : vector<8x256xf32> to vector<8x256xbf16>
    %c0_18 = arith.constant 0 : index
    %c0_19 = arith.constant 0 : index
    %25 = vector.load %arg8[%c0_18, %c0_19] : memref<256x32xbf16, #tpu.memory_space<vmem>>, vector<256x32xbf16>
    %cst_20 = arith.constant dense<0.000000e+00> : vector<8x32xf32>
    %26 = tpu.matmul %24, %25, %cst_20 {dimension_numbers = #tpu.dot_dimension_numbers<[1], [0], [0], [1], [0, 0, 1, 1], [], []>} : vector<8x256xbf16>, vector<256x32xbf16>, vector<8x32xf32> -> vector<8x32xf32>
    %c0_21 = arith.constant 0 : index
    %c0_22 = arith.constant 0 : index
    %27 = vector.load %arg9[%c0_21, %c0_22] : memref<1x32xf32, #tpu.memory_space<vmem>>, vector<1x32xf32>
    %28 = vector.broadcast %27 : vector<1x32xf32> to vector<8x32xf32>
    %29 = arith.addf %26, %28 : vector<8x32xf32>
    %cst_23 = arith.constant 0.000000e+00 : f32
    %30 = vector.broadcast %cst_23 : f32 to vector<8x32xf32>
    %31 = arith.maximumf %29, %30 : vector<8x32xf32>
    %32 = arith.truncf %31 : vector<8x32xf32> to vector<8x32xbf16>
    %c0_24 = arith.constant 0 : index
    %c0_25 = arith.constant 0 : index
    %33 = vector.load %arg10[%c0_24, %c0_25] : memref<32x16xbf16, #tpu.memory_space<vmem>>, vector<32x16xbf16>
    %cst_26 = arith.constant dense<0.000000e+00> : vector<8x16xf32>
    %34 = tpu.matmul %32, %33, %cst_26 {dimension_numbers = #tpu.dot_dimension_numbers<[1], [0], [0], [1], [0, 0, 1, 1], [], []>} : vector<8x32xbf16>, vector<32x16xbf16>, vector<8x16xf32> -> vector<8x16xf32>
    %c0_27 = arith.constant 0 : index
    %c0_28 = arith.constant 0 : index
    %35 = vector.load %arg11[%c0_27, %c0_28] : memref<1x16xf32, #tpu.memory_space<vmem>>, vector<1x16xf32>
    %36 = vector.broadcast %35 : vector<1x16xf32> to vector<8x16xf32>
    %37 = arith.addf %34, %36 : vector<8x16xf32>
    %cst_29 = arith.constant 0.000000e+00 : f32
    %38 = vector.broadcast %cst_29 : f32 to vector<8x16xf32>
    %39 = arith.maximumf %37, %38 : vector<8x16xf32>
    %40 = arith.truncf %39 : vector<8x16xf32> to vector<8x16xbf16>
    %c0_30 = arith.constant 0 : index
    %c0_31 = arith.constant 0 : index
    %41 = vector.load %arg12[%c0_30, %c0_31] : memref<16x8xbf16, #tpu.memory_space<vmem>>, vector<16x8xbf16>
    %cst_32 = arith.constant dense<0.000000e+00> : vector<8x8xf32>
    %42 = tpu.matmul %40, %41, %cst_32 {dimension_numbers = #tpu.dot_dimension_numbers<[1], [0], [0], [1], [0, 0, 1, 1], [], []>} : vector<8x16xbf16>, vector<16x8xbf16>, vector<8x8xf32> -> vector<8x8xf32>
    %c0_33 = arith.constant 0 : index
    %c0_34 = arith.constant 0 : index
    %43 = vector.load %arg13[%c0_33, %c0_34] : memref<1x8xf32, #tpu.memory_space<vmem>>, vector<1x8xf32>
    %44 = vector.broadcast %43 : vector<1x8xf32> to vector<8x8xf32>
    %45 = arith.addf %42, %44 : vector<8x8xf32>
    %cst_35 = arith.constant 0.000000e+00 : f32
    %46 = vector.broadcast %cst_35 : f32 to vector<8x8xf32>
    %47 = arith.maximumf %45, %46 : vector<8x8xf32>
    %c0_36 = arith.constant 0 : index
    %c0_37 = arith.constant 0 : index
    %48 = vector.load %arg14[%c0_36, %c0_37] : memref<8x8xf32, #tpu.memory_space<vmem>>, vector<8x8xf32>
    tpu.vector_store %arg14[%c0_36, %c0_37], %47 {strides = array<i32>} : memref<8x8xf32, #tpu.memory_space<vmem>>, vector<8x8xf32>,
    return
  }
  func.func @transform_0(%arg0: i32) -> (i32, i32) {
    %c0_i32 = arith.constant 0 : i32
    %c0_i32_0 = arith.constant 0 : i32
    return %arg0, %c0_i32 : i32, i32
  }
  func.func @transform_1(%arg0: i32) -> (i32, i32) {
    %c0_i32 = arith.constant 0 : i32
    %c0_i32_0 = arith.constant 0 : i32
    %c0_i32_1 = arith.constant 0 : i32
    return %c0_i32, %c0_i32_0 : i32, i32
  }
  func.func @transform_2(%arg0: i32) -> (i32, i32) {
    %c0_i32 = arith.constant 0 : i32
    %c0_i32_0 = arith.constant 0 : i32
    %c0_i32_1 = arith.constant 0 : i32
    return %c0_i32, %c0_i32_0 : i32, i32
  }
  func.func @transform_3(%arg0: i32) -> (i32, i32) {
    %c0_i32 = arith.constant 0 : i32
    %c0_i32_0 = arith.constant 0 : i32
    %c0_i32_1 = arith.constant 0 : i32
    return %c0_i32, %c0_i32_0 : i32, i32
  }
  func.func @transform_4(%arg0: i32) -> (i32, i32) {
    %c0_i32 = arith.constant 0 : i32
    %c0_i32_0 = arith.constant 0 : i32
    %c0_i32_1 = arith.constant 0 : i32
    return %c0_i32, %c0_i32_0 : i32, i32
  }
  func.func @transform_5(%arg0: i32) -> (i32, i32) {
    %c0_i32 = arith.constant 0 : i32
    %c0_i32_0 = arith.constant 0 : i32
    %c0_i32_1 = arith.constant 0 : i32
    return %c0_i32, %c0_i32_0 : i32, i32
  }
  func.func @transform_6(%arg0: i32) -> (i32, i32) {
    %c0_i32 = arith.constant 0 : i32
    %c0_i32_0 = arith.constant 0 : i32
    %c0_i32_1 = arith.constant 0 : i32
    return %c0_i32, %c0_i32_0 : i32, i32
  }
  func.func @transform_7(%arg0: i32) -> (i32, i32) {
    %c0_i32 = arith.constant 0 : i32
    %c0_i32_0 = arith.constant 0 : i32
    %c0_i32_1 = arith.constant 0 : i32
    return %c0_i32, %c0_i32_0 : i32, i32
  }
  func.func @transform_8(%arg0: i32) -> (i32, i32) {
    %c0_i32 = arith.constant 0 : i32
    %c0_i32_0 = arith.constant 0 : i32
    %c0_i32_1 = arith.constant 0 : i32
    return %c0_i32, %c0_i32_0 : i32, i32
  }
  func.func @transform_9(%arg0: i32) -> (i32, i32) {
    %c0_i32 = arith.constant 0 : i32
    %c0_i32_0 = arith.constant 0 : i32
    %c0_i32_1 = arith.constant 0 : i32
    return %c0_i32, %c0_i32_0 : i32, i32
  }
  func.func @transform_10(%arg0: i32) -> (i32, i32) {
    %c0_i32 = arith.constant 0 : i32
    %c0_i32_0 = arith.constant 0 : i32
    %c0_i32_1 = arith.constant 0 : i32
    return %c0_i32, %c0_i32_0 : i32, i32
  }
  func.func @transform_11(%arg0: i32) -> (i32, i32) {
    %c0_i32 = arith.constant 0 : i32
    %c0_i32_0 = arith.constant 0 : i32
    %c0_i32_1 = arith.constant 0 : i32
    return %c0_i32, %c0_i32_0 : i32, i32
  }
  func.func @transform_12(%arg0: i32) -> (i32, i32) {
    %c0_i32 = arith.constant 0 : i32
    %c0_i32_0 = arith.constant 0 : i32
    %c0_i32_1 = arith.constant 0 : i32
    return %c0_i32, %c0_i32_0 : i32, i32
  }
  func.func @transform_13(%arg0: i32) -> (i32, i32) {
    %c0_i32 = arith.constant 0 : i32
    %c0_i32_0 = arith.constant 0 : i32
    return %arg0, %c0_i32 : i32, i32
  }
}

module attributes {stable_mosaic.version = 11 : i64} {
  func.func @_quantum_classifier_kernel(%arg0: i32, %arg1: memref<8x32xf32, #tpu.memory_space<vmem>>, %arg2: memref<8x256xf32, #tpu.memory_space<vmem>>, %arg3: memref<256x256xf32, #tpu.memory_space<vmem>>, %arg4: memref<256x256xf32, #tpu.memory_space<vmem>>, %arg5: memref<1x256xf32, #tpu.memory_space<vmem>>, %arg6: memref<1x256xf32, #tpu.memory_space<vmem>>, %arg7: memref<256x128xbf16, #tpu.memory_space<vmem>>, %arg8: memref<1x128xf32, #tpu.memory_space<vmem>>, %arg9: memref<128x128xbf16, #tpu.memory_space<vmem>>, %arg10: memref<1x128xf32, #tpu.memory_space<vmem>>, %arg11: memref<128x128xbf16, #tpu.memory_space<vmem>>, %arg12: memref<1x128xf32, #tpu.memory_space<vmem>>, %arg13: memref<1x128xf32, #tpu.memory_space<vmem>>, %arg14: memref<1x1xf32, #tpu.memory_space<vmem>>, %arg15: memref<8x1xf32, #tpu.memory_space<vmem>>) attributes {dimension_semantics = [#tpu.dimension_semantics<parallel>], iteration_bounds = array<i64: 1>, scalar_prefetch = 0 : i64, scratch_operands = 0 : i64, tpu.core_type = #tpu.core_type<tc>, window_params = [{transform_indices = @transform_0, window_bounds = array<i64: 8, 32>}, {pipeline_mode = #tpu.pipeline_mode<synchronous>, transform_indices = @transform_1, window_bounds = array<i64: 8, 256>}, {pipeline_mode = #tpu.pipeline_mode<synchronous>, transform_indices = @transform_2, window_bounds = array<i64: 256, 256>}, {pipeline_mode = #tpu.pipeline_mode<synchronous>, transform_indices = @transform_3, window_bounds = array<i64: 256, 256>}, {pipeline_mode = #tpu.pipeline_mode<synchronous>, transform_indices = @transform_4, window_bounds = array<i64: 1, 256>}, {pipeline_mode = #tpu.pipeline_mode<synchronous>, transform_indices = @transform_5, window_bounds = array<i64: 1, 256>}, {pipeline_mode = #tpu.pipeline_mode<synchronous>, transform_indices = @transform_6, window_bounds = array<i64: 256, 128>}, {pipeline_mode = #tpu.pipeline_mode<synchronous>, transform_indices = @transform_7, window_bounds = array<i64: 1, 128>}, {pipeline_mode = #tpu.pipeline_mode<synchronous>, transform_indices = @transform_8, window_bounds = array<i64: 128, 128>}, {pipeline_mode = #tpu.pipeline_mode<synchronous>, transform_indices = @transform_9, window_bounds = array<i64: 1, 128>}, {pipeline_mode = #tpu.pipeline_mode<synchronous>, transform_indices = @transform_10, window_bounds = array<i64: 128, 128>}, {pipeline_mode = #tpu.pipeline_mode<synchronous>, transform_indices = @transform_11, window_bounds = array<i64: 1, 128>}, {pipeline_mode = #tpu.pipeline_mode<synchronous>, transform_indices = @transform_12, window_bounds = array<i64: 1, 128>}, {pipeline_mode = #tpu.pipeline_mode<synchronous>, transform_indices = @transform_13, window_bounds = array<i64: 1, 1>}, {transform_indices = @transform_14, window_bounds = array<i64: 8, 1>}]} {
    %c0 = arith.constant 0 : index
    %c0_0 = arith.constant 0 : index
    %0 = vector.load %arg1[%c0, %c0_0] : memref<8x32xf32, #tpu.memory_space<vmem>>, vector<8x32xf32>
    %1 = vector.extract_strided_slice %0 {offsets = [0, 0], sizes = [8, 8], strides = [1, 1]} : vector<8x32xf32> to vector<8x8xf32>
    %2 = vector.extract_strided_slice %0 {offsets = [0, 8], sizes = [8, 8], strides = [1, 1]} : vector<8x32xf32> to vector<8x8xf32>
    %3 = vector.extract_strided_slice %0 {offsets = [0, 16], sizes = [8, 8], strides = [1, 1]} : vector<8x32xf32> to vector<8x8xf32>
    %4 = vector.extract_strided_slice %0 {offsets = [0, 24], sizes = [8, 8], strides = [1, 1]} : vector<8x32xf32> to vector<8x8xf32>
    %c0_1 = arith.constant 0 : index
    %c0_2 = arith.constant 0 : index
    %5 = vector.load %arg2[%c0_1, %c0_2] : memref<8x256xf32, #tpu.memory_space<vmem>>, vector<8x256xf32>
    %6 = vector.extract_strided_slice %5 {offsets = [0, 0], sizes = [1, 256], strides = [1, 1]} : vector<8x256xf32> to vector<1x256xf32>
    %7 = vector.extract_strided_slice %1 {offsets = [0, 0], sizes = [8, 1], strides = [1, 1]} : vector<8x8xf32> to vector<8x1xf32>
    %8 = vector.extract_strided_slice %3 {offsets = [0, 0], sizes = [8, 1], strides = [1, 1]} : vector<8x8xf32> to vector<8x1xf32>
    %9 = vector.extract_strided_slice %1 {offsets = [0, 0], sizes = [8, 1], strides = [1, 1]} : vector<8x8xf32> to vector<8x1xf32>
    %10 = arith.subf %8, %9 : vector<8x1xf32>
    %11 = vector.broadcast %10 : vector<8x1xf32> to vector<8x256xf32>
    %12 = vector.broadcast %6 : vector<1x256xf32> to vector<8x256xf32>
    %13 = arith.mulf %11, %12 : vector<8x256xf32>
    %14 = vector.broadcast %7 : vector<8x1xf32> to vector<8x256xf32>
    %15 = arith.addf %14, %13 : vector<8x256xf32>
    %16 = vector.extract_strided_slice %2 {offsets = [0, 0], sizes = [8, 1], strides = [1, 1]} : vector<8x8xf32> to vector<8x1xf32>
    %17 = vector.extract_strided_slice %4 {offsets = [0, 0], sizes = [8, 1], strides = [1, 1]} : vector<8x8xf32> to vector<8x1xf32>
    %18 = vector.extract_strided_slice %2 {offsets = [0, 0], sizes = [8, 1], strides = [1, 1]} : vector<8x8xf32> to vector<8x1xf32>
    %19 = arith.subf %17, %18 : vector<8x1xf32>
    %20 = vector.broadcast %19 : vector<8x1xf32> to vector<8x256xf32>
    %21 = vector.broadcast %6 : vector<1x256xf32> to vector<8x256xf32>
    %22 = arith.mulf %20, %21 : vector<8x256xf32>
    %23 = vector.broadcast %16 : vector<8x1xf32> to vector<8x256xf32>
    %24 = arith.addf %23, %22 : vector<8x256xf32>
    %25 = vector.extract_strided_slice %5 {offsets = [1, 0], sizes = [1, 256], strides = [1, 1]} : vector<8x256xf32> to vector<1x256xf32>
    %26 = vector.extract_strided_slice %1 {offsets = [0, 1], sizes = [8, 1], strides = [1, 1]} : vector<8x8xf32> to vector<8x1xf32>
    %27 = vector.extract_strided_slice %3 {offsets = [0, 1], sizes = [8, 1], strides = [1, 1]} : vector<8x8xf32> to vector<8x1xf32>
    %28 = vector.extract_strided_slice %1 {offsets = [0, 1], sizes = [8, 1], strides = [1, 1]} : vector<8x8xf32> to vector<8x1xf32>
    %29 = arith.subf %27, %28 : vector<8x1xf32>
    %30 = vector.broadcast %29 : vector<8x1xf32> to vector<8x256xf32>
    %31 = vector.broadcast %25 : vector<1x256xf32> to vector<8x256xf32>
    %32 = arith.mulf %30, %31 : vector<8x256xf32>
    %33 = vector.broadcast %26 : vector<8x1xf32> to vector<8x256xf32>
    %34 = arith.addf %33, %32 : vector<8x256xf32>
    %35 = vector.extract_strided_slice %2 {offsets = [0, 1], sizes = [8, 1], strides = [1, 1]} : vector<8x8xf32> to vector<8x1xf32>
    %36 = vector.extract_strided_slice %4 {offsets = [0, 1], sizes = [8, 1], strides = [1, 1]} : vector<8x8xf32> to vector<8x1xf32>
    %37 = vector.extract_strided_slice %2 {offsets = [0, 1], sizes = [8, 1], strides = [1, 1]} : vector<8x8xf32> to vector<8x1xf32>
    %38 = arith.subf %36, %37 : vector<8x1xf32>
    %39 = vector.broadcast %38 : vector<8x1xf32> to vector<8x256xf32>
    %40 = vector.broadcast %25 : vector<1x256xf32> to vector<8x256xf32>
    %41 = arith.mulf %39, %40 : vector<8x256xf32>
    %42 = vector.broadcast %35 : vector<8x1xf32> to vector<8x256xf32>
    %43 = arith.addf %42, %41 : vector<8x256xf32>
    %44 = arith.mulf %15, %34 : vector<8x256xf32>
    %45 = arith.mulf %24, %43 : vector<8x256xf32>
    %46 = arith.subf %44, %45 : vector<8x256xf32>
    %47 = arith.mulf %15, %43 : vector<8x256xf32>
    %48 = arith.mulf %24, %34 : vector<8x256xf32>
    %49 = arith.addf %47, %48 : vector<8x256xf32>
    %50 = vector.extract_strided_slice %5 {offsets = [2, 0], sizes = [1, 256], strides = [1, 1]} : vector<8x256xf32> to vector<1x256xf32>
    %51 = vector.extract_strided_slice %1 {offsets = [0, 2], sizes = [8, 1], strides = [1, 1]} : vector<8x8xf32> to vector<8x1xf32>
    %52 = vector.extract_strided_slice %3 {offsets = [0, 2], sizes = [8, 1], strides = [1, 1]} : vector<8x8xf32> to vector<8x1xf32>
    %53 = vector.extract_strided_slice %1 {offsets = [0, 2], sizes = [8, 1], strides = [1, 1]} : vector<8x8xf32> to vector<8x1xf32>
    %54 = arith.subf %52, %53 : vector<8x1xf32>
    %55 = vector.broadcast %54 : vector<8x1xf32> to vector<8x256xf32>
    %56 = vector.broadcast %50 : vector<1x256xf32> to vector<8x256xf32>
    %57 = arith.mulf %55, %56 : vector<8x256xf32>
    %58 = vector.broadcast %51 : vector<8x1xf32> to vector<8x256xf32>
    %59 = arith.addf %58, %57 : vector<8x256xf32>
    %60 = vector.extract_strided_slice %2 {offsets = [0, 2], sizes = [8, 1], strides = [1, 1]} : vector<8x8xf32> to vector<8x1xf32>
    %61 = vector.extract_strided_slice %4 {offsets = [0, 2], sizes = [8, 1], strides = [1, 1]} : vector<8x8xf32> to vector<8x1xf32>
    %62 = vector.extract_strided_slice %2 {offsets = [0, 2], sizes = [8, 1], strides = [1, 1]} : vector<8x8xf32> to vector<8x1xf32>
    %63 = arith.subf %61, %62 : vector<8x1xf32>
    %64 = vector.broadcast %63 : vector<8x1xf32> to vector<8x256xf32>
    %65 = vector.broadcast %50 : vector<1x256xf32> to vector<8x256xf32>
    %66 = arith.mulf %64, %65 : vector<8x256xf32>
    %67 = vector.broadcast %60 : vector<8x1xf32> to vector<8x256xf32>
    %68 = arith.addf %67, %66 : vector<8x256xf32>
    %69 = arith.mulf %46, %59 : vector<8x256xf32>
    %70 = arith.mulf %49, %68 : vector<8x256xf32>
    %71 = arith.subf %69, %70 : vector<8x256xf32>
    %72 = arith.mulf %46, %68 : vector<8x256xf32>
    %73 = arith.mulf %49, %59 : vector<8x256xf32>
    %74 = arith.addf %72, %73 : vector<8x256xf32>
    %75 = vector.extract_strided_slice %5 {offsets = [3, 0], sizes = [1, 256], strides = [1, 1]} : vector<8x256xf32> to vector<1x256xf32>
    %76 = vector.extract_strided_slice %1 {offsets = [0, 3], sizes = [8, 1], strides = [1, 1]} : vector<8x8xf32> to vector<8x1xf32>
    %77 = vector.extract_strided_slice %3 {offsets = [0, 3], sizes = [8, 1], strides = [1, 1]} : vector<8x8xf32> to vector<8x1xf32>
    %78 = vector.extract_strided_slice %1 {offsets = [0, 3], sizes = [8, 1], strides = [1, 1]} : vector<8x8xf32> to vector<8x1xf32>
    %79 = arith.subf %77, %78 : vector<8x1xf32>
    %80 = vector.broadcast %79 : vector<8x1xf32> to vector<8x256xf32>
    %81 = vector.broadcast %75 : vector<1x256xf32> to vector<8x256xf32>
    %82 = arith.mulf %80, %81 : vector<8x256xf32>
    %83 = vector.broadcast %76 : vector<8x1xf32> to vector<8x256xf32>
    %84 = arith.addf %83, %82 : vector<8x256xf32>
    %85 = vector.extract_strided_slice %2 {offsets = [0, 3], sizes = [8, 1], strides = [1, 1]} : vector<8x8xf32> to vector<8x1xf32>
    %86 = vector.extract_strided_slice %4 {offsets = [0, 3], sizes = [8, 1], strides = [1, 1]} : vector<8x8xf32> to vector<8x1xf32>
    %87 = vector.extract_strided_slice %2 {offsets = [0, 3], sizes = [8, 1], strides = [1, 1]} : vector<8x8xf32> to vector<8x1xf32>
    %88 = arith.subf %86, %87 : vector<8x1xf32>
    %89 = vector.broadcast %88 : vector<8x1xf32> to vector<8x256xf32>
    %90 = vector.broadcast %75 : vector<1x256xf32> to vector<8x256xf32>
    %91 = arith.mulf %89, %90 : vector<8x256xf32>
    %92 = vector.broadcast %85 : vector<8x1xf32> to vector<8x256xf32>
    %93 = arith.addf %92, %91 : vector<8x256xf32>
    %94 = arith.mulf %71, %84 : vector<8x256xf32>
    %95 = arith.mulf %74, %93 : vector<8x256xf32>
    %96 = arith.subf %94, %95 : vector<8x256xf32>
    %97 = arith.mulf %71, %93 : vector<8x256xf32>
    %98 = arith.mulf %74, %84 : vector<8x256xf32>
    %99 = arith.addf %97, %98 : vector<8x256xf32>
    %100 = vector.extract_strided_slice %5 {offsets = [4, 0], sizes = [1, 256], strides = [1, 1]} : vector<8x256xf32> to vector<1x256xf32>
    %101 = vector.extract_strided_slice %1 {offsets = [0, 4], sizes = [8, 1], strides = [1, 1]} : vector<8x8xf32> to vector<8x1xf32>
    %102 = vector.extract_strided_slice %3 {offsets = [0, 4], sizes = [8, 1], strides = [1, 1]} : vector<8x8xf32> to vector<8x1xf32>
    %103 = vector.extract_strided_slice %1 {offsets = [0, 4], sizes = [8, 1], strides = [1, 1]} : vector<8x8xf32> to vector<8x1xf32>
    %104 = arith.subf %102, %103 : vector<8x1xf32>
    %105 = vector.broadcast %104 : vector<8x1xf32> to vector<8x256xf32>
    %106 = vector.broadcast %100 : vector<1x256xf32> to vector<8x256xf32>
    %107 = arith.mulf %105, %106 : vector<8x256xf32>
    %108 = vector.broadcast %101 : vector<8x1xf32> to vector<8x256xf32>
    %109 = arith.addf %108, %107 : vector<8x256xf32>
    %110 = vector.extract_strided_slice %2 {offsets = [0, 4], sizes = [8, 1], strides = [1, 1]} : vector<8x8xf32> to vector<8x1xf32>
    %111 = vector.extract_strided_slice %4 {offsets = [0, 4], sizes = [8, 1], strides = [1, 1]} : vector<8x8xf32> to vector<8x1xf32>
    %112 = vector.extract_strided_slice %2 {offsets = [0, 4], sizes = [8, 1], strides = [1, 1]} : vector<8x8xf32> to vector<8x1xf32>
    %113 = arith.subf %111, %112 : vector<8x1xf32>
    %114 = vector.broadcast %113 : vector<8x1xf32> to vector<8x256xf32>
    %115 = vector.broadcast %100 : vector<1x256xf32> to vector<8x256xf32>
    %116 = arith.mulf %114, %115 : vector<8x256xf32>
    %117 = vector.broadcast %110 : vector<8x1xf32> to vector<8x256xf32>
    %118 = arith.addf %117, %116 : vector<8x256xf32>
    %119 = arith.mulf %96, %109 : vector<8x256xf32>
    %120 = arith.mulf %99, %118 : vector<8x256xf32>
    %121 = arith.subf %119, %120 : vector<8x256xf32>
    %122 = arith.mulf %96, %118 : vector<8x256xf32>
    %123 = arith.mulf %99, %109 : vector<8x256xf32>
    %124 = arith.addf %122, %123 : vector<8x256xf32>
    %125 = vector.extract_strided_slice %5 {offsets = [5, 0], sizes = [1, 256], strides = [1, 1]} : vector<8x256xf32> to vector<1x256xf32>
    %126 = vector.extract_strided_slice %1 {offsets = [0, 5], sizes = [8, 1], strides = [1, 1]} : vector<8x8xf32> to vector<8x1xf32>
    %127 = vector.extract_strided_slice %3 {offsets = [0, 5], sizes = [8, 1], strides = [1, 1]} : vector<8x8xf32> to vector<8x1xf32>
    %128 = vector.extract_strided_slice %1 {offsets = [0, 5], sizes = [8, 1], strides = [1, 1]} : vector<8x8xf32> to vector<8x1xf32>
    %129 = arith.subf %127, %128 : vector<8x1xf32>
    %130 = vector.broadcast %129 : vector<8x1xf32> to vector<8x256xf32>
    %131 = vector.broadcast %125 : vector<1x256xf32> to vector<8x256xf32>
    %132 = arith.mulf %130, %131 : vector<8x256xf32>
    %133 = vector.broadcast %126 : vector<8x1xf32> to vector<8x256xf32>
    %134 = arith.addf %133, %132 : vector<8x256xf32>
    %135 = vector.extract_strided_slice %2 {offsets = [0, 5], sizes = [8, 1], strides = [1, 1]} : vector<8x8xf32> to vector<8x1xf32>
    %136 = vector.extract_strided_slice %4 {offsets = [0, 5], sizes = [8, 1], strides = [1, 1]} : vector<8x8xf32> to vector<8x1xf32>
    %137 = vector.extract_strided_slice %2 {offsets = [0, 5], sizes = [8, 1], strides = [1, 1]} : vector<8x8xf32> to vector<8x1xf32>
    %138 = arith.subf %136, %137 : vector<8x1xf32>
    %139 = vector.broadcast %138 : vector<8x1xf32> to vector<8x256xf32>
    %140 = vector.broadcast %125 : vector<1x256xf32> to vector<8x256xf32>
    %141 = arith.mulf %139, %140 : vector<8x256xf32>
    %142 = vector.broadcast %135 : vector<8x1xf32> to vector<8x256xf32>
    %143 = arith.addf %142, %141 : vector<8x256xf32>
    %144 = arith.mulf %121, %134 : vector<8x256xf32>
    %145 = arith.mulf %124, %143 : vector<8x256xf32>
    %146 = arith.subf %144, %145 : vector<8x256xf32>
    %147 = arith.mulf %121, %143 : vector<8x256xf32>
    %148 = arith.mulf %124, %134 : vector<8x256xf32>
    %149 = arith.addf %147, %148 : vector<8x256xf32>
    %150 = vector.extract_strided_slice %5 {offsets = [6, 0], sizes = [1, 256], strides = [1, 1]} : vector<8x256xf32> to vector<1x256xf32>
    %151 = vector.extract_strided_slice %1 {offsets = [0, 6], sizes = [8, 1], strides = [1, 1]} : vector<8x8xf32> to vector<8x1xf32>
    %152 = vector.extract_strided_slice %3 {offsets = [0, 6], sizes = [8, 1], strides = [1, 1]} : vector<8x8xf32> to vector<8x1xf32>
    %153 = vector.extract_strided_slice %1 {offsets = [0, 6], sizes = [8, 1], strides = [1, 1]} : vector<8x8xf32> to vector<8x1xf32>
    %154 = arith.subf %152, %153 : vector<8x1xf32>
    %155 = vector.broadcast %154 : vector<8x1xf32> to vector<8x256xf32>
    %156 = vector.broadcast %150 : vector<1x256xf32> to vector<8x256xf32>
    %157 = arith.mulf %155, %156 : vector<8x256xf32>
    %158 = vector.broadcast %151 : vector<8x1xf32> to vector<8x256xf32>
    %159 = arith.addf %158, %157 : vector<8x256xf32>
    %160 = vector.extract_strided_slice %2 {offsets = [0, 6], sizes = [8, 1], strides = [1, 1]} : vector<8x8xf32> to vector<8x1xf32>
    %161 = vector.extract_strided_slice %4 {offsets = [0, 6], sizes = [8, 1], strides = [1, 1]} : vector<8x8xf32> to vector<8x1xf32>
    %162 = vector.extract_strided_slice %2 {offsets = [0, 6], sizes = [8, 1], strides = [1, 1]} : vector<8x8xf32> to vector<8x1xf32>
    %163 = arith.subf %161, %162 : vector<8x1xf32>
    %164 = vector.broadcast %163 : vector<8x1xf32> to vector<8x256xf32>
    %165 = vector.broadcast %150 : vector<1x256xf32> to vector<8x256xf32>
    %166 = arith.mulf %164, %165 : vector<8x256xf32>
    %167 = vector.broadcast %160 : vector<8x1xf32> to vector<8x256xf32>
    %168 = arith.addf %167, %166 : vector<8x256xf32>
    %169 = arith.mulf %146, %159 : vector<8x256xf32>
    %170 = arith.mulf %149, %168 : vector<8x256xf32>
    %171 = arith.subf %169, %170 : vector<8x256xf32>
    %172 = arith.mulf %146, %168 : vector<8x256xf32>
    %173 = arith.mulf %149, %159 : vector<8x256xf32>
    %174 = arith.addf %172, %173 : vector<8x256xf32>
    %175 = vector.extract_strided_slice %5 {offsets = [7, 0], sizes = [1, 256], strides = [1, 1]} : vector<8x256xf32> to vector<1x256xf32>
    %176 = vector.extract_strided_slice %1 {offsets = [0, 7], sizes = [8, 1], strides = [1, 1]} : vector<8x8xf32> to vector<8x1xf32>
    %177 = vector.extract_strided_slice %3 {offsets = [0, 7], sizes = [8, 1], strides = [1, 1]} : vector<8x8xf32> to vector<8x1xf32>
    %178 = vector.extract_strided_slice %1 {offsets = [0, 7], sizes = [8, 1], strides = [1, 1]} : vector<8x8xf32> to vector<8x1xf32>
    %179 = arith.subf %177, %178 : vector<8x1xf32>
    %180 = vector.broadcast %179 : vector<8x1xf32> to vector<8x256xf32>
    %181 = vector.broadcast %175 : vector<1x256xf32> to vector<8x256xf32>
    %182 = arith.mulf %180, %181 : vector<8x256xf32>
    %183 = vector.broadcast %176 : vector<8x1xf32> to vector<8x256xf32>
    %184 = arith.addf %183, %182 : vector<8x256xf32>
    %185 = vector.extract_strided_slice %2 {offsets = [0, 7], sizes = [8, 1], strides = [1, 1]} : vector<8x8xf32> to vector<8x1xf32>
    %186 = vector.extract_strided_slice %4 {offsets = [0, 7], sizes = [8, 1], strides = [1, 1]} : vector<8x8xf32> to vector<8x1xf32>
    %187 = vector.extract_strided_slice %2 {offsets = [0, 7], sizes = [8, 1], strides = [1, 1]} : vector<8x8xf32> to vector<8x1xf32>
    %188 = arith.subf %186, %187 : vector<8x1xf32>
    %189 = vector.broadcast %188 : vector<8x1xf32> to vector<8x256xf32>
    %190 = vector.broadcast %175 : vector<1x256xf32> to vector<8x256xf32>
    %191 = arith.mulf %189, %190 : vector<8x256xf32>
    %192 = vector.broadcast %185 : vector<8x1xf32> to vector<8x256xf32>
    %193 = arith.addf %192, %191 : vector<8x256xf32>
    %194 = arith.mulf %171, %184 : vector<8x256xf32>
    %195 = arith.mulf %174, %193 : vector<8x256xf32>
    %196 = arith.subf %194, %195 : vector<8x256xf32>
    %197 = arith.mulf %171, %193 : vector<8x256xf32>
    %198 = arith.mulf %174, %184 : vector<8x256xf32>
    %199 = arith.addf %197, %198 : vector<8x256xf32>
    %200 = tpu.concatenate %196, %199 in 0 : vector<8x256xf32>, vector<8x256xf32> -> vector<16x256xf32>
    %c0_3 = arith.constant 0 : index
    %c0_4 = arith.constant 0 : index
    %201 = vector.load %arg3[%c0_3, %c0_4] : memref<256x256xf32, #tpu.memory_space<vmem>>, vector<256x256xf32>
    %cst = arith.constant dense<0.000000e+00> : vector<16x256xf32>
    %202 = tpu.matmul %200, %201, %cst {dimension_numbers = #tpu.dot_dimension_numbers<[1], [0], [0], [1], [0, 0, 1, 1], [], []>} : vector<16x256xf32>, vector<256x256xf32>, vector<16x256xf32> -> vector<16x256xf32>
    %203 = vector.extract_strided_slice %202 {offsets = [0, 0], sizes = [8, 256], strides = [1, 1]} : vector<16x256xf32> to vector<8x256xf32>
    %204 = vector.extract_strided_slice %202 {offsets = [8, 0], sizes = [8, 256], strides = [1, 1]} : vector<16x256xf32> to vector<8x256xf32>
    %c0_5 = arith.constant 0 : index
    %c0_6 = arith.constant 0 : index
    %205 = vector.load %arg4[%c0_5, %c0_6] : memref<256x256xf32, #tpu.memory_space<vmem>>, vector<256x256xf32>
    %cst_7 = arith.constant dense<0.000000e+00> : vector<8x256xf32>
    %206 = tpu.matmul %199, %205, %cst_7 {dimension_numbers = #tpu.dot_dimension_numbers<[1], [0], [0], [1], [0, 0, 1, 1], [], []>} : vector<8x256xf32>, vector<256x256xf32>, vector<8x256xf32> -> vector<8x256xf32>
    %207 = arith.mulf %196, %203 : vector<8x256xf32>
    %208 = arith.mulf %199, %204 : vector<8x256xf32>
    %209 = arith.addf %207, %208 : vector<8x256xf32>
    %cst_8 = arith.constant 2.000000e+00 : f32
    %210 = vector.broadcast %cst_8 : f32 to vector<8x256xf32>
    %211 = arith.mulf %210, %196 : vector<8x256xf32>
    %212 = arith.mulf %211, %206 : vector<8x256xf32>
    %213 = arith.addf %209, %212 : vector<8x256xf32>
    %cst_9 = arith.constant dense<0.000000e+00> : vector<8xf32>
    %214 = vector.multi_reduction <add>, %213, %cst_9 [1] : vector<8x256xf32> to vector<8xf32>
    %215 = vector.shape_cast %214 : vector<8xf32> to vector<8x1xf32>
    %c0_10 = arith.constant 0 : index
    %c0_11 = arith.constant 0 : index
    %216 = vector.load %arg5[%c0_10, %c0_11] : memref<1x256xf32, #tpu.memory_space<vmem>>, vector<1x256xf32>
    %217 = vector.broadcast %215 : vector<8x1xf32> to vector<8x256xf32>
    %218 = vector.broadcast %216 : vector<1x256xf32> to vector<8x256xf32>
    %219 = arith.mulf %217, %218 : vector<8x256xf32>
    %c0_12 = arith.constant 0 : index
    %c0_13 = arith.constant 0 : index
    %220 = vector.load %arg6[%c0_12, %c0_13] : memref<1x256xf32, #tpu.memory_space<vmem>>, vector<1x256xf32>
    %221 = vector.broadcast %220 : vector<1x256xf32> to vector<8x256xf32>
    %222 = arith.addf %219, %221 : vector<8x256xf32>
    %cst_14 = arith.constant 0.000000e+00 : f32
    %223 = vector.broadcast %cst_14 : f32 to vector<8x256xf32>
    %224 = arith.maximumf %222, %223 : vector<8x256xf32>
    %225 = arith.truncf %224 : vector<8x256xf32> to vector<8x256xbf16>
    %c0_15 = arith.constant 0 : index
    %c0_16 = arith.constant 0 : index
    %226 = vector.load %arg7[%c0_15, %c0_16] : memref<256x128xbf16, #tpu.memory_space<vmem>>, vector<256x128xbf16>
    %cst_17 = arith.constant dense<0.000000e+00> : vector<8x128xf32>
    %227 = tpu.matmul %225, %226, %cst_17 {dimension_numbers = #tpu.dot_dimension_numbers<[1], [0], [0], [1], [0, 0, 1, 1], [], []>} : vector<8x256xbf16>, vector<256x128xbf16>, vector<8x128xf32> -> vector<8x128xf32>
    %c0_18 = arith.constant 0 : index
    %c0_19 = arith.constant 0 : index
    %228 = vector.load %arg8[%c0_18, %c0_19] : memref<1x128xf32, #tpu.memory_space<vmem>>, vector<1x128xf32>
    %229 = vector.broadcast %228 : vector<1x128xf32> to vector<8x128xf32>
    %230 = arith.addf %227, %229 : vector<8x128xf32>
    %cst_20 = arith.constant 0.000000e+00 : f32
    %231 = vector.broadcast %cst_20 : f32 to vector<8x128xf32>
    %232 = arith.maximumf %230, %231 : vector<8x128xf32>
    %233 = arith.truncf %232 : vector<8x128xf32> to vector<8x128xbf16>
    %c0_21 = arith.constant 0 : index
    %c0_22 = arith.constant 0 : index
    %234 = vector.load %arg9[%c0_21, %c0_22] : memref<128x128xbf16, #tpu.memory_space<vmem>>, vector<128x128xbf16>
    %cst_23 = arith.constant dense<0.000000e+00> : vector<8x128xf32>
    %235 = tpu.matmul %233, %234, %cst_23 {dimension_numbers = #tpu.dot_dimension_numbers<[1], [0], [0], [1], [0, 0, 1, 1], [], []>} : vector<8x128xbf16>, vector<128x128xbf16>, vector<8x128xf32> -> vector<8x128xf32>
    %c0_24 = arith.constant 0 : index
    %c0_25 = arith.constant 0 : index
    %236 = vector.load %arg10[%c0_24, %c0_25] : memref<1x128xf32, #tpu.memory_space<vmem>>, vector<1x128xf32>
    %237 = vector.broadcast %236 : vector<1x128xf32> to vector<8x128xf32>
    %238 = arith.addf %235, %237 : vector<8x128xf32>
    %cst_26 = arith.constant 0.000000e+00 : f32
    %239 = vector.broadcast %cst_26 : f32 to vector<8x128xf32>
    %240 = arith.maximumf %238, %239 : vector<8x128xf32>
    %241 = arith.truncf %240 : vector<8x128xf32> to vector<8x128xbf16>
    %c0_27 = arith.constant 0 : index
    %c0_28 = arith.constant 0 : index
    %242 = vector.load %arg11[%c0_27, %c0_28] : memref<128x128xbf16, #tpu.memory_space<vmem>>, vector<128x128xbf16>
    %cst_29 = arith.constant dense<0.000000e+00> : vector<8x128xf32>
    %243 = tpu.matmul %241, %242, %cst_29 {dimension_numbers = #tpu.dot_dimension_numbers<[1], [0], [0], [1], [0, 0, 1, 1], [], []>} : vector<8x128xbf16>, vector<128x128xbf16>, vector<8x128xf32> -> vector<8x128xf32>
    %c0_30 = arith.constant 0 : index
    %c0_31 = arith.constant 0 : index
    %244 = vector.load %arg12[%c0_30, %c0_31] : memref<1x128xf32, #tpu.memory_space<vmem>>, vector<1x128xf32>
    %245 = vector.broadcast %244 : vector<1x128xf32> to vector<8x128xf32>
    %246 = arith.addf %243, %245 : vector<8x128xf32>
    %cst_32 = arith.constant 0.000000e+00 : f32
    %247 = vector.broadcast %cst_32 : f32 to vector<8x128xf32>
    %248 = arith.maximumf %246, %247 : vector<8x128xf32>
    %c0_33 = arith.constant 0 : index
    %c0_34 = arith.constant 0 : index
    %249 = vector.load %arg13[%c0_33, %c0_34] : memref<1x128xf32, #tpu.memory_space<vmem>>, vector<1x128xf32>
    %250 = vector.broadcast %249 : vector<1x128xf32> to vector<8x128xf32>
    %251 = arith.mulf %248, %250 : vector<8x128xf32>
    %cst_35 = arith.constant dense<0.000000e+00> : vector<8xf32>
    %252 = vector.multi_reduction <add>, %251, %cst_35 [1] : vector<8x128xf32> to vector<8xf32>
    %253 = vector.shape_cast %252 : vector<8xf32> to vector<8x1xf32>
    %c0_36 = arith.constant 0 : index
    %c0_37 = arith.constant 0 : index
    %254 = vector.load %arg14[%c0_36, %c0_37] : memref<1x1xf32, #tpu.memory_space<vmem>>, vector<1x1xf32>
    %255 = vector.broadcast %254 : vector<1x1xf32> to vector<8x1xf32>
    %256 = arith.addf %253, %255 : vector<8x1xf32>
    %c0_38 = arith.constant 0 : index
    %c0_39 = arith.constant 0 : index
    %257 = vector.load %arg15[%c0_38, %c0_39] : memref<8x1xf32, #tpu.memory_space<vmem>>, vector<8x1xf32>
    tpu.vector_store %arg15[%c0_38, %c0_39], %256 {strides = array<i32>} : memref<8x1xf32, #tpu.memory_space<vmem>>, vector<8x1xf32>,
    return
  }
  func.func @transform_0(%arg0: i32) -> (i32, i32) {
    %c0_i32 = arith.constant 0 : i32
    %c0_i32_0 = arith.constant 0 : i32
    return %arg0, %c0_i32 : i32, i32
  }
  func.func @transform_1(%arg0: i32) -> (i32, i32) {
    %c0_i32 = arith.constant 0 : i32
    %c0_i32_0 = arith.constant 0 : i32
    %c0_i32_1 = arith.constant 0 : i32
    return %c0_i32, %c0_i32_0 : i32, i32
  }
  func.func @transform_2(%arg0: i32) -> (i32, i32) {
    %c0_i32 = arith.constant 0 : i32
    %c0_i32_0 = arith.constant 0 : i32
    %c0_i32_1 = arith.constant 0 : i32
    return %c0_i32, %c0_i32_0 : i32, i32
  }
  func.func @transform_3(%arg0: i32) -> (i32, i32) {
    %c0_i32 = arith.constant 0 : i32
    %c0_i32_0 = arith.constant 0 : i32
    %c0_i32_1 = arith.constant 0 : i32
    return %c0_i32, %c0_i32_0 : i32, i32
  }
  func.func @transform_4(%arg0: i32) -> (i32, i32) {
    %c0_i32 = arith.constant 0 : i32
    %c0_i32_0 = arith.constant 0 : i32
    %c0_i32_1 = arith.constant 0 : i32
    return %c0_i32, %c0_i32_0 : i32, i32
  }
  func.func @transform_5(%arg0: i32) -> (i32, i32) {
    %c0_i32 = arith.constant 0 : i32
    %c0_i32_0 = arith.constant 0 : i32
    %c0_i32_1 = arith.constant 0 : i32
    return %c0_i32, %c0_i32_0 : i32, i32
  }
  func.func @transform_6(%arg0: i32) -> (i32, i32) {
    %c0_i32 = arith.constant 0 : i32
    %c0_i32_0 = arith.constant 0 : i32
    %c0_i32_1 = arith.constant 0 : i32
    return %c0_i32, %c0_i32_0 : i32, i32
  }
  func.func @transform_7(%arg0: i32) -> (i32, i32) {
    %c0_i32 = arith.constant 0 : i32
    %c0_i32_0 = arith.constant 0 : i32
    %c0_i32_1 = arith.constant 0 : i32
    return %c0_i32, %c0_i32_0 : i32, i32
  }
  func.func @transform_8(%arg0: i32) -> (i32, i32) {
    %c0_i32 = arith.constant 0 : i32
    %c0_i32_0 = arith.constant 0 : i32
    %c0_i32_1 = arith.constant 0 : i32
    return %c0_i32, %c0_i32_0 : i32, i32
  }
  func.func @transform_9(%arg0: i32) -> (i32, i32) {
    %c0_i32 = arith.constant 0 : i32
    %c0_i32_0 = arith.constant 0 : i32
    %c0_i32_1 = arith.constant 0 : i32
    return %c0_i32, %c0_i32_0 : i32, i32
  }
  func.func @transform_10(%arg0: i32) -> (i32, i32) {
    %c0_i32 = arith.constant 0 : i32
    %c0_i32_0 = arith.constant 0 : i32
    %c0_i32_1 = arith.constant 0 : i32
    return %c0_i32, %c0_i32_0 : i32, i32
  }
  func.func @transform_11(%arg0: i32) -> (i32, i32) {
    %c0_i32 = arith.constant 0 : i32
    %c0_i32_0 = arith.constant 0 : i32
    %c0_i32_1 = arith.constant 0 : i32
    return %c0_i32, %c0_i32_0 : i32, i32
  }
  func.func @transform_12(%arg0: i32) -> (i32, i32) {
    %c0_i32 = arith.constant 0 : i32
    %c0_i32_0 = arith.constant 0 : i32
    %c0_i32_1 = arith.constant 0 : i32
    return %c0_i32, %c0_i32_0 : i32, i32
  }
  func.func @transform_13(%arg0: i32) -> (i32, i32) {
    %c0_i32 = arith.constant 0 : i32
    %c0_i32_0 = arith.constant 0 : i32
    %c0_i32_1 = arith.constant 0 : i32
    return %c0_i32, %c0_i32_0 : i32, i32
  }
  func.func @transform_14(%arg0: i32) -> (i32, i32) {
    %c0_i32 = arith.constant 0 : i32
    %c0_i32_0 = arith.constant 0 : i32
    return %arg0, %c0_i32 : i32, i32
  }
}

</mosaic_0001>

<bundles_post_ra>
// kernel: qcnn_forward.3
= control target key start
LH: loop header
LB: loop body
LE: loop exit
PB: predicated region body
PF: predicated region fallthrough
CT: control target
= control target key end

     0   :  { %s1738_s0 = inlined_call_operand.vmem [shape: f32[8,32], index: 0, kind: input, shape index: {}]   ;;  %s1739_s1 = inlined_call_operand.vmem [shape: f32[8,256], index: 1, kind: input, shape index: {}]   ;;  %s1740_s2 = inlined_call_operand.hbm [shape: f32[256,256], index: 2, kind: input, shape index: {}]   ;;  %s1741_s3 = inlined_call_operand.hbm [shape: f32[256,256], index: 3, kind: input, shape index: {}]   ;;  %s1742_s4 = inlined_call_operand.vmem [shape: f32[1,256], index: 4, kind: input, shape index: {}]   ;;  %s1743_s5 = inlined_call_operand.vmem [shape: f32[1,256], index: 5, kind: input, shape index: {}]   ;;  %s1744_s6 = inlined_call_operand.vmem [shape: bf16[256,128], index: 6, kind: input, shape index: {}]   ;;  %s1745_s7 = inlined_call_operand.vmem [shape: f32[1,128], index: 7, kind: input, shape index: {}]   ;;  %s1746_s8 = inlined_call_operand.vmem [shape: bf16[128,128], index: 8, kind: input, shape index: {}]   ;;  %s1747_s9 = inlined_call_operand.vmem [shape: f32[1,128], index: 9, kind: input, shape index: {}]   ;;  %s1748_s10 = inlined_call_operand.vmem [shape: bf16[128,128], index: 10, kind: input, shape index: {}]   ;;  %s1749_s11 = inlined_call_operand.vmem [shape: f32[1,128], index: 11, kind: input, shape index: {}]   ;;  %s1750_s12 = inlined_call_operand.vmem [shape: f32[1,128], index: 12, kind: input, shape index: {}]   ;;  %s1751_s13 = inlined_call_operand.<no memory space> [shape: f32[1,1], index: 13, kind: input, shape index: {}]   ;;  %s1752_s14 = inlined_call_operand.vmem [shape: f32[8,1], index: 14, kind: output, shape index: {}]  }
   0x1   :  { %v19_v0 = vstv %s1751_s13 }
   0x2   :  { %20 = vst [vmem:[#allocation2] sm:$0x1] %v19_v0 }
   0x3   :  { %21 = vsyncpa [#allocation4], 0  ;;  %s31_s17 = sshll.u32 %s1740_s2, 4  ;;  %s32_s17 = int_to_ptr.hbm [resolvable:$true] %s31_s17 }
   0x4   :  { %22 = vsyncpa [#allocation6], 0  ;;  %s1348_s18 = smov [#allocation3]   ;;  %s44_s22 = sshll.u32 %s1741_s3, 4  ;;  %s45_s22 = int_to_ptr.hbm [resolvable:$true] %s44_s22 }
   0x5   :  { %s33_s19 = sshll.u32 %s1348_s18, 4  ;;  %s1349_s23 = smov 256   ;;  %s34_s19 = int_to_ptr.vmem [resolvable:$true] %s33_s19 }
   0x6   :  { %s1350_s24 = smov 16   ;;  %s1351_s13 = smov [#allocation5]  }
   0x7   :  { %39 = dma.hbm_to_vmem [thread:$0]  %s32_s17, 8192, %s34_s19, [#allocation4], %s1349_s23, %s1349_s23, %s1350_s24  }
   0x8   :  { %s46_s25 = sshll.u32 %s1351_s13, 4  ;;  %s47_s25 = int_to_ptr.vmem [resolvable:$true] %s46_s25 }
   0x9   :  { %52 = dma.hbm_to_vmem [thread:$0]  %s45_s22, 8192, %s47_s25, [#allocation6], %s1349_s23, %s1349_s23, %s1350_s24  }
   0xa   :  { %1344 = dma.done.wait [#allocation4], 8192  }
   0xb   :  { %1345 = vsyncadd [#allocation4], 4294959104 }
   0xc   :  { %1346 = dma.done.wait [#allocation6], 8192  }
   0xd   :  { %1347 = vsyncadd [#allocation6], 4294959104  ;;  %v1352_v1 = vmov 0   ;;  %v1353_v2 = vmov 8   ;;  %v1354_v3 = vmov 9   ;;  %v1471_v4 = vld [vmem:[%s1738_s0] sm:$0xff] }
   0xe   :  { %1258 = vset.pattern.permute.xlu2 %v1352_v1  ;;  %1259 = vset.pattern.permute.xlu1 %v1353_v2  ;;  %v1355_v5 = vmov 1   ;;  %v1356_v6 = vmov 2   ;;  %v1357_v7 = vmov 5   ;;  %v1358_v8 = vmov 10   ;;  %v412_v48 = vld [vmem:[#allocation3 + $0xf0] sm:$0xff]  ;;  %v413_v50 = vld [vmem:[#allocation3 + $0xf8] sm:$0xff] }
   0xf   :  { %1261 = vset.pattern.permute.xlu0 %v1354_v3  ;;  %99 = vperm.xlu2 %1258, %v1471_v4   ;;  %v1359_v9 = vmov 11   ;;  %v1360_v10 = vmov 3   ;;  %v1361_v11 = vmov 4   ;;  %v1362_v12 = vmov 12   ;;  %v444_v49 = vld [vmem:[#allocation3 + $0x1f0] sm:$0xff]  ;;  %v445_v51 = vld [vmem:[#allocation3 + $0x1f8] sm:$0xff] }
  0x10   :  { %85 = vrot.lane.b32.xlu0 %v1471_v4, %s1350_s24  ;;  %111 = vperm.xlu1 %1259, %v1471_v4   ;;  %v1363_v13 = vmov 13   ;;  %v1364_v14 = vmov 6   ;;  %v1365_v15 = vmov 24   ;;  %v1366_v16 = vmov 25   ;;  %v410_v52 = vld [vmem:[#allocation3 + $0xe0] sm:$0xff]  ;;  %v411_v54 = vld [vmem:[#allocation3 + $0xe8] sm:$0xff] }
  0x11   :  { %v1367_v17 = vmov 16   ;;  %v1368_v20 = vmov 26   ;;  %v1369_v21 = vmov 17   ;;  %v1370_v22 = vmov 19   ;;  %446 = vmatpush.msra.mxu0 %v412_v48  ;;  %469 = vmatpush.msra.mxu1 %v444_v49  ;;  %v442_v53 = vld [vmem:[#allocation3 + $0x1e0] sm:$0xff]  ;;  %v443_v55 = vld [vmem:[#allocation3 + $0x1e8] sm:$0xff] }
  0x12   :  { %v1371_v23 = vmov 20   ;;  %v1372_v24 = vmov 18   ;;  %v1373_v25 = vmov 28   ;;  %v1374_v26 = vmov 29   ;;  %492 = vmatpush.msra.mxu2 %v413_v50  ;;  %515 = vmatpush.msra.mxu3 %v445_v51  ;;  %v408_v58 = vld [vmem:[#allocation3 + $0xd0] sm:$0xff]  ;;  %v409_v60 = vld [vmem:[#allocation3 + $0xd8] sm:$0xff] }
  0x13   :  { %v1375_v27 = vmov 27   ;;  %v1376_v28 = vmov 14   ;;  %v1377_v29 = vmov 22   ;;  %v1378_v30 = vmov 21   ;;  %447 = vmatpush.msra.mxu0 %v410_v52  ;;  %470 = vmatpush.msra.mxu1 %v442_v53  ;;  %v440_v59 = vld [vmem:[#allocation3 + $0x1d0] sm:$0xff]  ;;  %v441_v61 = vld [vmem:[#allocation3 + $0x1d8] sm:$0xff] }
  0x14   :  { %v1379_v31 = vmov 15   ;;  %v1380_v32 = vmov 31   ;;  %v1381_v33 = vmov 30   ;;  %v1382_v35 = vmov 23   ;;  %493 = vmatpush.msra.mxu2 %v411_v54  ;;  %516 = vmatpush.msra.mxu3 %v443_v55  ;;  %v406_v62 = vld [vmem:[#allocation3 + $0xc0] sm:$0xff]  ;;  %v407_v0 = vld [vmem:[#allocation3 + $0xc8] sm:$0xff] }
  0x15   :  { %v1383_v37 = vmov 7   ;;  %448 = vmatpush.msra.mxu0 %v408_v58  ;;  %471 = vmatpush.msra.mxu1 %v440_v59  ;;  %v438_v63 = vld [vmem:[#allocation3 + $0x1c0] sm:$0xff]  ;;  %v439_v2 = vld [vmem:[#allocation3 + $0x1c8] sm:$0xff]  ;;  %v404_v3 = vld [vmem:[#allocation3 + $0xb0] sm:$0xff]  ;;  %vm1054_vm0 = vcmask 7168  }
  0x16   :  { %494 = vmatpush.msra.mxu2 %v409_v60  ;;  %517 = vmatpush.msra.mxu3 %v441_v61  ;;  %v429_v49 = vld [vmem:[#allocation3 + $0x178] sm:$0xff]  ;;  %v394_v52 = vld [vmem:[#allocation3 + $0x60] sm:$0xff]  ;;  %v395_v54 = vld [vmem:[#allocation3 + $0x68] sm:$0xff] }
  0x17   :  { %1260 = vset.pattern.permute.xlu2 %v1355_v5  ;;  %449 = vmatpush.msra.mxu0 %v406_v62  ;;  %v405_v5 = vld [vmem:[#allocation3 + $0xb8] sm:$0xff]  ;;  %v426_v53 = vld [vmem:[#allocation3 + $0x160] sm:$0xff] }
  0x18   :  { %137 = vperm.xlu0 %1261, %v1471_v4   ;;  %125 = vperm.xlu2 %1260, %v1471_v4  }
  0x19   :  { %1262 = vset.pattern.permute.xlu1 %v1356_v6  ;;  %472 = vmatpush.msra.mxu1 %v438_v63  ;;  %v1522_v6 = vld [vmem:[%s1739_s1] sm:$0xff] }
  0x1a   :  { %163 = vperm.xlu1 %1262, %v1471_v4   ;;  %495 = vmatpush.msra.mxu2 %v407_v0  ;;  %v158_v55 = vperm.slane %v1522_v6, 2 }
  0x1b   :  { %518 = vmatpush.msra.mxu3 %v439_v2  ;;  %450 = vmatpush.msra.mxu0 %v404_v3  ;;  %v424_v2 = vld [vmem:[#allocation3 + $0x150] sm:$0xff] }
  0x1c   :  { %496 = vmatpush.msra.mxu2 %v405_v5 }
  0x20   :  { %1268 = vset.pattern.permute.xlu0 %v1357_v7  ;;  %1263 = vset.pattern.permute.xlu2 %v1358_v8  ;;  %v1527_v7 = vld [vmem:[%s1739_s1 + $0x8] sm:$0xff]  ;;  %v437_v8 = vld [vmem:[#allocation3 + $0x1b8] sm:$0xff] }
  0x21   :  { %277 = vperm.xlu0 %1268, %v1471_v4   ;;  %175 = vperm.xlu2 %1263, %v1471_v4   ;;  %v159_v58 = vperm.slane %v1527_v7, 2 }
  0x22   :  { %1265 = vset.pattern.permute.xlu1 %v1359_v9  ;;  %519 = vmatpush.msra.mxu3 %v437_v8  ;;  %v402_v9 = vld [vmem:[#allocation3 + $0xa0] sm:$0xff] }
  0x23   :  { %213 = vperm.xlu1 %1265, %v1471_v4   ;;  %451 = vmatpush.msra.mxu0 %v402_v9 }
  0x29   :  { %1264 = vset.pattern.permute.xlu2 %v1360_v10  ;;  %1271 = vset.pattern.permute.xlu0 %v1367_v17  ;;  %v434_v10 = vld [vmem:[#allocation3 + $0x1a0] sm:$0xff] }
  0x2a   :  { %201 = vperm.xlu2 %1264, %v1471_v4  }
  0x2b   :  { %1266 = vset.pattern.permute.xlu1 %v1361_v11  ;;  %v403_v11 = vld [vmem:[#allocation3 + $0xa8] sm:$0xff] }
  0x2c   :  { %239 = vperm.xlu1 %1266, %v1471_v4   ;;  %497 = vmatpush.msra.mxu2 %v403_v11  ;;  %v425_v11 = vld [vmem:[#allocation3 + $0x158] sm:$0xff] }
  0x32   :  { %1267 = vset.pattern.permute.xlu2 %v1362_v12  ;;  %v94_v12 = vperm.slane %v1522_v6, 0 }
  0x33   :  { %251 = vperm.xlu2 %1267, %v1471_v4  }
  0x34   :  { %1269 = vset.pattern.permute.xlu1 %v1363_v13  ;;  %v95_v13 = vperm.slane %v1527_v7, 0 }
  0x35   :  { %289 = vperm.xlu1 %1269, %v1471_v4  }
  0x3b   :  { %1270 = vset.pattern.permute.xlu2 %v1364_v14  ;;  %v435_v14 = vld [vmem:[#allocation3 + $0x1a8] sm:$0xff] }
  0x3c   :  { %315 = vperm.xlu2 %1270, %v1471_v4   ;;  %520 = vmatpush.msra.mxu3 %v435_v14  ;;  %v422_v14 = vld [vmem:[#allocation3 + $0x140] sm:$0xff] }
  0x3d   :  { %1272 = vset.pattern.permute.xlu1 %v1365_v15  ;;  %v400_v15 = vld [vmem:[#allocation3 + $0x90] sm:$0xff] }
  0x3e   :  { %452 = vmatpush.msra.mxu0 %v400_v15 }
  0x44   :  { %1274 = vset.pattern.permute.xlu2 %v1366_v16  ;;  %v432_v16 = vld [vmem:[#allocation3 + $0x190] sm:$0xff] }
  0x69   :  { %v1489_v34 = vpop.permute.xlu2 %99 }
  0x72   :  { %v1492_v36 = vpop.permute.xlu2 %125 }
  0x7b   :  { %v1497_v39 = vpop.permute.xlu2 %175 }
  0x82   :  { %v86_v18 = vpop.permute.xlu0 %85  ;;  %v1495_v38 = vpop.permute.xlu1 %111 }
  0x83   :  { %v88_v19 = vsub.f32 %v1471_v4, %v86_v18  ;;  %v401_v18 = vld [vmem:[#allocation3 + $0x98] sm:$0xff] }
  0x84   :  { %v1501_v41 = vpop.permute.xlu2 %201  ;;  %498 = vmatpush.msra.mxu2 %v401_v18 }
  0x85   :  { %131 = vperm.xlu2 %1274, %v88_v19   ;;  %105 = vperm.xlu1 %1272, %v88_v19  }
  0x86   :  { %91 = vperm.xlu0 %1271, %v88_v19  }
  0x8a   :  { %v1511_v46 = vpop.permute.xlu0 %137 }
  0x8c   :  { %v1499_v40 = vpop.permute.xlu1 %163 }
  0x8d   :  { %1276 = vset.pattern.permute.xlu2 %v1368_v20  ;;  %1273 = vset.pattern.permute.xlu1 %v1369_v21  ;;  %v1505_v43 = vpop.permute.xlu2 %251  ;;  %v120_v20 = vperm.slane %v1522_v6, 1  ;;  %v121_v21 = vperm.slane %v1527_v7, 1 }
  0x8e   :  { %1277 = vset.pattern.permute.xlu0 %v1370_v22  ;;  %169 = vperm.xlu2 %1276, %v88_v19  }
  0x8f   :  { %117 = vperm.xlu1 %1273, %v88_v19   ;;  %193 = vperm.xlu0 %1277, %v88_v19  }
  0x93   :  { %v1517_v57 = vpop.permute.xlu0 %277 }
  0x95   :  { %v1503_v42 = vpop.permute.xlu1 %213 }
  0x96   :  { %1279 = vset.pattern.permute.xlu2 %v1371_v23  ;;  %v1509_v45 = vpop.permute.xlu2 %315  ;;  %v398_v23 = vld [vmem:[#allocation3 + $0x80] sm:$0xff] }
  0x97   :  { %1275 = vset.pattern.permute.xlu1 %v1372_v24  ;;  %1280 = vset.pattern.permute.xlu0 %v1373_v25  ;;  %v430_v24 = vld [vmem:[#allocation3 + $0x180] sm:$0xff]  ;;  %v399_v25 = vld [vmem:[#allocation3 + $0x88] sm:$0xff] }
  0x98   :  { %231 = vperm.xlu2 %1279, %v88_v19   ;;  %155 = vperm.xlu1 %1275, %v88_v19  }
  0x99   :  { %245 = vperm.xlu0 %1280, %v88_v19   ;;  %453 = vmatpush.msra.mxu0 %v398_v23  ;;  %v388_v23 = vld [vmem:[#allocation3 + $0x30] sm:$0xff] }
  0x9a   :  { %499 = vmatpush.msra.mxu2 %v399_v25 }
  0x9e   :  { %v1507_v44 = vpop.permute.xlu1 %239 }
  0xa0   :  { %1283 = vset.pattern.permute.xlu2 %v1374_v26  ;;  %1278 = vset.pattern.permute.xlu1 %v1375_v27 }
  0xa1   :  { %283 = vperm.xlu2 %1283, %v88_v19   ;;  %207 = vperm.xlu1 %1278, %v88_v19  }
  0xa2   :  { %1281 = vset.pattern.permute.xlu0 %v1376_v28  ;;  %v431_v28 = vld [vmem:[#allocation3 + $0x188] sm:$0xff] }
  0xa3   :  { %327 = vperm.xlu0 %1281, %v1471_v4  }
  0xa7   :  { %v1513_v47 = vpop.permute.xlu1 %289 }
  0xa9   :  { %1284 = vset.pattern.permute.xlu2 %v1377_v29  ;;  %1282 = vset.pattern.permute.xlu1 %v1378_v30 }
  0xaa   :  { %307 = vperm.xlu2 %1284, %v88_v19   ;;  %269 = vperm.xlu1 %1282, %v88_v19  }
  0xab   :  { %1290 = vset.pattern.permute.xlu0 %v1379_v31 }
  0xb2   :  { %1288 = vset.pattern.permute.xlu2 %v1380_v32  ;;  %1285 = vset.pattern.permute.xlu1 %v1381_v33  ;;  %v428_v32 = vld [vmem:[#allocation3 + $0x170] sm:$0xff]  ;;  %v397_v33 = vld [vmem:[#allocation3 + $0x78] sm:$0xff] }
  0xb3   :  { %359 = vperm.xlu2 %1288, %v88_v19   ;;  %321 = vperm.xlu1 %1285, %v88_v19  }
  0xb4   :  { %500 = vmatpush.msra.mxu2 %v397_v33 }
  0xb6   :  { %501 = vmatpush.msra.mxu2 %v395_v54  ;;  %v273_v54 = vperm.slane %v1527_v7, 5 }
  0xbb   :  { %1289 = vset.pattern.permute.xlu2 %v1379_v31  ;;  %1286 = vset.pattern.permute.xlu1 %v1382_v35  ;;  %v396_v31 = vld [vmem:[#allocation3 + $0x70] sm:$0xff] }
  0xbc   :  { %365 = vperm.xlu2 %1289, %v1471_v4   ;;  %345 = vperm.xlu1 %1286, %v88_v19   ;;  %v433_v19 = vld [vmem:[#allocation3 + $0x198] sm:$0xff] }
  0xbd   :  { %521 = vmatpush.msra.mxu3 %v433_v19  ;;  %454 = vmatpush.msra.mxu0 %v396_v31  ;;  %v235_v31 = vperm.slane %v1527_v7, 4 }
  0xbf   :  { %522 = vmatpush.msra.mxu3 %v431_v28  ;;  %455 = vmatpush.msra.mxu0 %v394_v52  ;;  %v418_v52 = vld [vmem:[#allocation3 + $0x120] sm:$0xff] }
  0xc1   :  { %523 = vmatpush.msra.mxu3 %v429_v49 }
  0xc4   :  { %1287 = vset.pattern.permute.xlu1 %v1383_v37 }
  0xc5   :  { %353 = vperm.xlu1 %1287, %v1471_v4   ;;  %v436_v4 = vld [vmem:[#allocation3 + $0x1b0] sm:$0xff] }
  0xc6   :  { %473 = vmatpush.msra.mxu1 %v436_v4 }
  0xc8   :  { %474 = vmatpush.msra.mxu1 %v434_v10 }
  0xca   :  { %475 = vmatpush.msra.mxu1 %v432_v16 }
  0xcc   :  { %476 = vmatpush.msra.mxu1 %v430_v24  ;;  %v420_v24 = vld [vmem:[#allocation3 + $0x130] sm:$0xff] }
  0xce   :  { %477 = vmatpush.msra.mxu1 %v428_v32  ;;  %v272_v32 = vperm.slane %v1522_v6, 5 }
  0xd0   :  { %478 = vmatpush.msra.mxu1 %v426_v53 }
  0xd2   :  { %479 = vmatpush.msra.mxu1 %v424_v2 }
  0xd4   :  { %480 = vmatpush.msra.mxu1 %v422_v14  ;;  %v414_v14 = vld [vmem:[#allocation3 + $0x100] sm:$0xff] }
  0xd6   :  { %481 = vmatpush.msra.mxu1 %v420_v24  ;;  %v568_v24 = vld [vmem:[#allocation5 + $0xf0] sm:$0xff] }
  0xd8   :  { %482 = vmatpush.msra.mxu1 %v418_v52 }
  0xdf   :  { %v1515_v56 = vpop.permute.xlu2 %131 }
  0xe0   :  { %v134_v35 = vmul.f32 %v1515_v56, %v120_v20  ;;  %v135_v37 = vmul.f32 %v1515_v56, %v121_v21  ;;  %v427_v56 = vld [vmem:[#allocation3 + $0x168] sm:$0xff] }
  0xe1   :  { %524 = vmatpush.msra.mxu3 %v427_v56 }
  0xe2   :  { %v140_v3 = vadd.f32 %v1511_v46, %v134_v35  ;;  %v141_v4 = vadd.f32 %v1511_v46, %v135_v37  ;;  %v386_v37 = vld [vmem:[#allocation3 + $0x20] sm:$0xff] }
  0xe3   :  { %525 = vmatpush.msra.mxu3 %v425_v11 }
  0xe8   :  { %v1531_v17 = vpop.permute.xlu2 %169 }
  0xf2   :  { %v1547_v5 = vpop.permute.xlu2 %231 }
  0xf7   :  { %v106_v1 = vpop.permute.xlu1 %105 }
  0xf8   :  { %v92_v22 = vpop.permute.xlu0 %91  ;;  %v108_v26 = vmul.f32 %v106_v1, %v94_v12  ;;  %v109_v27 = vmul.f32 %v106_v1, %v95_v13  ;;  %v392_v1 = vld [vmem:[#allocation3 + $0x50] sm:$0xff] }
  0xf9   :  { %v96_v29 = vmul.f32 %v94_v12, %v92_v22  ;;  %v97_v30 = vmul.f32 %v95_v13, %v92_v22  ;;  %v390_v12 = vld [vmem:[#allocation3 + $0x40] sm:$0xff]  ;;  %v173_v13 = vmul.f32 %v1531_v17, %v159_v58  ;;  %456 = vmatpush.msra.mxu0 %v392_v1  ;;  %v234_v22 = vperm.slane %v1522_v6, 4 }
  0xfa   :  { %v114_v59 = vadd.f32 %v1495_v38, %v108_v26  ;;  %v115_v60 = vadd.f32 %v1495_v38, %v109_v27  ;;  %v393_v38 = vld [vmem:[#allocation3 + $0x58] sm:$0xff] }
  0xfb   :  { %v102_v61 = vadd.f32 %v1489_v34, %v96_v29  ;;  %v103_v62 = vadd.f32 %v1489_v34, %v97_v30  ;;  %502 = vmatpush.msra.mxu2 %v393_v38  ;;  %457 = vmatpush.msra.mxu0 %v390_v12  ;;  %v389_v29 = vld [vmem:[#allocation3 + $0x38] sm:$0xff]  ;;  %v179_v49 = vadd.f32 %v1497_v39, %v173_v13  ;;  %v382_v13 = vld [vmem:[#allocation3] sm:$0xff] }
  0xfc   :  { %v144_v46 = vmul.f32 %v140_v3, %v114_v59  ;;  %v145_v15 = vmul.f32 %v141_v4, %v115_v60  ;;  %v421_v30 = vld [vmem:[#allocation3 + $0x138] sm:$0xff]  ;;  %v236_v53 = vmul.f32 %v234_v22, %v1547_v5 }
  0xfd   :  { %v148_v16 = vmul.f32 %v140_v3, %v102_v61  ;;  %v149_v18 = vmul.f32 %v141_v4, %v103_v62  ;;  %458 = vmatpush.msra.mxu0 %v388_v23  ;;  %v416_v4 = vld [vmem:[#allocation3 + $0x110] sm:$0xff]  ;;  %v385_v38 = vld [vmem:[#allocation3 + $0x18] sm:$0xff] }
  0xfe   :  { %483 = vmatpush.msra.mxu1 %v416_v4 }
  0xff   :  { %459 = vmatpush.msra.mxu0 %v386_v37 }
 0x100   :  { %484 = vmatpush.msra.mxu1 %v414_v14 }
 0x101   :  { %v118_v48 = vpop.permute.xlu1 %117  ;;  %v194_v19 = vpop.permute.xlu0 %193 }
 0x102   :  { %v122_v50 = vmul.f32 %v120_v20, %v118_v48  ;;  %v123_v51 = vmul.f32 %v121_v21, %v118_v48  ;;  %v391_v20 = vld [vmem:[#allocation3 + $0x48] sm:$0xff] }
 0x103   :  { %v423_v21 = vld [vmem:[#allocation3 + $0x148] sm:$0xff]  ;;  %503 = vmatpush.msra.mxu2 %v391_v20 }
 0x104   :  { %v128_v63 = vadd.f32 %v1492_v36, %v122_v50  ;;  %v129_v0 = vadd.f32 %v1492_v36, %v123_v51  ;;  %v172_v36 = vmul.f32 %v1531_v17, %v158_v55  ;;  %526 = vmatpush.msra.mxu3 %v423_v21  ;;  %v196_v50 = vperm.slane %v1522_v6, 3 }
 0x105   :  { %v197_v51 = vperm.slane %v1527_v7, 3  ;;  %504 = vmatpush.msra.mxu2 %v389_v29 }
 0x106   :  { %v142_v8 = vmul.f32 %v128_v63, %v102_v61  ;;  %v143_v9 = vmul.f32 %v129_v0, %v103_v62  ;;  %v150_v10 = vmul.f32 %v128_v63, %v114_v59  ;;  %v151_v34 = vmul.f32 %v129_v0, %v115_v60  ;;  %527 = vmatpush.msra.mxu3 %v421_v30  ;;  %v419_v59 = vld [vmem:[#allocation3 + $0x128] sm:$0xff]  ;;  %v384_v63 = vld [vmem:[#allocation3 + $0x10] sm:$0xff] }
 0x107   :  { %v178_v48 = vadd.f32 %v1497_v39, %v172_v36  ;;  %v387_v39 = vld [vmem:[#allocation3 + $0x28] sm:$0xff]  ;;  %460 = vmatpush.msra.mxu0 %v384_v63 }
 0x108   :  { %v146_v26 = vsub.f32 %v142_v8, %v144_v46  ;;  %v147_v17 = vsub.f32 %v143_v9, %v145_v15  ;;  %v152_v27 = vadd.f32 %v150_v10, %v148_v16  ;;  %v153_v28 = vadd.f32 %v151_v34, %v149_v18  ;;  %v284_v8 = vpop.permute.xlu2 %283  ;;  %505 = vmatpush.msra.mxu2 %v387_v39  ;;  %v417_v10 = vld [vmem:[#allocation3 + $0x118] sm:$0xff]  ;;  %v383_v15 = vld [vmem:[#allocation3 + $0x8] sm:$0xff] }
 0x109   :  { %v198_v9 = vmul.f32 %v196_v50, %v194_v19  ;;  %528 = vmatpush.msra.mxu3 %v419_v59  ;;  %v415_v16 = vld [vmem:[#allocation3 + $0x108] sm:$0xff]  ;;  %v237_v18 = vmul.f32 %v235_v31, %v1547_v5  ;;  %v286_v20 = vmul.f32 %v284_v8, %v272_v32  ;;  %v287_v21 = vmul.f32 %v284_v8, %v273_v54  ;;  %v569_v5 = vld [vmem:[#allocation5 + $0xf8] sm:$0xff]  ;;  %v564_v59 = vld [vmem:[#allocation5 + $0xd0] sm:$0xff] }
 0x10a   :  { %v156_v25 = vpop.permute.xlu1 %155  ;;  %v182_v60 = vmul.f32 %v178_v48, %v152_v27  ;;  %v183_v56 = vmul.f32 %v179_v49, %v153_v28  ;;  %v186_v61 = vmul.f32 %v178_v48, %v146_v26  ;;  %v187_v62 = vmul.f32 %v179_v49, %v147_v17  ;;  %506 = vmatpush.msra.mxu2 %v385_v38 }
 0x10b   :  { %v160_v33 = vmul.f32 %v158_v55, %v156_v25  ;;  %v161_v35 = vmul.f32 %v159_v58, %v156_v25  ;;  %v246_v46 = vpop.permute.xlu0 %245  ;;  %529 = vmatpush.msra.mxu3 %v417_v10  ;;  %v600_v25 = vld [vmem:[#allocation5 + $0x1f0] sm:$0xff]  ;;  %461 = vmatpush.msra.mxu0 %v382_v13  ;;  %v292_v4 = vadd.f32 %v1513_v47, %v286_v20  ;;  %v310_v8 = vperm.slane %v1522_v6, 6 }
 0x10c   :  { %v248_v30 = vmul.f32 %v246_v46, %v234_v22  ;;  %507 = vmatpush.msra.mxu2 %v383_v15  ;;  %622 = vmatpush.msrb.mxu1 %v600_v25  ;;  %v599_v22 = vld [vmem:[#allocation5 + $0x1e8] sm:$0xff]  ;;  %v293_v38 = vadd.f32 %v1513_v47, %v287_v21  ;;  %v311_v25 = vperm.slane %v1527_v7, 6 }
 0x10d   :  { %v166_v55 = vadd.f32 %v1499_v40, %v160_v33  ;;  %v167_v58 = vadd.f32 %v1499_v40, %v161_v35  ;;  %v199_v40 = vmul.f32 %v197_v51, %v194_v19  ;;  %v1568_v19 = vadd.f32 %v1507_v44, %v236_v53  ;;  %530 = vmatpush.msra.mxu3 %v415_v16  ;;  %v566_v35 = vld [vmem:[#allocation5 + $0xe0] sm:$0xff]  ;;  %v595_v47 = vld [vmem:[#allocation5 + $0x1c8] sm:$0xff] }
 0x10e   :  { %v249_v33 = vmul.f32 %v246_v46, %v235_v31  ;;  %602 = vmatpush.msrb.mxu0 %v568_v24  ;;  %642 = vmatpush.msrb.mxu2 %v569_v5  ;;  %v592_v24 = vld [vmem:[#allocation5 + $0x1b0] sm:$0xff] }
 0x10f   :  { %v180_v0 = vmul.f32 %v166_v55, %v146_v26  ;;  %v181_v1 = vmul.f32 %v167_v58, %v147_v17  ;;  %v188_v2 = vmul.f32 %v166_v55, %v152_v27  ;;  %v189_v3 = vmul.f32 %v167_v58, %v153_v28  ;;  %v601_v28 = vld [vmem:[#allocation5 + $0x1f8] sm:$0xff] }
 0x110   :  { %v204_v26 = vadd.f32 %v1501_v41, %v198_v9  ;;  %v205_v29 = vadd.f32 %v1501_v41, %v199_v40  ;;  %662 = vmatpush.msrb.mxu3 %v601_v28  ;;  %603 = vmatpush.msrb.mxu0 %v566_v35  ;;  %v308_v15 = vpop.permute.xlu2 %307 }
 0x111   :  { %v184_v34 = vsub.f32 %v180_v0, %v182_v60  ;;  %v185_v11 = vsub.f32 %v181_v1, %v183_v56  ;;  %v190_v12 = vadd.f32 %v188_v2, %v186_v61  ;;  %v191_v36 = vadd.f32 %v189_v3, %v187_v62  ;;  %v596_v60 = vld [vmem:[#allocation5 + $0x1d0] sm:$0xff]  ;;  %v565_v62 = vld [vmem:[#allocation5 + $0xd8] sm:$0xff] }
 0x112   :  { %v254_v56 = vadd.f32 %v1505_v43, %v248_v30  ;;  %v255_v61 = vadd.f32 %v1505_v43, %v249_v33  ;;  %663 = vmatpush.msrb.mxu3 %v599_v22  ;;  %v597_v3 = vld [vmem:[#allocation5 + $0x1d8] sm:$0xff]  ;;  %604 = vmatpush.msrb.mxu0 %v564_v59  ;;  %v558_v30 = vld [vmem:[#allocation5 + $0xa0] sm:$0xff] }
 0x113   :  { %v208_v23 = vpop.permute.xlu1 %207  ;;  %v218_v49 = vmul.f32 %v204_v26, %v184_v34  ;;  %v219_v52 = vmul.f32 %v205_v29, %v185_v11  ;;  %v226_v41 = vmul.f32 %v204_v26, %v190_v12  ;;  %v227_v53 = vmul.f32 %v205_v29, %v191_v36  ;;  %v557_v59 = vld [vmem:[#allocation5 + $0x98] sm:$0xff] }
 0x114   :  { %v210_v17 = vmul.f32 %v208_v23, %v196_v50  ;;  %v211_v27 = vmul.f32 %v208_v23, %v197_v51  ;;  %v598_v50 = vld [vmem:[#allocation5 + $0x1e0] sm:$0xff]  ;;  %v567_v51 = vld [vmem:[#allocation5 + $0xe8] sm:$0xff]  ;;  %664 = vmatpush.msrb.mxu3 %v597_v3  ;;  %v560_v23 = vld [vmem:[#allocation5 + $0xb0] sm:$0xff] }
 0x115   :  { %623 = vmatpush.msrb.mxu1 %v598_v50  ;;  %643 = vmatpush.msrb.mxu2 %v567_v51 }
 0x116   :  { %v216_v37 = vadd.f32 %v1503_v42, %v210_v17  ;;  %v217_v48 = vadd.f32 %v1503_v42, %v211_v27  ;;  %v243_v42 = vadd.f32 %v1507_v44, %v237_v18  ;;  %v562_v44 = vld [vmem:[#allocation5 + $0xc0] sm:$0xff]  ;;  %665 = vmatpush.msrb.mxu3 %v595_v47 }
 0x117   :  { %624 = vmatpush.msrb.mxu1 %v596_v60  ;;  %644 = vmatpush.msrb.mxu2 %v565_v62  ;;  %v550_v47 = vld [vmem:[#allocation5 + $0x60] sm:$0xff] }
 0x118   :  { %v220_v55 = vmul.f32 %v216_v37, %v190_v12  ;;  %v221_v31 = vmul.f32 %v217_v48, %v191_v36  ;;  %v224_v58 = vmul.f32 %v216_v37, %v184_v34  ;;  %v225_v39 = vmul.f32 %v217_v48, %v185_v11  ;;  %v594_v11 = vld [vmem:[#allocation5 + $0x1c0] sm:$0xff]  ;;  %v563_v12 = vld [vmem:[#allocation5 + $0xc8] sm:$0xff]  ;;  %605 = vmatpush.msrb.mxu0 %v562_v44 }
 0x119   :  { %625 = vmatpush.msrb.mxu1 %v594_v11  ;;  %645 = vmatpush.msrb.mxu2 %v563_v12  ;;  %v590_v37 = vld [vmem:[#allocation5 + $0x1a0] sm:$0xff]  ;;  %v553_v12 = vld [vmem:[#allocation5 + $0x78] sm:$0xff] }
 0x11a   :  { %v222_v63 = vsub.f32 %v218_v49, %v220_v55  ;;  %v223_v0 = vsub.f32 %v219_v52, %v221_v31  ;;  %v228_v1 = vadd.f32 %v226_v41, %v224_v58  ;;  %v229_v2 = vadd.f32 %v227_v53, %v225_v39  ;;  %606 = vmatpush.msrb.mxu0 %v560_v23  ;;  %v559_v52 = vld [vmem:[#allocation5 + $0xa8] sm:$0xff]  ;;  %v556_v53 = vld [vmem:[#allocation5 + $0x90] sm:$0xff] }
 0x11b   :  { %626 = vmatpush.msrb.mxu1 %v592_v24  ;;  %v313_v41 = vmul.f32 %v311_v25, %v308_v15  ;;  %v588_v39 = vld [vmem:[#allocation5 + $0x190] sm:$0xff]  ;;  %v551_v23 = vld [vmem:[#allocation5 + $0x68] sm:$0xff] }
 0x11c   :  { %v270_v9 = vpop.permute.xlu1 %269  ;;  %v256_v43 = vmul.f32 %v1568_v19, %v222_v63  ;;  %v257_v40 = vmul.f32 %v243_v42, %v223_v0  ;;  %v258_v10 = vmul.f32 %v254_v56, %v228_v1  ;;  %v259_v34 = vmul.f32 %v255_v61, %v229_v2  ;;  %607 = vmatpush.msrb.mxu0 %v558_v30  ;;  %v583_v24 = vld [vmem:[#allocation5 + $0x168] sm:$0xff] }
 0x11d   :  { %v262_v36 = vmul.f32 %v254_v56, %v222_v63  ;;  %v263_v13 = vmul.f32 %v255_v61, %v223_v0  ;;  %v264_v14 = vmul.f32 %v1568_v19, %v228_v1  ;;  %v265_v46 = vmul.f32 %v243_v42, %v229_v2  ;;  %v561_v19 = vld [vmem:[#allocation5 + $0xb8] sm:$0xff]  ;;  %627 = vmatpush.msrb.mxu1 %v590_v37  ;;  %v328_v42 = vpop.permute.xlu0 %327  ;;  %v554_v61 = vld [vmem:[#allocation5 + $0x80] sm:$0xff]  ;;  %v555_v2 = vld [vmem:[#allocation5 + $0x88] sm:$0xff] }
 0x11e   :  { %v260_v16 = vsub.f32 %v256_v43, %v258_v10  ;;  %v261_v18 = vsub.f32 %v257_v40, %v259_v34  ;;  %v274_v20 = vmul.f32 %v272_v32, %v270_v9  ;;  %v275_v21 = vmul.f32 %v273_v54, %v270_v9  ;;  %v593_v32 = vld [vmem:[#allocation5 + $0x1b8] sm:$0xff]  ;;  %646 = vmatpush.msrb.mxu2 %v561_v19  ;;  %v586_v1 = vld [vmem:[#allocation5 + $0x180] sm:$0xff]  ;;  %v552_v43 = vld [vmem:[#allocation5 + $0x70] sm:$0xff]  ;;  %v360_v10 = vpop.permute.xlu2 %359 }
 0x11f   :  { %v266_v26 = vadd.f32 %v264_v14, %v262_v36  ;;  %v267_v17 = vadd.f32 %v265_v46, %v263_v13  ;;  %v312_v54 = vmul.f32 %v310_v8, %v308_v15  ;;  %666 = vmatpush.msrb.mxu3 %v593_v32  ;;  %v589_v56 = vld [vmem:[#allocation5 + $0x198] sm:$0xff]  ;;  %608 = vmatpush.msrb.mxu0 %v556_v53  ;;  %v584_v40 = vld [vmem:[#allocation5 + $0x170] sm:$0xff]  ;;  %v582_v15 = vld [vmem:[#allocation5 + $0x160] sm:$0xff] }
 0x120   :  { %v280_v27 = vadd.f32 %v1517_v57, %v274_v20  ;;  %v281_v5 = vadd.f32 %v1517_v57, %v275_v21  ;;  %v300_v28 = vmul.f32 %v292_v4, %v260_v16  ;;  %v301_v29 = vmul.f32 %v293_v38, %v261_v18  ;;  %v591_v57 = vld [vmem:[#allocation5 + $0x1a8] sm:$0xff]  ;;  %647 = vmatpush.msrb.mxu2 %v559_v52  ;;  %v585_v46 = vld [vmem:[#allocation5 + $0x178] sm:$0xff]  ;;  %v572_v53 = vld [vmem:[#allocation5 + $0x110] sm:$0xff] }
 0x121   :  { %v296_v33 = vmul.f32 %v292_v4, %v266_v26  ;;  %v297_v35 = vmul.f32 %v293_v38, %v267_v17  ;;  %667 = vmatpush.msrb.mxu3 %v591_v57  ;;  %v318_v62 = vadd.f32 %v1509_v45, %v312_v54  ;;  %v319_v3 = vadd.f32 %v1509_v45, %v313_v41  ;;  %v587_v4 = vld [vmem:[#allocation5 + $0x188] sm:$0xff]  ;;  %v549_v19 = vld [vmem:[#allocation5 + $0x58] sm:$0xff] }
 0x122   :  { %v294_v48 = vmul.f32 %v280_v27, %v260_v16  ;;  %v295_v49 = vmul.f32 %v281_v5, %v261_v18  ;;  %v302_v50 = vmul.f32 %v280_v27, %v266_v26  ;;  %v303_v51 = vmul.f32 %v281_v5, %v267_v17  ;;  %628 = vmatpush.msrb.mxu1 %v588_v39  ;;  %v580_v26 = vld [vmem:[#allocation5 + $0x150] sm:$0xff]  ;;  %v581_v27 = vld [vmem:[#allocation5 + $0x158] sm:$0xff]  ;;  %v546_v5 = vld [vmem:[#allocation5 + $0x40] sm:$0xff] }
 0x123   :  { %648 = vmatpush.msrb.mxu2 %v557_v59  ;;  %668 = vmatpush.msrb.mxu3 %v589_v56  ;;  %v547_v32 = vld [vmem:[#allocation5 + $0x48] sm:$0xff]  ;;  %v349_v54 = vperm.slane %v1527_v7, 7  ;;  %v545_v37 = vld [vmem:[#allocation5 + $0x38] sm:$0xff]  ;;  %v540_v7 = vld [vmem:[#allocation5 + $0x10] sm:$0xff] }
 0x124   :  { %v298_v22 = vsub.f32 %v294_v48, %v296_v33  ;;  %v299_v55 = vsub.f32 %v295_v49, %v297_v35  ;;  %v304_v31 = vadd.f32 %v302_v50, %v300_v28  ;;  %v305_v58 = vadd.f32 %v303_v51, %v301_v29  ;;  %609 = vmatpush.msrb.mxu0 %v554_v61  ;;  %v578_v28 = vld [vmem:[#allocation5 + $0x140] sm:$0xff]  ;;  %v579_v30 = vld [vmem:[#allocation5 + $0x148] sm:$0xff]  ;;  %v544_v33 = vld [vmem:[#allocation5 + $0x30] sm:$0xff] }
 0x125   :  { %v322_v60 = vpop.permute.xlu1 %321  ;;  %629 = vmatpush.msrb.mxu1 %v586_v1  ;;  %649 = vmatpush.msrb.mxu2 %v555_v2  ;;  %v348_v29 = vperm.slane %v1522_v6, 7  ;;  %v576_v35 = vld [vmem:[#allocation5 + $0x130] sm:$0xff]  ;;  %v577_v48 = vld [vmem:[#allocation5 + $0x138] sm:$0xff]  ;;  %v542_v50 = vld [vmem:[#allocation5 + $0x20] sm:$0xff]  ;;  %v363_v41 = vmul.f32 %v360_v10, %v349_v54 }
 0x126   :  { %v324_v63 = vmul.f32 %v322_v60, %v310_v8  ;;  %v325_v0 = vmul.f32 %v322_v60, %v311_v25  ;;  %v332_v9 = vmul.f32 %v318_v62, %v298_v22  ;;  %v333_v34 = vmul.f32 %v319_v3, %v299_v55  ;;  %669 = vmatpush.msrb.mxu3 %v587_v4  ;;  %v548_v25 = vld [vmem:[#allocation5 + $0x50] sm:$0xff]  ;;  %v366_v49 = vpop.permute.xlu2 %365  ;;  %v574_v51 = vld [vmem:[#allocation5 + $0x120] sm:$0xff]  ;;  %v543_v52 = vld [vmem:[#allocation5 + $0x28] sm:$0xff] }
 0x127   :  { %v340_v11 = vmul.f32 %v318_v62, %v304_v31  ;;  %v341_v8 = vmul.f32 %v319_v3, %v305_v58  ;;  %610 = vmatpush.msrb.mxu0 %v552_v43  ;;  %630 = vmatpush.msrb.mxu1 %v584_v40  ;;  %v362_v6 = vmul.f32 %v360_v10, %v348_v29  ;;  %v575_v57 = vld [vmem:[#allocation5 + $0x128] sm:$0xff]  ;;  %v573_v39 = vld [vmem:[#allocation5 + $0x118] sm:$0xff] }
 0x128   :  { %v330_v38 = vadd.f32 %v328_v42, %v324_v63  ;;  %v331_v44 = vadd.f32 %v328_v42, %v325_v0  ;;  %650 = vmatpush.msrb.mxu2 %v553_v12  ;;  %670 = vmatpush.msrb.mxu3 %v585_v46  ;;  %v369_v59 = vadd.f32 %v366_v49, %v363_v41  ;;  %v538_v42 = vld [vmem:[#allocation5] sm:$0xff]  ;;  %v539_v0 = vld [vmem:[#allocation5 + $0x8] sm:$0xff] }
 0x129   :  { %611 = vmatpush.msrb.mxu0 %v550_v47  ;;  %631 = vmatpush.msrb.mxu1 %v582_v15  ;;  %v570_v63 = vld [vmem:[#allocation5 + $0x100] sm:$0xff]  ;;  %v571_v4 = vld [vmem:[#allocation5 + $0x108] sm:$0xff] }
 0x12a   :  { %v334_v36 = vmul.f32 %v330_v38, %v304_v31  ;;  %v335_v13 = vmul.f32 %v331_v44, %v305_v58  ;;  %v338_v45 = vmul.f32 %v330_v38, %v298_v22  ;;  %v339_v14 = vmul.f32 %v331_v44, %v299_v55  ;;  %651 = vmatpush.msrb.mxu2 %v551_v23  ;;  %v541_v58 = vld [vmem:[#allocation5 + $0x18] sm:$0xff]  ;;  %v1195_v46 = vld [vmem:[%s1744_s6 + $0x28] sm:$0xff] }
 0x12b   :  { %671 = vmatpush.msrb.mxu3 %v583_v24  ;;  %612 = vmatpush.msrb.mxu0 %v548_v25  ;;  %v368_v22 = vadd.f32 %v366_v49, %v362_v6  ;;  %v1203_v47 = vld [vmem:[%s1744_s6 + $0x68] sm:$0xff]  ;;  %v1202_v23 = vld [vmem:[%s1744_s6 + $0x60] sm:$0xff]  ;;  %v1193_v24 = vld [vmem:[%s1744_s6 + $0x18] sm:$0xff] }
 0x12c   :  { %v1603_v16 = vsub.f32 %v332_v9, %v334_v36  ;;  %v1605_v18 = vsub.f32 %v333_v34, %v335_v13  ;;  %v1607_v20 = vadd.f32 %v340_v11, %v338_v45  ;;  %v1609_v21 = vadd.f32 %v341_v8, %v339_v14  ;;  %632 = vmatpush.msrb.mxu1 %v580_v26  ;;  %v1197_v36 = vld [vmem:[%s1744_s6 + $0x38] sm:$0xff]  ;;  %v1196_v45 = vld [vmem:[%s1744_s6 + $0x30] sm:$0xff] }
 0x12d   :  { %652 = vmatpush.msrb.mxu2 %v549_v19  ;;  %672 = vmatpush.msrb.mxu3 %v581_v27  ;;  %v1205_v13 = vld [vmem:[%s1744_s6 + $0x78] sm:$0xff]  ;;  %v1204_v14 = vld [vmem:[%s1744_s6 + $0x70] sm:$0xff] }
 0x12e   :  { %v346_v17 = vpop.permute.xlu1 %345  ;;  %613 = vmatpush.msrb.mxu0 %v546_v5  ;;  %633 = vmatpush.msrb.mxu1 %v578_v28  ;;  %v372_v62 = vmul.f32 %v368_v22, %v1607_v20  ;;  %v373_v1 = vmul.f32 %v369_v59, %v1609_v21  ;;  %v376_v2 = vmul.f32 %v368_v22, %v1603_v16  ;;  %v1201_v25 = vld [vmem:[%s1744_s6 + $0x58] sm:$0xff] }
 0x12f   :  { %653 = vmatpush.msrb.mxu2 %v547_v32  ;;  %673 = vmatpush.msrb.mxu3 %v579_v30  ;;  %v350_v55 = vmul.f32 %v348_v29, %v346_v17  ;;  %v351_v31 = vmul.f32 %v349_v54, %v346_v17  ;;  %v377_v3 = vmul.f32 %v369_v59, %v1605_v18  ;;  %v1192_v29 = vld [vmem:[%s1744_s6 + $0x10] sm:$0xff]  ;;  %v1199_v59 = vld [vmem:[%s1744_s6 + $0x48] sm:$0xff] }
 0x130   :  { %614 = vmatpush.msrb.mxu0 %v544_v33  ;;  %634 = vmatpush.msrb.mxu1 %v576_v35  ;;  %v1200_v32 = vld [vmem:[%s1744_s6 + $0x50] sm:$0xff] }
 0x131   :  { %654 = vmatpush.msrb.mxu2 %v545_v37  ;;  %674 = vmatpush.msrb.mxu3 %v577_v48 }
 0x132   :  { %615 = vmatpush.msrb.mxu0 %v542_v50  ;;  %635 = vmatpush.msrb.mxu1 %v574_v51 }
 0x133   :  { %655 = vmatpush.msrb.mxu2 %v543_v52  ;;  %675 = vmatpush.msrb.mxu3 %v575_v57 }
 0x134   :  { %616 = vmatpush.msrb.mxu0 %v540_v7  ;;  %636 = vmatpush.msrb.mxu1 %v572_v53 }
 0x135   :  { %656 = vmatpush.msrb.mxu2 %v541_v58  ;;  %676 = vmatpush.msrb.mxu3 %v573_v39  ;;  %v1191_v39 = vld [vmem:[%s1744_s6 + $0x8] sm:$0xff] }
 0x136   :  { %617 = vmatpush.msrb.mxu0 %v538_v42  ;;  %637 = vmatpush.msrb.mxu1 %v570_v63  ;;  %v1198_v42 = vld [vmem:[%s1744_s6 + $0x40] sm:$0xff] }
 0x137   :  { %v354_v60 = vpop.permute.xlu1 %353  ;;  %657 = vmatpush.msrb.mxu2 %v539_v0  ;;  %677 = vmatpush.msrb.mxu3 %v571_v4  ;;  %v1210_v63 = vld [vmem:[%s1746_s8 + $0x20] sm:$0xff]  ;;  %v1209_v0 = vld [vmem:[%s1746_s8 + $0x18] sm:$0xff] }
 0x138   :  { %v356_v56 = vadd.f32 %v354_v60, %v350_v55  ;;  %v357_v61 = vadd.f32 %v354_v60, %v351_v31  ;;  %v1190_v60 = vld [vmem:[%s1744_s6] sm:$0xff] }
 0x13a   :  { %v370_v38 = vmul.f32 %v356_v56, %v1603_v16  ;;  %v371_v44 = vmul.f32 %v357_v61, %v1605_v18  ;;  %v378_v9 = vmul.f32 %v356_v56, %v1607_v20  ;;  %v379_v43 = vmul.f32 %v357_v61, %v1609_v21  ;;  %v1194_v21 = vld [vmem:[%s1744_s6 + $0x20] sm:$0xff]  ;;  %v1213_v56 = vld [vmem:[%s1746_s8 + $0x38] sm:$0xff]  ;;  %v1212_v61 = vld [vmem:[%s1746_s8 + $0x30] sm:$0xff] }
 0x13c   :  { %v374_v40 = vsub.f32 %v370_v38, %v372_v62  ;;  %v375_v10 = vsub.f32 %v371_v44, %v373_v1  ;;  %v380_v34 = vadd.f32 %v378_v9, %v376_v2  ;;  %v381_v11 = vadd.f32 %v379_v43, %v377_v3  ;;  %v1211_v62 = vld [vmem:[%s1746_s8 + $0x28] sm:$0xff]  ;;  %v697_v1 = vld [vmem:[%s1742_s4] sm:$0x3]  ;;  %v1208_v2 = vld [vmem:[%s1746_s8 + $0x10] sm:$0xff] }
 0x13d   :  { %v705_v3 = vld [vmem:[%s1743_s5] sm:$0x3]  ;;  %v699_v4 = vperm.slane %v697_v1, 0  ;;  %v700_v38 = vperm.slane %v697_v1, 1 }
 0x13e   :  { %462 = vmatmul.f32.vlgmr.msra.gmra.mxu0 %v374_v40  ;;  %485 = vmatmul.f32.vlgmr.msra.gmra.mxu1 %v375_v10  ;;  %v688_v48 = vmul.f32 2.0, %v374_v40  ;;  %v689_v51 = vmul.f32 2.0, %v375_v10  ;;  %v707_v44 = vperm.slane %v705_v3, 0  ;;  %v708_v9 = vperm.slane %v705_v3, 1 }
 0x13f   :  { %508 = vmatmul.f32.vlgmr.msra.gmra.mxu2 %v374_v40  ;;  %531 = vmatmul.f32.vlgmr.msra.gmra.mxu3 %v375_v10 }
 0x140   :  { %849 = vmatpush.bf16.msra.mxu0 %v1197_v36  ;;  %862 = vmatpush.bf16.msra.mxu1 %v1205_v13 }
 0x141   :  { %945 = vmatpush.bf16.msra.mxu2 %v1213_v56 }
 0x144   :  { %850 = vmatpush.bf16.msra.mxu0 %v1196_v45  ;;  %863 = vmatpush.bf16.msra.mxu1 %v1204_v14  ;;  %v1207_v45 = vld [vmem:[%s1746_s8 + $0x8] sm:$0xff]  ;;  %v1206_v14 = vld [vmem:[%s1746_s8] sm:$0xff] }
 0x145   :  { %946 = vmatpush.bf16.msra.mxu2 %v1212_v61 }
 0x146   :  { %465 = vmatmul.f32.gmra.mxu0 %v380_v34  ;;  %488 = vmatmul.f32.gmra.mxu1 %v381_v11 }
 0x147   :  { %511 = vmatmul.f32.gmra.mxu2 %v380_v34  ;;  %534 = vmatmul.f32.gmra.mxu3 %v381_v11 }
 0x148   :  { %851 = vmatpush.bf16.msra.mxu0 %v1195_v46  ;;  %864 = vmatpush.bf16.msra.mxu1 %v1203_v47  ;;  %v1221_v46 = vld [vmem:[%s1748_s10 + $0x38] sm:$0xff]  ;;  %v1220_v47 = vld [vmem:[%s1748_s10 + $0x30] sm:$0xff] }
 0x149   :  { %947 = vmatpush.bf16.msra.mxu2 %v1211_v62  ;;  %1028 = vmatpush.bf16.msra.mxu3 %v1221_v46 }
 0x14c   :  { %852 = vmatpush.bf16.msra.mxu0 %v1194_v21  ;;  %865 = vmatpush.bf16.msra.mxu1 %v1202_v23  ;;  %v1291_v21 = vld [vmem:[%s1745_s7] ss:$0 sm:$0xff] }
 0x14d   :  { %948 = vmatpush.bf16.msra.mxu2 %v1210_v63  ;;  %1029 = vmatpush.bf16.msra.mxu3 %v1220_v47 }
 0x14e   :  { %618 = vmatmul.f32.vlgmr.msrb.gmra.mxu0 %v380_v34  ;;  %638 = vmatmul.f32.vlgmr.msrb.gmra.mxu1 %v381_v11 }
 0x14f   :  { %658 = vmatmul.f32.vlgmr.msrb.gmra.mxu2 %v380_v34  ;;  %678 = vmatmul.f32.vlgmr.msrb.gmra.mxu3 %v381_v11 }
 0x150   :  { %853 = vmatpush.bf16.msra.mxu0 %v1193_v24  ;;  %866 = vmatpush.bf16.msra.mxu1 %v1201_v25 }
 0x151   :  { %949 = vmatpush.bf16.msra.mxu2 %v1209_v0 }
 0x154   :  { %854 = vmatpush.bf16.msra.mxu0 %v1192_v29  ;;  %867 = vmatpush.bf16.msra.mxu1 %v1200_v32  ;;  %v1214_v29 = vld [vmem:[%s1748_s10] sm:$0xff] }
 0x155   :  { %950 = vmatpush.bf16.msra.mxu2 %v1208_v2  ;;  %v1292_v32 = vld [vmem:[%s1747_s9] ss:$0 sm:$0xff] }
 0x158   :  { %855 = vmatpush.bf16.msra.mxu0 %v1191_v39  ;;  %868 = vmatpush.bf16.msra.mxu1 %v1199_v59 }
 0x159   :  { %951 = vmatpush.bf16.msra.mxu2 %v1207_v45 }
 0x15c   :  { %856 = vmatpush.bf16.msra.mxu0 %v1190_v60  ;;  %869 = vmatpush.bf16.msra.mxu1 %v1198_v42 }
 0x15d   :  { %952 = vmatpush.bf16.msra.mxu2 %v1206_v14 }
 0x1bb   :  { %v463_v8 = vpop.f32.mrf.mxu0  ;;  %v486_v12 = vpop.f32.mrf.mxu1 }
 0x1bc   :  { %v487_v30 = vadd.f32 %v486_v12, %v463_v8 }
 0x1be   :  { %v682_v6 = vmul.f32 %v487_v30, %v374_v40 }
 0x1c2   :  { %v509_v15 = vpop.f32.mrf.mxu2  ;;  %v532_v16 = vpop.f32.mrf.mxu3 }
 0x1c3   :  { %v466_v18 = vpop.f32.mrf.mxu0  ;;  %v489_v20 = vpop.f32.mrf.mxu1  ;;  %v533_v54 = vadd.f32 %v532_v16, %v509_v15  ;;  %v1219_v15 = vld [vmem:[%s1748_s10 + $0x28] sm:$0xff]  ;;  %v1218_v16 = vld [vmem:[%s1748_s10 + $0x20] sm:$0xff] }
 0x1c4   :  { %v490_v5 = vadd.f32 %v489_v20, %v466_v18  ;;  %1030 = vmatpush.bf16.msra.mxu3 %v1219_v15  ;;  %v1217_v18 = vld [vmem:[%s1748_s10 + $0x18] sm:$0xff]  ;;  %v1216_v20 = vld [vmem:[%s1748_s10 + $0x10] sm:$0xff] }
 0x1c5   :  { %v683_v52 = vmul.f32 %v533_v54, %v375_v10 }
 0x1c6   :  { %v684_v35 = vmul.f32 %v490_v5, %v380_v34 }
 0x1c8   :  { %v686_v7 = vadd.f32 %v684_v35, %v682_v6  ;;  %1031 = vmatpush.bf16.msra.mxu3 %v1218_v16 }
 0x1ca   :  { %v512_v26 = vpop.f32.mrf.mxu2  ;;  %v535_v17 = vpop.f32.mrf.mxu3 }
 0x1cb   :  { %v619_v19 = vpop.f32.mrf.mxu0  ;;  %v639_v27 = vpop.f32.mrf.mxu1  ;;  %v536_v28 = vadd.f32 %v535_v17, %v512_v26 }
 0x1cc   :  { %v640_v33 = vadd.f32 %v639_v27, %v619_v19  ;;  %1032 = vmatpush.bf16.msra.mxu3 %v1217_v18 }
 0x1cd   :  { %v685_v37 = vmul.f32 %v536_v28, %v381_v11  ;;  %v1215_v28 = vld [vmem:[%s1748_s10 + $0x8] sm:$0xff] }
 0x1ce   :  { %v690_v57 = vmul.f32 %v688_v48, %v640_v33  ;;  %v1293_v48 = vld [vmem:[%s1749_s11] ss:$0 sm:$0xff] }
 0x1cf   :  { %v687_v53 = vadd.f32 %v685_v37, %v683_v52 }
 0x1d0   :  { %v692_v55 = vadd.f32 %v690_v57, %v686_v7  ;;  %1033 = vmatpush.bf16.msra.mxu3 %v1216_v20 }
 0x1d2   :  { %v659_v49 = vpop.f32.mrf.mxu2  ;;  %v679_v50 = vpop.f32.mrf.mxu3 }
 0x1d3   :  { %v680_v41 = vadd.f32 %v679_v50, %v659_v49 }
 0x1d4   :  { %1034 = vmatpush.bf16.msra.mxu3 %v1215_v28 }
 0x1d5   :  { %v691_v22 = vmul.f32 %v689_v51, %v680_v41  ;;  %v1294_v51 = vld [vmem:[%s1750_s12] ss:$0 sm:$0xff] }
 0x1d6   :  { %v1295_v41 = vld [vmem:[#allocation2] ss:$0 sm:$0xff] }
 0x1d7   :  { %v693_v31 = vadd.f32 %v691_v22, %v687_v53 }
 0x1d8   :  { %1035 = vmatpush.bf16.msra.mxu3 %v1214_v29 }
 0x1d9   :  { %v694_v58 = vadd.f32 %v693_v31, %v692_v55 }
 0x1db   :  { %695 = vadd.xlane.f32.xlu0 %v694_v58 }
 0x24e   :  { %v696_v43 = vpop.xlane.xlu0 %695 }
 0x24f   :  { %v703_v40 = vmul.f32 %v699_v4, %v696_v43  ;;  %v704_v10 = vmul.f32 %v700_v38, %v696_v43 }
 0x251   :  { %v711_v34 = vadd.f32 %v707_v44, %v703_v40  ;;  %v712_v11 = vadd.f32 %v708_v9, %v704_v10 }
 0x253   :  { %v713_v8 = vmax.f32 %v711_v34, 0.0  ;;  %v714_v12 = vmax.f32 %v712_v11, 0.0 }
 0x255   :  { %v715_v36 = vpack.c.bf16 %v713_v8, %v713_v8  ;;  %v716_v13 = vpack.c.bf16 %v714_v12, %v714_v12 }
 0x257   :  { %857 = vmatmul.bf16.vlgmr.msra.gmra.mxu0 %v715_v36  ;;  %870 = vmatmul.bf16.vlgmr.msra.gmra.mxu1 %v716_v13 }
 0x2d4   :  { %v858_v23 = vpop.f32.mrf.mxu0  ;;  %v871_v24 = vpop.f32.mrf.mxu1 }
 0x2d5   :  { %v859_v25 = vadd.f32 %v1291_v21, %v858_v23 }
 0x2d7   :  { %v872_v26 = vadd.f32 %v871_v24, %v859_v25 }
 0x2d9   :  { %v875_v17 = vmax.f32 %v872_v26, 0.0 }
 0x2db   :  { %v876_v19 = vpack.c.bf16 %v875_v17, %v875_v17 }
 0x2dc   :  { %v860_v27 = vpop.f32.mrf.mxu0  ;;  %v873_v5 = vpop.f32.mrf.mxu1 }
 0x2dd   :  { %953 = vmatmul.bf16.vlgmr.msra.gmra.mxu2 %v876_v19 }
 0x360   :  { %v954_v30 = vpop.f32.mrf.mxu2 }
 0x361   :  { %v955_v54 = vadd.f32 %v1292_v32, %v954_v30 }
 0x363   :  { %v958_v33 = vmax.f32 %v955_v54, 0.0 }
 0x365   :  { %v959_v35 = vpack.c.bf16 %v958_v33, %v958_v33 }
 0x367   :  { %1036 = vmatmul.bf16.vlgmr.msra.gmra.mxu3 %v959_v35 }
 0x368   :  { %v956_v37 = vpop.f32.mrf.mxu2 }
 0x3ea   :  { %v1037_v49 = vpop.f32.mrf.mxu3 }
 0x3eb   :  { %v1038_v50 = vadd.f32 %v1293_v48, %v1037_v49 }
 0x3ed   :  { %v1041_v6 = vmax.f32 %v1038_v50, 0.0 }
 0x3ef   :  { %v1046_v52 = vmul.f32 %v1294_v51, %v1041_v6 }
 0x3f1   :  { %1047 = vadd.xlane.f32.xlu1 %v1046_v52 }
 0x3f2   :  { %v1039_v57 = vpop.f32.mrf.mxu3 }
 0x464   :  { %v1048_v7 = vpop.xlane.xlu1 %1047 }
 0x465   :  { %v1053_v53 = vadd.f32 %v1295_v41, %v1048_v7 }
 0x467   :  { %1055 = vst.msk [vmem:[%s1752_s14] sm:$0xff] %vm1054_vm0, %v1053_v53 }
 0x468   :  { %1060 = vsyncpa [#allocation4], 1 }
 0x469   :  { %1061 = vsyncpa [#allocation6], 1 }

// kernel: qcnn_forward.2
= control target key start
LH: loop header
LB: loop body
LE: loop exit
PB: predicated region body
PF: predicated region fallthrough
CT: control target
= control target key end

     0   :  { %18 = vsyncpa [#allocation3], 0  ;;  %s2769_s0 = inlined_call_operand.vmem [shape: bf16[8,256], index: 0, kind: input, shape index: {}]   ;;  %s2770_s1 = inlined_call_operand.hbm [shape: bf16[256,512], index: 1, kind: input, shape index: {}]   ;;  %s2771_s2 = inlined_call_operand.vmem [shape: f32[1,512], index: 2, kind: input, shape index: {}]   ;;  %s2772_s3 = inlined_call_operand.hbm [shape: bf16[512,256], index: 3, kind: input, shape index: {}]   ;;  %s2773_s4 = inlined_call_operand.vmem [shape: f32[1,256], index: 4, kind: input, shape index: {}]   ;;  %s2774_s5 = inlined_call_operand.hbm [shape: bf16[256,256], index: 5, kind: input, shape index: {}]   ;;  %s2775_s6 = inlined_call_operand.vmem [shape: f32[1,256], index: 6, kind: input, shape index: {}]   ;;  %s2776_s7 = inlined_call_operand.vmem [shape: bf16[256,32], index: 7, kind: input, shape index: {}]   ;;  %s2777_s8 = inlined_call_operand.vmem [shape: f32[1,32], index: 8, kind: input, shape index: {}]   ;;  %s2778_s9 = inlined_call_operand.vmem [shape: bf16[32,16], index: 9, kind: input, shape index: {}]   ;;  %s2779_s10 = inlined_call_operand.vmem [shape: f32[1,16], index: 10, kind: input, shape index: {}]   ;;  %s2780_s11 = inlined_call_operand.vmem [shape: bf16[16,8], index: 11, kind: input, shape index: {}]   ;;  %s2781_s12 = inlined_call_operand.vmem [shape: f32[1,8], index: 12, kind: input, shape index: {}]   ;;  %s2782_s13 = inlined_call_operand.vmem [shape: f32[8,8], index: 13, kind: output, shape index: {}]  }
   0x1   :  { %19 = vsyncpa [#allocation5], 0  ;;  %s41_s27 = sshll.u32 %s2772_s3, 4  ;;  %s2578_s28 = smov [#allocation4]   ;;  %s42_s27 = int_to_ptr.hbm [resolvable:$true] %s41_s27 }
   0x2   :  { %s43_s29 = sshll.u32 %s2578_s28, 4  ;;  %s26_s15 = sshll.u32 %s2770_s1, 4  ;;  %s44_s29 = int_to_ptr.vmem [resolvable:$true] %s43_s29  ;;  %s27_s15 = int_to_ptr.hbm [resolvable:$true] %s26_s15 }
   0x3   :  { %s2579_s16 = smov 128   ;;  %s2580_s17 = smov 8  }
   0x4   :  { %49 = dma.hbm_to_vmem [thread:$0]  %s42_s27, 8192, %s44_s29, [#allocation5], %s2579_s16, %s2579_s16, %s2580_s17  }
   0x5   :  { %s2581_s18 = smov [#allocation2]   ;;  %s2582_s20 = smov 256  }
   0x6   :  { %s28_s19 = sshll.u32 %s2581_s18, 4  ;;  %s2583_s21 = smov 16   ;;  %s29_s19 = int_to_ptr.vmem [resolvable:$true] %s28_s19 }
   0x7   :  { %34 = dma.hbm_to_vmem [thread:$0]  %s27_s15, 8192, %s29_s19, [#allocation3], %s2582_s20, %s2582_s20, %s2583_s21  }
   0x8   :  { %s56_s23 = sshll.u32 %s2774_s5, 4  ;;  %s2584_s24 = smov [#allocation6]   ;;  %s57_s23 = int_to_ptr.hbm [resolvable:$true] %s56_s23 }
   0x9   :  { %s58_s25 = sshll.u32 %s2584_s24, 4  ;;  %s59_s25 = int_to_ptr.vmem [resolvable:$true] %s58_s25 }
   0xa   :  { %64 = dma.hbm_to_vmem [thread:$0]  %s57_s23, 4096, %s59_s25, [#allocation5], %s2579_s16, %s2579_s16, %s2580_s17  }
   0xb   :  { %2574 = dma.done.wait [#allocation3], 8192  }
   0xc   :  { %2575 = vsyncadd [#allocation3], 4294959104 }
   0xd   :  { %2576 = dma.done.wait [#allocation5], 12288  }
   0xe   :  { %2577 = vsyncadd [#allocation5], 4294955008  ;;  %v1709_v0 = vld [vmem:[#allocation2 + $0xe0] sm:$0xf]  ;;  %v2343_v1 = vld [vmem:[#allocation2 + $0xec] sm:$0xf0] }
   0xf   :  { %v1837_v2 = vld [vmem:[#allocation2 + $0x1e0] sm:$0xf]  ;;  %v1710_v3 = vor.u32 %v2343_v1, %v1709_v0  ;;  %v2375_v4 = vld [vmem:[#allocation2 + $0x1ec] sm:$0xf0]  ;;  %v2341_v5 = vld [vmem:[#allocation2 + $0xe4] sm:$0xf] }
  0x10   :  { %v1711_v6 = vld [vmem:[#allocation2 + $0xf0] sm:$0xf0]  ;;  %v1838_v7 = vor.u32 %v2375_v4, %v1837_v2  ;;  %v2373_v9 = vld [vmem:[#allocation2 + $0x1e4] sm:$0xf]  ;;  %v1693_v11 = vld [vmem:[#allocation2 + $0xc0] sm:$0xf] }
  0x11   :  { %v1714_v8 = vor.u32 %v2341_v5, %v1711_v6  ;;  %v1839_v10 = vld [vmem:[#allocation2 + $0x1f0] sm:$0xf0]  ;;  %494 = vmatpush.bf16.msra.mxu0 %v1710_v3  ;;  %v2339_v13 = vld [vmem:[#allocation2 + $0xcc] sm:$0xf0]  ;;  %v1821_v14 = vld [vmem:[#allocation2 + $0x1c0] sm:$0xf] }
  0x12   :  { %v1842_v12 = vor.u32 %v2373_v9, %v1839_v10  ;;  %v2371_v15 = vld [vmem:[#allocation2 + $0x1cc] sm:$0xf0]  ;;  %507 = vmatpush.bf16.msra.mxu1 %v1838_v7  ;;  %v1694_v16 = vor.u32 %v2339_v13, %v1693_v11  ;;  %v2337_v18 = vld [vmem:[#allocation2 + $0xc4] sm:$0xf]  ;;  %v1695_v19 = vld [vmem:[#allocation2 + $0xd0] sm:$0xf0] }
  0x13   :  { %520 = vmatpush.bf16.msra.mxu2 %v1714_v8  ;;  %v1822_v17 = vor.u32 %v2371_v15, %v1821_v14  ;;  %v2369_v20 = vld [vmem:[#allocation2 + $0x1c4] sm:$0xf]  ;;  %v1698_v21 = vor.u32 %v2337_v18, %v1695_v19  ;;  %v1823_v22 = vld [vmem:[#allocation2 + $0x1d0] sm:$0xf0]  ;;  %v1677_v23 = vld [vmem:[#allocation2 + $0xa0] sm:$0xf] }
  0x14   :  { %533 = vmatpush.bf16.msra.mxu3 %v1842_v12  ;;  %v2335_v24 = vld [vmem:[#allocation2 + $0xac] sm:$0xf0]  ;;  %v1826_v25 = vor.u32 %v2369_v20, %v1823_v22  ;;  %v1805_v26 = vld [vmem:[#allocation2 + $0x1a0] sm:$0xf]  ;;  %v2333_v28 = vld [vmem:[#allocation2 + $0xa4] sm:$0xf] }
  0x15   :  { %v2367_v27 = vld [vmem:[#allocation2 + $0x1ac] sm:$0xf0]  ;;  %495 = vmatpush.bf16.msra.mxu0 %v1694_v16  ;;  %v1678_v29 = vor.u32 %v2335_v24, %v1677_v23  ;;  %v1679_v30 = vld [vmem:[#allocation2 + $0xb0] sm:$0xf0]  ;;  %v2365_v31 = vld [vmem:[#allocation2 + $0x1a4] sm:$0xf] }
  0x16   :  { %v1807_v32 = vld [vmem:[#allocation2 + $0x1b0] sm:$0xf0]  ;;  %508 = vmatpush.bf16.msra.mxu1 %v1822_v17  ;;  %v1806_v33 = vor.u32 %v2367_v27, %v1805_v26  ;;  %v1682_v34 = vor.u32 %v2333_v28, %v1679_v30  ;;  %v1661_v35 = vld [vmem:[#allocation2 + $0x80] sm:$0xf]  ;;  %v2331_v36 = vld [vmem:[#allocation2 + $0x8c] sm:$0xf0] }
  0x17   :  { %521 = vmatpush.bf16.msra.mxu2 %v1698_v21  ;;  %v1789_v37 = vld [vmem:[#allocation2 + $0x180] sm:$0xf]  ;;  %v1810_v38 = vor.u32 %v2365_v31, %v1807_v32  ;;  %v2363_v39 = vld [vmem:[#allocation2 + $0x18c] sm:$0xf0]  ;;  %v2329_v40 = vld [vmem:[#allocation2 + $0x84] sm:$0xf]  ;;  %v1662_v44 = vor.u32 %v2331_v36, %v1661_v35 }
  0x18   :  { %534 = vmatpush.bf16.msra.mxu3 %v1826_v25  ;;  %v1663_v41 = vld [vmem:[#allocation2 + $0x90] sm:$0xf0]  ;;  %v2361_v42 = vld [vmem:[#allocation2 + $0x184] sm:$0xf]  ;;  %v1790_v45 = vor.u32 %v2363_v39, %v1789_v37  ;;  %v1645_v47 = vld [vmem:[#allocation2 + $0x60] sm:$0xf] }
  0x19   :  { %v1791_v43 = vld [vmem:[#allocation2 + $0x190] sm:$0xf0]  ;;  %496 = vmatpush.bf16.msra.mxu0 %v1678_v29  ;;  %v1666_v46 = vor.u32 %v2329_v40, %v1663_v41  ;;  %v2327_v48 = vld [vmem:[#allocation2 + $0x6c] sm:$0xf0]  ;;  %v1773_v49 = vld [vmem:[#allocation2 + $0x160] sm:$0xf] }
  0x1a   :  { %509 = vmatpush.bf16.msra.mxu1 %v1806_v33  ;;  %v1794_v50 = vor.u32 %v2361_v42, %v1791_v43  ;;  %v2359_v51 = vld [vmem:[#allocation2 + $0x16c] sm:$0xf0]  ;;  %v2325_v52 = vld [vmem:[#allocation2 + $0x64] sm:$0xf]  ;;  %v1647_v53 = vld [vmem:[#allocation2 + $0x70] sm:$0xf0]  ;;  %v1646_v56 = vor.u32 %v2327_v48, %v1645_v47 }
  0x1b   :  { %522 = vmatpush.bf16.msra.mxu2 %v1682_v34  ;;  %v2357_v54 = vld [vmem:[#allocation2 + $0x164] sm:$0xf]  ;;  %v1775_v55 = vld [vmem:[#allocation2 + $0x170] sm:$0xf0]  ;;  %v1774_v57 = vor.u32 %v2359_v51, %v1773_v49  ;;  %v1650_v58 = vor.u32 %v2325_v52, %v1647_v53  ;;  %v1629_v59 = vld [vmem:[#allocation2 + $0x40] sm:$0xf] }
  0x1c   :  { %535 = vmatpush.bf16.msra.mxu3 %v1810_v38  ;;  %v2323_v60 = vld [vmem:[#allocation2 + $0x4c] sm:$0xf0]  ;;  %v1757_v61 = vld [vmem:[#allocation2 + $0x140] sm:$0xf]  ;;  %v1778_v62 = vor.u32 %v2357_v54, %v1775_v55  ;;  %v2321_v0 = vld [vmem:[#allocation2 + $0x44] sm:$0xf] }
  0x1d   :  { %497 = vmatpush.bf16.msra.mxu0 %v1662_v44  ;;  %v2355_v63 = vld [vmem:[#allocation2 + $0x14c] sm:$0xf0]  ;;  %v1631_v1 = vld [vmem:[#allocation2 + $0x50] sm:$0xf0]  ;;  %v2353_v2 = vld [vmem:[#allocation2 + $0x144] sm:$0xf]  ;;  %v1630_v4 = vor.u32 %v2323_v60, %v1629_v59 }
  0x1e   :  { %510 = vmatpush.bf16.msra.mxu1 %v1790_v45  ;;  %v1759_v3 = vld [vmem:[#allocation2 + $0x150] sm:$0xf0]  ;;  %v1758_v5 = vor.u32 %v2355_v63, %v1757_v61  ;;  %v1634_v6 = vor.u32 %v2321_v0, %v1631_v1  ;;  %v1613_v7 = vld [vmem:[#allocation2 + $0x20] sm:$0xf]  ;;  %v2319_v8 = vld [vmem:[#allocation2 + $0x2c] sm:$0xf0] }
  0x1f   :  { %523 = vmatpush.bf16.msra.mxu2 %v1666_v46  ;;  %v1741_v9 = vld [vmem:[#allocation2 + $0x120] sm:$0xf]  ;;  %v1762_v10 = vor.u32 %v2353_v2, %v1759_v3  ;;  %v2351_v11 = vld [vmem:[#allocation2 + $0x12c] sm:$0xf0]  ;;  %v2317_v12 = vld [vmem:[#allocation2 + $0x24] sm:$0xf]  ;;  %v1614_v16 = vor.u32 %v2319_v8, %v1613_v7 }
  0x20   :  { %536 = vmatpush.bf16.msra.mxu3 %v1794_v50  ;;  %v1615_v13 = vld [vmem:[#allocation2 + $0x30] sm:$0xf0]  ;;  %v2349_v14 = vld [vmem:[#allocation2 + $0x124] sm:$0xf]  ;;  %v1597_v17 = vld [vmem:[#allocation2] sm:$0xf]  ;;  %v1742_v20 = vor.u32 %v2351_v11, %v1741_v9 }
  0x21   :  { %498 = vmatpush.bf16.msra.mxu0 %v1646_v56  ;;  %v1743_v15 = vld [vmem:[#allocation2 + $0x130] sm:$0xf0]  ;;  %v2315_v18 = vld [vmem:[#allocation2 + $0xc] sm:$0xf0]  ;;  %v1725_v19 = vld [vmem:[#allocation2 + $0x100] sm:$0xf]  ;;  %v1618_v21 = vor.u32 %v2317_v12, %v1615_v13 }
  0x22   :  { %511 = vmatpush.bf16.msra.mxu1 %v1774_v57  ;;  %v2347_v22 = vld [vmem:[#allocation2 + $0x10c] sm:$0xf0]  ;;  %v2313_v23 = vld [vmem:[#allocation2 + $0x4] sm:$0xf]  ;;  %v1746_v25 = vor.u32 %v2349_v14, %v1743_v15  ;;  %v1599_v26 = vld [vmem:[#allocation2 + $0x10] sm:$0xf0]  ;;  %v1598_v32 = vor.u32 %v2315_v18, %v1597_v17 }
  0x23   :  { %524 = vmatpush.bf16.msra.mxu2 %v1650_v58  ;;  %v92_v24 = vld [vmem:[%s2769_s0] sm:$0xff]  ;;  %v1727_v28 = vld [vmem:[#allocation2 + $0x110] sm:$0xf0]  ;;  %v1717_v29 = vld [vmem:[#allocation2 + $0xe8] sm:$0xf]  ;;  %v1726_v37 = vor.u32 %v2347_v22, %v1725_v19  ;;  %v1602_v38 = vor.u32 %v2313_v23, %v1599_v26  ;;  %vm1538_vm0 = vcmask 261120  }
  0x24   :  { %537 = vmatpush.bf16.msra.mxu3 %v1778_v62  ;;  %v2345_v27 = vld [vmem:[#allocation2 + $0x104] sm:$0xf]  ;;  %v2344_v30 = vld [vmem:[#allocation2 + $0xf4] sm:$0xf0]  ;;  %v1845_v31 = vld [vmem:[#allocation2 + $0x1e8] sm:$0xf]  ;;  %v168_v36 = vunpack.c.l.b16 %v92_v24  ;;  %v169_v41 = vunpack.c.h.b16 %v92_v24 }
  0x25   :  { %499 = vmatpush.bf16.msra.mxu0 %v1630_v4  ;;  %v2376_v33 = vld [vmem:[#allocation2 + $0x1f4] sm:$0xf0]  ;;  %v2342_v34 = vld [vmem:[#allocation2 + $0xec] sm:$0xf]  ;;  %v1719_v35 = vld [vmem:[#allocation2 + $0xf8] sm:$0xf0]  ;;  %v1730_v42 = vor.u32 %v2345_v27, %v1727_v28  ;;  %v1718_v43 = vor.u32 %v2344_v30, %v1717_v29 }
  0x26   :  { %512 = vmatpush.bf16.msra.mxu1 %v1758_v5  ;;  %v2374_v39 = vld [vmem:[#allocation2 + $0x1ec] sm:$0xf]  ;;  %v1847_v40 = vld [vmem:[#allocation2 + $0x1f8] sm:$0xf0]  ;;  %v1846_v44 = vor.u32 %v2376_v33, %v1845_v31  ;;  %v1722_v45 = vor.u32 %v2342_v34, %v1719_v35  ;;  %v1701_v46 = vld [vmem:[#allocation2 + $0xc8] sm:$0xf]  ;;  %v2667_v50 = vpack.c.b16 %v168_v36, %v168_v36  ;;  %v2669_v54 = vpack.c.b16 %v169_v41, %v169_v41 }
  0x27   :  { %525 = vmatpush.bf16.msra.mxu2 %v1634_v6  ;;  %v2340_v47 = vld [vmem:[#allocation2 + $0xd4] sm:$0xf0]  ;;  %v1829_v48 = vld [vmem:[#allocation2 + $0x1c8] sm:$0xf]  ;;  %v1850_v49 = vor.u32 %v2374_v39, %v1847_v40  ;;  %v2338_v52 = vld [vmem:[#allocation2 + $0xcc] sm:$0xf] }
  0x28   :  { %538 = vmatpush.bf16.msra.mxu3 %v1762_v10  ;;  %v2372_v51 = vld [vmem:[#allocation2 + $0x1d4] sm:$0xf0]  ;;  %v1703_v53 = vld [vmem:[#allocation2 + $0xd8] sm:$0xf0]  ;;  %v2370_v55 = vld [vmem:[#allocation2 + $0x1cc] sm:$0xf]  ;;  %v1702_v57 = vor.u32 %v2340_v47, %v1701_v46 }
  0x29   :  { %500 = vmatpush.bf16.msra.mxu0 %v1614_v16  ;;  %v1831_v56 = vld [vmem:[#allocation2 + $0x1d8] sm:$0xf0]  ;;  %v1830_v58 = vor.u32 %v2372_v51, %v1829_v48  ;;  %v1706_v59 = vor.u32 %v2338_v52, %v1703_v53  ;;  %v1685_v60 = vld [vmem:[#allocation2 + $0xa8] sm:$0xf]  ;;  %v2336_v61 = vld [vmem:[#allocation2 + $0xb4] sm:$0xf0] }
  0x2a   :  { %513 = vmatpush.bf16.msra.mxu1 %v1742_v20  ;;  %v1813_v62 = vld [vmem:[#allocation2 + $0x1a8] sm:$0xf]  ;;  %v1834_v63 = vor.u32 %v2370_v55, %v1831_v56  ;;  %v2368_v0 = vld [vmem:[#allocation2 + $0x1b4] sm:$0xf0]  ;;  %v2334_v1 = vld [vmem:[#allocation2 + $0xac] sm:$0xf]  ;;  %v1686_v5 = vor.u32 %v2336_v61, %v1685_v60 }
  0x2b   :  { %526 = vmatpush.bf16.msra.mxu2 %v1618_v21  ;;  %v1687_v2 = vld [vmem:[#allocation2 + $0xb8] sm:$0xf0]  ;;  %v2366_v3 = vld [vmem:[#allocation2 + $0x1ac] sm:$0xf]  ;;  %v1814_v6 = vor.u32 %v2368_v0, %v1813_v62  ;;  %v1669_v8 = vld [vmem:[#allocation2 + $0x88] sm:$0xf] }
  0x2c   :  { %539 = vmatpush.bf16.msra.mxu3 %v1746_v25  ;;  %v1815_v4 = vld [vmem:[#allocation2 + $0x1b8] sm:$0xf0]  ;;  %v1690_v7 = vor.u32 %v2334_v1, %v1687_v2  ;;  %v2332_v9 = vld [vmem:[#allocation2 + $0x94] sm:$0xf0]  ;;  %v1797_v10 = vld [vmem:[#allocation2 + $0x188] sm:$0xf] }
  0x2d   :  { %501 = vmatpush.bf16.msra.mxu0 %v1598_v32  ;;  %v1818_v11 = vor.u32 %v2366_v3, %v1815_v4  ;;  %v2364_v12 = vld [vmem:[#allocation2 + $0x194] sm:$0xf0]  ;;  %v2330_v13 = vld [vmem:[#allocation2 + $0x8c] sm:$0xf]  ;;  %v1671_v14 = vld [vmem:[#allocation2 + $0x98] sm:$0xf0]  ;;  %v1670_v17 = vor.u32 %v2332_v9, %v1669_v8 }
  0x2e   :  { %514 = vmatpush.bf16.msra.mxu1 %v1726_v37  ;;  %v2362_v15 = vld [vmem:[#allocation2 + $0x18c] sm:$0xf]  ;;  %v1799_v16 = vld [vmem:[#allocation2 + $0x198] sm:$0xf0]  ;;  %v1798_v18 = vor.u32 %v2364_v12, %v1797_v10  ;;  %v1674_v19 = vor.u32 %v2330_v13, %v1671_v14  ;;  %v1653_v20 = vld [vmem:[#allocation2 + $0x68] sm:$0xf] }
  0x2f   :  { %527 = vmatpush.bf16.msra.mxu2 %v1602_v38  ;;  %v2328_v21 = vld [vmem:[#allocation2 + $0x74] sm:$0xf0]  ;;  %v1781_v22 = vld [vmem:[#allocation2 + $0x168] sm:$0xf]  ;;  %v1802_v23 = vor.u32 %v2362_v15, %v1799_v16  ;;  %v2326_v25 = vld [vmem:[#allocation2 + $0x6c] sm:$0xf] }
  0x30   :  { %540 = vmatpush.bf16.msra.mxu3 %v1730_v42  ;;  %502 = vmatmul.bf16.vlgmr.msra.gmra.mxu0 %v2667_v50  ;;  %v2360_v24 = vld [vmem:[#allocation2 + $0x174] sm:$0xf0]  ;;  %v1655_v26 = vld [vmem:[#allocation2 + $0x78] sm:$0xf0]  ;;  %v2358_v27 = vld [vmem:[#allocation2 + $0x16c] sm:$0xf]  ;;  %v1654_v29 = vor.u32 %v2328_v21, %v1653_v20 }
  0x31   :  { %546 = vmatpush.bf16.msrb.mxu0 %v1718_v43  ;;  %515 = vmatmul.bf16.vlgmr.msra.gmra.mxu1 %v2669_v54  ;;  %v1783_v28 = vld [vmem:[#allocation2 + $0x178] sm:$0xf0]  ;;  %v1782_v30 = vor.u32 %v2360_v24, %v1781_v22  ;;  %v1658_v31 = vor.u32 %v2326_v25, %v1655_v26  ;;  %v1637_v32 = vld [vmem:[#allocation2 + $0x48] sm:$0xf]  ;;  %v2324_v33 = vld [vmem:[#allocation2 + $0x54] sm:$0xf0] }
  0x32   :  { %559 = vmatpush.bf16.msrb.mxu1 %v1846_v44  ;;  %528 = vmatmul.bf16.vlgmr.msra.gmra.mxu2 %v2667_v50  ;;  %v1765_v34 = vld [vmem:[#allocation2 + $0x148] sm:$0xf]  ;;  %v1786_v35 = vor.u32 %v2358_v27, %v1783_v28  ;;  %v2356_v36 = vld [vmem:[#allocation2 + $0x154] sm:$0xf0]  ;;  %v2322_v37 = vld [vmem:[#allocation2 + $0x4c] sm:$0xf]  ;;  %v1638_v41 = vor.u32 %v2324_v33, %v1637_v32 }
  0x33   :  { %572 = vmatpush.bf16.msrb.mxu2 %v1722_v45  ;;  %541 = vmatmul.bf16.vlgmr.msra.gmra.mxu3 %v2669_v54  ;;  %v1639_v38 = vld [vmem:[#allocation2 + $0x58] sm:$0xf0]  ;;  %v2354_v39 = vld [vmem:[#allocation2 + $0x14c] sm:$0xf]  ;;  %v1621_v42 = vld [vmem:[#allocation2 + $0x28] sm:$0xf]  ;;  %v1766_v44 = vor.u32 %v2356_v36, %v1765_v34 }
  0x34   :  { %585 = vmatpush.bf16.msrb.mxu3 %v1850_v49  ;;  %v1767_v40 = vld [vmem:[#allocation2 + $0x158] sm:$0xf0]  ;;  %v2320_v43 = vld [vmem:[#allocation2 + $0x34] sm:$0xf0]  ;;  %v1642_v45 = vor.u32 %v2322_v37, %v1639_v38  ;;  %v1749_v46 = vld [vmem:[#allocation2 + $0x128] sm:$0xf] }
  0x35   :  { %547 = vmatpush.bf16.msrb.mxu0 %v1702_v57  ;;  %v1770_v47 = vor.u32 %v2354_v39, %v1767_v40  ;;  %v2352_v48 = vld [vmem:[#allocation2 + $0x134] sm:$0xf0]  ;;  %v2318_v49 = vld [vmem:[#allocation2 + $0x2c] sm:$0xf]  ;;  %v1623_v51 = vld [vmem:[#allocation2 + $0x38] sm:$0xf0]  ;;  %v1622_v55 = vor.u32 %v2320_v43, %v1621_v42 }
  0x36   :  { %560 = vmatpush.bf16.msrb.mxu1 %v1830_v58  ;;  %v2350_v52 = vld [vmem:[#allocation2 + $0x12c] sm:$0xf]  ;;  %v1751_v53 = vld [vmem:[#allocation2 + $0x138] sm:$0xf0]  ;;  %v1605_v56 = vld [vmem:[#allocation2 + $0x8] sm:$0xf]  ;;  %v1750_v57 = vor.u32 %v2352_v48, %v1749_v46  ;;  %v1626_v58 = vor.u32 %v2318_v49, %v1623_v51 }
  0x37   :  { %573 = vmatpush.bf16.msrb.mxu2 %v1706_v59  ;;  %v2316_v59 = vld [vmem:[#allocation2 + $0x14] sm:$0xf0]  ;;  %v1733_v60 = vld [vmem:[#allocation2 + $0x108] sm:$0xf]  ;;  %v1754_v62 = vor.u32 %v2350_v52, %v1751_v53  ;;  %v1607_v0 = vld [vmem:[#allocation2 + $0x18] sm:$0xf0] }
  0x38   :  { %586 = vmatpush.bf16.msrb.mxu3 %v1834_v63  ;;  %v2348_v61 = vld [vmem:[#allocation2 + $0x114] sm:$0xf0]  ;;  %v2314_v63 = vld [vmem:[#allocation2 + $0xc] sm:$0xf]  ;;  %v1735_v2 = vld [vmem:[#allocation2 + $0x118] sm:$0xf0] }
  0x39   :  { %548 = vmatpush.bf16.msrb.mxu0 %v1686_v5  ;;  %v2346_v1 = vld [vmem:[#allocation2 + $0x10c] sm:$0xf]  ;;  %v1909_v3 = vld [vmem:[#allocation4 + $0x70] sm:$0xf]  ;;  %v2392_v4 = vld [vmem:[#allocation4 + $0x74] sm:$0xf0]  ;;  %v1606_v5 = vor.u32 %v2316_v59, %v1605_v56  ;;  %v1734_v8 = vor.u32 %v2348_v61, %v1733_v60  ;;  %v1610_v9 = vor.u32 %v2314_v63, %v1607_v0 }
  0x3a   :  { %561 = vmatpush.bf16.msrb.mxu1 %v1814_v6  ;;  %v1973_v6 = vld [vmem:[#allocation4 + $0xf0] sm:$0xf]  ;;  %v1738_v10 = vor.u32 %v2346_v1, %v1735_v2  ;;  %v2424_v13 = vld [vmem:[#allocation4 + $0x174] sm:$0xf0]  ;;  %v1901_v14 = vld [vmem:[#allocation4 + $0x60] sm:$0xf] }
  0x3b   :  { %574 = vmatpush.bf16.msrb.mxu2 %v1690_v7  ;;  %v2408_v7 = vld [vmem:[#allocation4 + $0xf4] sm:$0xf0]  ;;  %v2037_v12 = vld [vmem:[#allocation4 + $0x170] sm:$0xf]  ;;  %v2390_v15 = vld [vmem:[#allocation4 + $0x64] sm:$0xf0] }
  0x3c   :  { %587 = vmatpush.bf16.msrb.mxu3 %v1818_v11  ;;  %v1910_v11 = vor.u32 %v2392_v4, %v1909_v3  ;;  %v1974_v16 = vor.u32 %v2408_v7, %v1973_v6  ;;  %v1902_v20 = vor.u32 %v2390_v15, %v1901_v14  ;;  %v2029_v21 = vld [vmem:[#allocation4 + $0x160] sm:$0xf]  ;;  %v2422_v22 = vld [vmem:[#allocation4 + $0x164] sm:$0xf0]  ;;  %v2388_v24 = vld [vmem:[#allocation4 + $0x54] sm:$0xf0] }
  0x3d   :  { %549 = vmatpush.bf16.msrb.mxu0 %v1670_v17  ;;  %v1965_v17 = vld [vmem:[#allocation4 + $0xe0] sm:$0xf]  ;;  %v1957_v26 = vld [vmem:[#allocation4 + $0xd0] sm:$0xf]  ;;  %v2404_v27 = vld [vmem:[#allocation4 + $0xd4] sm:$0xf0]  ;;  %v2030_v28 = vor.u32 %v2422_v22, %v2029_v21 }
  0x3e   :  { %562 = vmatpush.bf16.msrb.mxu1 %v1798_v18  ;;  %v2406_v18 = vld [vmem:[#allocation4 + $0xe4] sm:$0xf0]  ;;  %v1958_v32 = vor.u32 %v2404_v27, %v1957_v26  ;;  %v1949_v33 = vld [vmem:[#allocation4 + $0xc0] sm:$0xf]  ;;  %v1877_v36 = vld [vmem:[#allocation4 + $0x30] sm:$0xf] }
  0x3f   :  { %575 = vmatpush.bf16.msrb.mxu2 %v1674_v19  ;;  %v2038_v19 = vor.u32 %v2424_v13, %v2037_v12  ;;  %v1966_v25 = vor.u32 %v2406_v18, %v1965_v17  ;;  %v2402_v34 = vld [vmem:[#allocation4 + $0xc4] sm:$0xf0]  ;;  %v1941_v38 = vld [vmem:[#allocation4 + $0xb0] sm:$0xf]  ;;  %v2400_v39 = vld [vmem:[#allocation4 + $0xb4] sm:$0xf0] }
  0x40   :  { %588 = vmatpush.bf16.msrb.mxu3 %v1802_v23  ;;  %v1893_v23 = vld [vmem:[#allocation4 + $0x50] sm:$0xf]  ;;  %v1950_v37 = vor.u32 %v2402_v34, %v1949_v33  ;;  %v1869_v40 = vld [vmem:[#allocation4 + $0x20] sm:$0xf]  ;;  %v1942_v42 = vor.u32 %v2400_v39, %v1941_v38  ;;  %v2396_v51 = vld [vmem:[#allocation4 + $0x94] sm:$0xf0] }
  0x41   :  { %550 = vmatpush.bf16.msrb.mxu0 %v1654_v29  ;;  %v1894_v29 = vor.u32 %v2388_v24, %v1893_v23  ;;  %v1933_v43 = vld [vmem:[#allocation4 + $0xa0] sm:$0xf]  ;;  %v1861_v46 = vld [vmem:[#allocation4 + $0x10] sm:$0xf]  ;;  %v2391_v56 = vld [vmem:[#allocation4 + $0x74] sm:$0xf] }
  0x42   :  { %563 = vmatpush.bf16.msrb.mxu1 %v1782_v30  ;;  %v1885_v30 = vld [vmem:[#allocation4 + $0x40] sm:$0xf]  ;;  %v1925_v49 = vld [vmem:[#allocation4 + $0x90] sm:$0xf]  ;;  %v2394_v60 = vld [vmem:[#allocation4 + $0x84] sm:$0xf0] }
  0x43   :  { %576 = vmatpush.bf16.msrb.mxu2 %v1658_v31  ;;  %v2386_v31 = vld [vmem:[#allocation4 + $0x44] sm:$0xf0]  ;;  %v1853_v53 = vld [vmem:[#allocation4] sm:$0xf]  ;;  %v2389_v0 = vld [vmem:[#allocation4 + $0x64] sm:$0xf] }
  0x44   :  { %589 = vmatpush.bf16.msrb.mxu3 %v1786_v35  ;;  %v1886_v35 = vor.u32 %v2386_v31, %v1885_v30  ;;  %v1917_v59 = vld [vmem:[#allocation4 + $0x80] sm:$0xf]  ;;  %v1903_v1 = vld [vmem:[#allocation4 + $0x68] sm:$0xf0]  ;;  %v2101_v3 = vld [vmem:[#allocation4 + $0x1f0] sm:$0xf] }
  0x45   :  { %551 = vmatpush.bf16.msrb.mxu0 %v1638_v41  ;;  %v2382_v41 = vld [vmem:[#allocation4 + $0x24] sm:$0xf0]  ;;  %v1918_v63 = vor.u32 %v2394_v60, %v1917_v59  ;;  %v1906_v2 = vor.u32 %v2389_v0, %v1903_v1  ;;  %v2440_v4 = vld [vmem:[#allocation4 + $0x1f4] sm:$0xf0]  ;;  %v1975_v7 = vld [vmem:[#allocation4 + $0xf8] sm:$0xf0] }
  0x46   :  { %564 = vmatpush.bf16.msrb.mxu1 %v1766_v44  ;;  %v2398_v44 = vld [vmem:[#allocation4 + $0xa4] sm:$0xf0]  ;;  %v2102_v6 = vor.u32 %v2440_v4, %v2101_v3  ;;  %v1895_v13 = vld [vmem:[#allocation4 + $0x58] sm:$0xf0]  ;;  %v2093_v15 = vld [vmem:[#allocation4 + $0x1e0] sm:$0xf] }
  0x47   :  { %577 = vmatpush.bf16.msrb.mxu2 %v1642_v45  ;;  %v1870_v45 = vor.u32 %v2382_v41, %v1869_v40  ;;  %v1934_v48 = vor.u32 %v2398_v44, %v1933_v43  ;;  %v2405_v17 = vld [vmem:[#allocation4 + $0xe4] sm:$0xf]  ;;  %v2013_v21 = vld [vmem:[#allocation4 + $0x140] sm:$0xf]  ;;  %v2418_v22 = vld [vmem:[#allocation4 + $0x144] sm:$0xf0] }
  0x48   :  { %590 = vmatpush.bf16.msrb.mxu3 %v1770_v47  ;;  %v2380_v47 = vld [vmem:[#allocation4 + $0x14] sm:$0xf0]  ;;  %v2385_v23 = vld [vmem:[#allocation4 + $0x44] sm:$0xf]  ;;  %v2014_v24 = vor.u32 %v2418_v22, %v2013_v21  ;;  %v2085_v27 = vld [vmem:[#allocation4 + $0x1d0] sm:$0xf] }
  0x49   :  { %552 = vmatpush.bf16.msrb.mxu0 %v1622_v55  ;;  %v1862_v52 = vor.u32 %v2380_v47, %v1861_v46  ;;  %v2378_v55 = vld [vmem:[#allocation4 + $0x4] sm:$0xf0]  ;;  %v2403_v30 = vld [vmem:[#allocation4 + $0xd4] sm:$0xf]  ;;  %v1959_v31 = vld [vmem:[#allocation4 + $0xd8] sm:$0xf0] }
  0x4a   :  { %565 = vmatpush.bf16.msrb.mxu1 %v1750_v57  ;;  %v1926_v57 = vor.u32 %v2396_v51, %v1925_v49  ;;  %v1854_v61 = vor.u32 %v2378_v55, %v1853_v53  ;;  %v2005_v33 = vld [vmem:[#allocation4 + $0x130] sm:$0xf]  ;;  %v2416_v34 = vld [vmem:[#allocation4 + $0x134] sm:$0xf0]  ;;  %v2077_v38 = vld [vmem:[#allocation4 + $0x1c0] sm:$0xf] }
  0x4b   :  { %578 = vmatpush.bf16.msrb.mxu2 %v1626_v58  ;;  %v1911_v58 = vld [vmem:[#allocation4 + $0x78] sm:$0xf0]  ;;  %v2434_v39 = vld [vmem:[#allocation4 + $0x1c4] sm:$0xf0]  ;;  %v1951_v41 = vld [vmem:[#allocation4 + $0xc8] sm:$0xf0] }
  0x4c   :  { %591 = vmatpush.bf16.msrb.mxu3 %v1754_v62  ;;  %v1914_v62 = vor.u32 %v2391_v56, %v1911_v58  ;;  %v2078_v40 = vor.u32 %v2434_v39, %v2077_v38  ;;  %v1997_v43 = vld [vmem:[#allocation4 + $0x120] sm:$0xf]  ;;  %v2414_v44 = vld [vmem:[#allocation4 + $0x124] sm:$0xf0]  ;;  %v1871_v47 = vld [vmem:[#allocation4 + $0x28] sm:$0xf0] }
  0x4d   :  { %553 = vmatpush.bf16.msrb.mxu0 %v1606_v5  ;;  %v2407_v5 = vld [vmem:[#allocation4 + $0xf4] sm:$0xf]  ;;  %v1998_v46 = vor.u32 %v2414_v44, %v1997_v43  ;;  %v2069_v49 = vld [vmem:[#allocation4 + $0x1b0] sm:$0xf]  ;;  %v2432_v51 = vld [vmem:[#allocation4 + $0x1b4] sm:$0xf0] }
  0x4e   :  { %566 = vmatpush.bf16.msrb.mxu1 %v1734_v8  ;;  %v1978_v8 = vor.u32 %v2407_v5, %v1975_v7  ;;  %v2070_v53 = vor.u32 %v2432_v51, %v2069_v49  ;;  %v1943_v55 = vld [vmem:[#allocation4 + $0xb8] sm:$0xf0]  ;;  %v1989_v56 = vld [vmem:[#allocation4 + $0x110] sm:$0xf]  ;;  %v2379_v60 = vld [vmem:[#allocation4 + $0x14] sm:$0xf] }
  0x4f   :  { %579 = vmatpush.bf16.msrb.mxu2 %v1610_v9  ;;  %v2021_v9 = vld [vmem:[#allocation4 + $0x150] sm:$0xf]  ;;  %v2430_v0 = vld [vmem:[#allocation4 + $0x1a4] sm:$0xf0]  ;;  %v2397_v1 = vld [vmem:[#allocation4 + $0xa4] sm:$0xf] }
  0x50   :  { %592 = vmatpush.bf16.msrb.mxu3 %v1738_v10  ;;  %554 = vmatmul.bf16.vlgmr.msrb.gmra.mxu0 %v2667_v50  ;;  %v2420_v10 = vld [vmem:[#allocation4 + $0x154] sm:$0xf0]  ;;  %v1981_v5 = vld [vmem:[#allocation4 + $0x100] sm:$0xf]  ;;  %v2377_v7 = vld [vmem:[#allocation4 + $0x4] sm:$0xf] }
  0x51   :  { %996 = vmatpush.bf16.msra.mxu0 %v1910_v11  ;;  %567 = vmatmul.bf16.vlgmr.msrb.gmra.mxu1 %v2669_v54  ;;  %v2387_v11 = vld [vmem:[#allocation4 + $0x54] sm:$0xf]  ;;  %v2022_v12 = vor.u32 %v2420_v10, %v2021_v9  ;;  %v1855_v9 = vld [vmem:[#allocation4 + $0x8] sm:$0xf0]  ;;  %v2421_v21 = vld [vmem:[#allocation4 + $0x164] sm:$0xf] }
  0x52   :  { %1009 = vmatpush.bf16.msra.mxu1 %v1974_v16  ;;  %580 = vmatmul.bf16.vlgmr.msrb.gmra.mxu2 %v2667_v50  ;;  %v2384_v50 = vld [vmem:[#allocation4 + $0x34] sm:$0xf0]  ;;  %v1898_v14 = vor.u32 %v2387_v11, %v1895_v13  ;;  %v2438_v16 = vld [vmem:[#allocation4 + $0x1e4] sm:$0xf0]  ;;  %v2423_v10 = vld [vmem:[#allocation4 + $0x174] sm:$0xf] }
  0x53   :  { %593 = vmatmul.bf16.vlgmr.msrb.gmra.mxu3 %v2669_v54  ;;  %1022 = vmatpush.bf16.msra.mxu2 %v2038_v19  ;;  %v1878_v54 = vor.u32 %v2384_v50, %v1877_v36  ;;  %v2094_v18 = vor.u32 %v2438_v16, %v2093_v15  ;;  %v1967_v19 = vld [vmem:[#allocation4 + $0xe8] sm:$0xf0]  ;;  %v2006_v36 = vor.u32 %v2416_v34, %v2005_v33  ;;  %v1879_v50 = vld [vmem:[#allocation4 + $0x38] sm:$0xf0]  ;;  %v2428_v15 = vld [vmem:[#allocation4 + $0x194] sm:$0xf0] }
  0x54   :  { %1035 = vmatpush.bf16.msra.mxu3 %v2102_v6  ;;  %v2410_v6 = vld [vmem:[#allocation4 + $0x104] sm:$0xf0]  ;;  %v2039_v11 = vld [vmem:[#allocation4 + $0x178] sm:$0xf0]  ;;  %v2395_v16 = vld [vmem:[#allocation4 + $0x94] sm:$0xf] }
  0x55   :  { %997 = vmatpush.bf16.msra.mxu0 %v1902_v20  ;;  %v1970_v20 = vor.u32 %v2405_v17, %v1967_v19  ;;  %v2042_v13 = vor.u32 %v2423_v10, %v2039_v11  ;;  %v2031_v22 = vld [vmem:[#allocation4 + $0x168] sm:$0xf0]  ;;  %v2419_v34 = vld [vmem:[#allocation4 + $0x154] sm:$0xf]  ;;  %v2429_v10 = vld [vmem:[#allocation4 + $0x1a4] sm:$0xf] }
  0x56   :  { %1010 = vmatpush.bf16.msra.mxu1 %v1966_v25  ;;  %v1887_v25 = vld [vmem:[#allocation4 + $0x48] sm:$0xf0]  ;;  %v2415_v51 = vld [vmem:[#allocation4 + $0x134] sm:$0xf]  ;;  %vm1569_vm1 = vcmask 130048   ;;  %vm1587_vm2 = vcmask 64512  }
  0x57   :  { %1023 = vmatpush.bf16.msra.mxu2 %v2030_v28  ;;  %v1890_v26 = vor.u32 %v2385_v23, %v1887_v25  ;;  %v2436_v28 = vld [vmem:[#allocation4 + $0x1d4] sm:$0xf0]  ;;  %v2045_v23 = vld [vmem:[#allocation4 + $0x180] sm:$0xf]  ;;  %v2426_v25 = vld [vmem:[#allocation4 + $0x184] sm:$0xf0] }
  0x58   :  { %1036 = vmatpush.bf16.msra.mxu3 %v2094_v18  ;;  %v1927_v18 = vld [vmem:[#allocation4 + $0x98] sm:$0xf0]  ;;  %v2095_v38 = vld [vmem:[#allocation4 + $0x1e8] sm:$0xf0] }
  0x59   :  { %998 = vmatpush.bf16.msra.mxu0 %v1894_v29  ;;  %v2086_v29 = vor.u32 %v2436_v28, %v2085_v27  ;;  %v1930_v19 = vor.u32 %v2395_v16, %v1927_v18  ;;  %v1919_v27 = vld [vmem:[#allocation4 + $0x88] sm:$0xf0]  ;;  %v2046_v28 = vor.u32 %v2426_v25, %v2045_v23 }
  0x5a   :  { %1011 = vmatpush.bf16.msra.mxu1 %v1958_v32  ;;  %v1962_v32 = vor.u32 %v2403_v30, %v1959_v31  ;;  %v2439_v30 = vld [vmem:[#allocation4 + $0x1f4] sm:$0xf]  ;;  %v2103_v31 = vld [vmem:[#allocation4 + $0x1f8] sm:$0xf0]  ;;  %v2047_v25 = vld [vmem:[#allocation4 + $0x188] sm:$0xf0] }
  0x5b   :  { %1024 = vmatpush.bf16.msra.mxu2 %v2022_v12  ;;  %v1858_v12 = vor.u32 %v2377_v7, %v1855_v9  ;;  %v2106_v33 = vor.u32 %v2439_v30, %v2103_v31  ;;  %v1991_v9 = vld [vmem:[#allocation4 + $0x118] sm:$0xf0] }
  0x5c   :  { %1037 = vmatpush.bf16.msra.mxu3 %v2086_v29 }
  0x5d   :  { %999 = vmatpush.bf16.msra.mxu0 %v1886_v35  ;;  %v2383_v35 = vld [vmem:[#allocation4 + $0x34] sm:$0xf] }
  0x5e   :  { %1012 = vmatpush.bf16.msra.mxu1 %v1950_v37  ;;  %v1882_v37 = vor.u32 %v2383_v35, %v1879_v50  ;;  %v2023_v35 = vld [vmem:[#allocation4 + $0x158] sm:$0xf0] }
  0x5f   :  { %1025 = vmatpush.bf16.msra.mxu2 %v2014_v24  ;;  %v2034_v24 = vor.u32 %v2421_v21, %v2031_v22  ;;  %v2055_v21 = vld [vmem:[#allocation4 + $0x198] sm:$0xf0] }
  0x60   :  { %1038 = vmatpush.bf16.msra.mxu3 %v2078_v40 }
  0x61   :  { %1000 = vmatpush.bf16.msra.mxu0 %v1878_v54  ;;  %v2401_v54 = vld [vmem:[#allocation4 + $0xc4] sm:$0xf] }
  0x62   :  { %1013 = vmatpush.bf16.msra.mxu1 %v1942_v42  ;;  %v1954_v42 = vor.u32 %v2401_v54, %v1951_v41  ;;  %v2417_v41 = vld [vmem:[#allocation4 + $0x144] sm:$0xf] }
  0x63   :  { %1026 = vmatpush.bf16.msra.mxu2 %v2006_v36  ;;  %v2026_v36 = vor.u32 %v2419_v34, %v2023_v35 }
  0x64   :  { %1039 = vmatpush.bf16.msra.mxu3 %v2070_v53 }
  0x65   :  { %1001 = vmatpush.bf16.msra.mxu0 %v1870_v45  ;;  %v2381_v45 = vld [vmem:[#allocation4 + $0x24] sm:$0xf] }
  0x66   :  { %1014 = vmatpush.bf16.msra.mxu1 %v1934_v48  ;;  %v1874_v48 = vor.u32 %v2381_v45, %v1871_v47  ;;  %v2087_v47 = vld [vmem:[#allocation4 + $0x1d8] sm:$0xf0] }
  0x67   :  { %1027 = vmatpush.bf16.msra.mxu2 %v1998_v46  ;;  %v2435_v46 = vld [vmem:[#allocation4 + $0x1d4] sm:$0xf] }
  0x68   :  { %v2090_v49 = vor.u32 %v2435_v46, %v2087_v47  ;;  %v2167_v46 = vld [vmem:[#allocation6 + $0x78] sm:$0xf0]  ;;  %v2157_v47 = vld [vmem:[#allocation6 + $0x60] sm:$0xf] }
  0x69   :  { %1002 = vmatpush.bf16.msra.mxu0 %v1862_v52  ;;  %v2399_v52 = vld [vmem:[#allocation4 + $0xb4] sm:$0xf] }
  0x6a   :  { %1015 = vmatpush.bf16.msra.mxu1 %v1926_v57  ;;  %v2412_v57 = vld [vmem:[#allocation4 + $0x114] sm:$0xf0]  ;;  %v1946_v58 = vor.u32 %v2399_v52, %v1943_v55  ;;  %v2007_v52 = vld [vmem:[#allocation4 + $0x138] sm:$0xf0] }
  0x6b   :  { %v1990_v59 = vor.u32 %v2412_v57, %v1989_v56  ;;  %v2010_v56 = vor.u32 %v2415_v51, %v2007_v52  ;;  %v2453_v51 = vld [vmem:[#allocation6 + $0x64] sm:$0xf]  ;;  %v2159_v52 = vld [vmem:[#allocation6 + $0x68] sm:$0xf0] }
  0x6d   :  { %1003 = vmatpush.bf16.msra.mxu0 %v1854_v61  ;;  %v1863_v61 = vld [vmem:[#allocation4 + $0x18] sm:$0xf0]  ;;  %1028 = vmatpush.bf16.msra.mxu2 %v1990_v59 }
  0x6e   :  { %1016 = vmatpush.bf16.msra.mxu1 %v1918_v63  ;;  %v1866_v63 = vor.u32 %v2379_v60, %v1863_v61  ;;  %v2433_v60 = vld [vmem:[#allocation4 + $0x1c4] sm:$0xf]  ;;  %v2079_v61 = vld [vmem:[#allocation4 + $0x1c8] sm:$0xf0] }
  0x71   :  { %1048 = vmatpush.bf16.msrb.mxu0 %v1914_v62  ;;  %v2061_v62 = vld [vmem:[#allocation4 + $0x1a0] sm:$0xf] }
  0x72   :  { %1061 = vmatpush.bf16.msrb.mxu1 %v1978_v8  ;;  %v2062_v3 = vor.u32 %v2430_v0, %v2061_v62  ;;  %v1982_v8 = vor.u32 %v2410_v6, %v1981_v5  ;;  %v2431_v5 = vld [vmem:[#allocation4 + $0x1b4] sm:$0xf]  ;;  %v2071_v6 = vld [vmem:[#allocation4 + $0x1b8] sm:$0xf0] }
  0x73   :  { %v2074_v7 = vor.u32 %v2431_v5, %v2071_v6  ;;  %v2448_v5 = vld [vmem:[#allocation6 + $0x34] sm:$0xf0]  ;;  %v2229_v6 = vld [vmem:[#allocation6 + $0xf0] sm:$0xf] }
  0x74   :  { %1040 = vmatpush.bf16.msra.mxu3 %v2062_v3  ;;  %1029 = vmatpush.bf16.msra.mxu2 %v1982_v8  ;;  %v2411_v8 = vld [vmem:[#allocation4 + $0x114] sm:$0xf] }
  0x75   :  { %1049 = vmatpush.bf16.msrb.mxu0 %v1906_v2  ;;  %v1935_v2 = vld [vmem:[#allocation4 + $0xa8] sm:$0xf0] }
  0x76   :  { %1062 = vmatpush.bf16.msrb.mxu1 %v1970_v20  ;;  %v1938_v4 = vor.u32 %v2397_v1, %v1935_v2  ;;  %v2682_v20 = vld [vmem:[%s2771_s2] sm:$0xf]  ;;  %v2413_v1 = vld [vmem:[#allocation4 + $0x124] sm:$0xf]  ;;  %v1999_v2 = vld [vmem:[#allocation4 + $0x128] sm:$0xf0] }
  0x77   :  { %v160_v45 = vperm.slane %v2682_v20, 1  ;;  %v2002_v3 = vor.u32 %v2413_v1, %v1999_v2  ;;  %v2143_v1 = vld [vmem:[#allocation6 + $0x48] sm:$0xf0] }
  0x78   :  { %1074 = vmatpush.bf16.msrb.mxu2 %v2042_v13  ;;  %v2063_v13 = vld [vmem:[#allocation4 + $0x1a8] sm:$0xf0] }
  0x79   :  { %1050 = vmatpush.bf16.msrb.mxu0 %v1898_v14  ;;  %v2053_v14 = vld [vmem:[#allocation4 + $0x190] sm:$0xf] }
  0x7a   :  { %1063 = vmatpush.bf16.msrb.mxu1 %v1962_v32  ;;  %v2054_v17 = vor.u32 %v2428_v15, %v2053_v14  ;;  %v159_v32 = vperm.slane %v2682_v20, 0  ;;  %v2409_v14 = vld [vmem:[#allocation4 + $0x104] sm:$0xf]  ;;  %v1983_v15 = vld [vmem:[#allocation4 + $0x108] sm:$0xf0] }
  0x7b   :  { %v1986_v22 = vor.u32 %v2409_v14, %v1983_v15  ;;  %v2471_v14 = vld [vmem:[#allocation6 + $0xf4] sm:$0xf]  ;;  %v2231_v15 = vld [vmem:[#allocation6 + $0xf8] sm:$0xf0] }
  0x7c   :  { %1041 = vmatpush.bf16.msra.mxu3 %v2054_v17  ;;  %1075 = vmatpush.bf16.msrb.mxu2 %v2034_v24  ;;  %v2066_v17 = vor.u32 %v2429_v10, %v2063_v13  ;;  %v2425_v24 = vld [vmem:[#allocation4 + $0x184] sm:$0xf]  ;;  %v2447_v10 = vld [vmem:[#allocation6 + $0x34] sm:$0xf] }
  0x7d   :  { %1051 = vmatpush.bf16.msrb.mxu0 %v1890_v26  ;;  %v2393_v26 = vld [vmem:[#allocation4 + $0x84] sm:$0xf] }
  0x7e   :  { %1064 = vmatpush.bf16.msrb.mxu1 %v1954_v42  ;;  %v1922_v29 = vor.u32 %v2393_v26, %v1919_v27  ;;  %v2015_v42 = vld [vmem:[#allocation4 + $0x148] sm:$0xf0]  ;;  %v2050_v26 = vor.u32 %v2425_v24, %v2047_v25  ;;  %v161_v27 = vperm.slane %v2682_v20, 2 }
  0x7f   :  { %v2018_v44 = vor.u32 %v2417_v41, %v2015_v42  ;;  %v2127_v24 = vld [vmem:[#allocation6 + $0x28] sm:$0xf0] }
  0x80   :  { %1042 = vmatpush.bf16.msra.mxu3 %v2046_v28  ;;  %1076 = vmatpush.bf16.msrb.mxu2 %v2026_v36 }
  0x81   :  { %1052 = vmatpush.bf16.msrb.mxu0 %v1882_v37  ;;  %v2437_v37 = vld [vmem:[#allocation4 + $0x1e4] sm:$0xf] }
  0x82   :  { %1065 = vmatpush.bf16.msrb.mxu1 %v1946_v58  ;;  %v2098_v40 = vor.u32 %v2437_v37, %v2095_v38 }
  0x84   :  { %1087 = vmatpush.bf16.msrb.mxu3 %v2106_v33  ;;  %1077 = vmatpush.bf16.msrb.mxu2 %v2018_v44  ;;  %v2456_v44 = vld [vmem:[#allocation6 + $0x74] sm:$0xf0] }
  0x85   :  { %1053 = vmatpush.bf16.msrb.mxu0 %v1874_v48 }
  0x86   :  { %1066 = vmatpush.bf16.msrb.mxu1 %v1938_v4 }
  0x88   :  { %1088 = vmatpush.bf16.msrb.mxu3 %v2098_v40  ;;  %1078 = vmatpush.bf16.msrb.mxu2 %v2010_v56  ;;  %v2149_v56 = vld [vmem:[#allocation6 + $0x50] sm:$0xf] }
  0x89   :  { %1054 = vmatpush.bf16.msrb.mxu0 %v1866_v63  ;;  %v2082_v63 = vor.u32 %v2433_v60, %v2079_v61  ;;  %v2151_v60 = vld [vmem:[#allocation6 + $0x58] sm:$0xf0]  ;;  %v2141_v61 = vld [vmem:[#allocation6 + $0x40] sm:$0xf] }
  0x8a   :  { %1067 = vmatpush.bf16.msrb.mxu1 %v1930_v19  ;;  %v2427_v19 = vld [vmem:[#allocation4 + $0x194] sm:$0xf] }
  0x8b   :  { %v2058_v23 = vor.u32 %v2427_v19, %v2055_v21  ;;  %v2221_v19 = vld [vmem:[#allocation6 + $0xe0] sm:$0xf] }
  0x8c   :  { %1089 = vmatpush.bf16.msrb.mxu3 %v2090_v49  ;;  %1079 = vmatpush.bf16.msrb.mxu2 %v2002_v3 }
  0x8d   :  { %1055 = vmatpush.bf16.msrb.mxu0 %v1858_v12  ;;  %v1994_v12 = vor.u32 %v2411_v8, %v1991_v9  ;;  %v2472_v9 = vld [vmem:[#allocation6 + $0xf4] sm:$0xf0] }
  0x8e   :  { %1068 = vmatpush.bf16.msrb.mxu1 %v1922_v29 }
  0x90   :  { %1090 = vmatpush.bf16.msrb.mxu3 %v2082_v63  ;;  %1080 = vmatpush.bf16.msrb.mxu2 %v1994_v12  ;;  %v2230_v12 = vor.u32 %v2472_v9, %v2229_v6  ;;  %v2460_v9 = vld [vmem:[#allocation6 + $0x94] sm:$0xf0] }
  0x94   :  { %1091 = vmatpush.bf16.msrb.mxu3 %v2074_v7  ;;  %1081 = vmatpush.bf16.msrb.mxu2 %v1986_v22  ;;  %v2470_v22 = vld [vmem:[#allocation6 + $0xe4] sm:$0xf0] }
  0x95   :  { %v2222_v25 = vor.u32 %v2470_v22, %v2221_v19  ;;  %v2175_v19 = vld [vmem:[#allocation6 + $0x88] sm:$0xf0] }
  0x98   :  { %1092 = vmatpush.bf16.msrb.mxu3 %v2066_v17  ;;  %v2125_v17 = vld [vmem:[#allocation6 + $0x20] sm:$0xf] }
  0x9c   :  { %1093 = vmatpush.bf16.msrb.mxu3 %v2058_v23  ;;  %v2445_v23 = vld [vmem:[#allocation6 + $0x24] sm:$0xf] }
  0xa0   :  { %1094 = vmatpush.bf16.msrb.mxu3 %v2050_v26  ;;  %v2130_v26 = vor.u32 %v2445_v23, %v2127_v24  ;;  %v2480_v24 = vld [vmem:[%s2776_s7 + $0x38] sm:$0xff] }
  0xad   :  { %v503_v50 = vpop.f32.mrf.mxu0 }
  0xae   :  { %v504_v39 = vadd.f32 %v503_v50, %v159_v32  ;;  %v516_v54 = vpop.f32.mrf.mxu1  ;;  %v162_v32 = vperm.slane %v2682_v20, 3 }
  0xb0   :  { %v517_v43 = vadd.f32 %v516_v54, %v504_v39 }
  0xb2   :  { %v598_v48 = vmax.f32 %v517_v43, 0.0  ;;  %v2165_v43 = vld [vmem:[#allocation6 + $0x70] sm:$0xf] }
  0xb3   :  { %v2166_v20 = vor.u32 %v2456_v44, %v2165_v43  ;;  %v2442_v43 = vld [vmem:[#allocation6 + $0x4] sm:$0xf0]  ;;  %v2205_v44 = vld [vmem:[#allocation6 + $0xc0] sm:$0xf] }
  0xb4   :  { %v602_v53 = vpack.c.bf16 %v598_v48, %v598_v48  ;;  %v2454_v48 = vld [vmem:[#allocation6 + $0x64] sm:$0xf0] }
  0xb5   :  { %v529_v55 = vpop.f32.mrf.mxu2  ;;  %v505_v59 = vpop.f32.mrf.mxu0 }
  0xb6   :  { %v530_v57 = vadd.f32 %v529_v55, %v160_v45  ;;  %v542_v58 = vpop.f32.mrf.mxu3  ;;  %1004 = vmatmul.bf16.vlgmr.msra.gmra.mxu0 %v602_v53  ;;  %v518_v62 = vpop.f32.mrf.mxu1  ;;  %v2455_v45 = vld [vmem:[#allocation6 + $0x74] sm:$0xf]  ;;  %v2162_v55 = vor.u32 %v2453_v51, %v2159_v52  ;;  %v2465_v51 = vld [vmem:[#allocation6 + $0xc4] sm:$0xf]  ;;  %v2207_v52 = vld [vmem:[#allocation6 + $0xc8] sm:$0xf0] }
  0xb7   :  { %v2170_v49 = vor.u32 %v2455_v45, %v2167_v46  ;;  %1302 = vmatpush.bf16.msra.mxu0 %v2166_v20  ;;  %v2450_v62 = vld [vmem:[#allocation6 + $0x44] sm:$0xf0]  ;;  %v2441_v46 = vld [vmem:[#allocation6 + $0x4] sm:$0xf] }
  0xb8   :  { %v543_v0 = vadd.f32 %v542_v58, %v530_v57  ;;  %v2452_v57 = vld [vmem:[#allocation6 + $0x54] sm:$0xf0]  ;;  %v2451_v58 = vld [vmem:[#allocation6 + $0x54] sm:$0xf]  ;;  %v2142_v2 = vor.u32 %v2450_v62, %v2141_v61  ;;  %v2466_v20 = vld [vmem:[#allocation6 + $0xc4] sm:$0xf0] }
  0xb9   :  { %v2150_v59 = vor.u32 %v2452_v57, %v2149_v56  ;;  %v2154_v63 = vor.u32 %v2451_v58, %v2151_v60  ;;  %v2197_v57 = vld [vmem:[#allocation6 + $0xb0] sm:$0xf]  ;;  %v2464_v58 = vld [vmem:[#allocation6 + $0xb4] sm:$0xf0]  ;;  %v2199_v61 = vld [vmem:[#allocation6 + $0xb8] sm:$0xf0] }
  0xba   :  { %v599_v4 = vmax.f32 %v543_v0, 0.0  ;;  %v2449_v0 = vld [vmem:[#allocation6 + $0x44] sm:$0xf]  ;;  %v2198_v60 = vor.u32 %v2464_v58, %v2197_v57  ;;  %v2482_v57 = vld [vmem:[%s2776_s7 + $0x48] sm:$0xff] }
  0xbb   :  { %v2146_v3 = vor.u32 %v2449_v0, %v2143_v1  ;;  %v2462_v0 = vld [vmem:[#allocation6 + $0xa4] sm:$0xf0]  ;;  %v2461_v1 = vld [vmem:[#allocation6 + $0xa4] sm:$0xf] }
  0xbc   :  { %v603_v11 = vpack.c.bf16 %v599_v4, %v599_v4  ;;  %v2133_v4 = vld [vmem:[#allocation6 + $0x30] sm:$0xf]  ;;  %v2481_v58 = vld [vmem:[%s2776_s7 + $0x40] sm:$0xff] }
  0xbd   :  { %v531_v16 = vpop.f32.mrf.mxu2  ;;  %v2134_v8 = vor.u32 %v2448_v5, %v2133_v4 }
  0xbe   :  { %1017 = vmatmul.bf16.vlgmr.msra.gmra.mxu1 %v603_v11  ;;  %v544_v18 = vpop.f32.mrf.mxu3  ;;  %v2234_v16 = vor.u32 %v2471_v14, %v2231_v15  ;;  %v670_v14 = vld [vmem:[%s2773_s4] sm:$0x3] }
  0xbf   :  { %1315 = vmatpush.bf16.msra.mxu1 %v2230_v12  ;;  %v2446_v18 = vld [vmem:[#allocation6 + $0x24] sm:$0xf0]  ;;  %v2183_v12 = vld [vmem:[#allocation6 + $0x98] sm:$0xf0]  ;;  %v2173_v15 = vld [vmem:[#allocation6 + $0x80] sm:$0xf] }
  0xc0   :  { %v2126_v21 = vor.u32 %v2446_v18, %v2125_v17  ;;  %v2457_v17 = vld [vmem:[#allocation6 + $0x84] sm:$0xf]  ;;  %v672_v22 = vperm.slane %v670_v14, 0 }
  0xc3   :  { %1316 = vmatpush.bf16.msra.mxu1 %v2222_v25  ;;  %v2488_v25 = vld [vmem:[%s2776_s7 + $0x78] sm:$0xff] }
  0xc6   :  { %1056 = vmatmul.bf16.vlgmr.msrb.gmra.mxu0 %v602_v53  ;;  %v2158_v53 = vor.u32 %v2454_v48, %v2157_v47  ;;  %v2111_v47 = vld [vmem:[#allocation6 + $0x8] sm:$0xf0]  ;;  %v2206_v48 = vor.u32 %v2466_v20, %v2205_v44  ;;  %v2487_v20 = vld [vmem:[%s2776_s7 + $0x70] sm:$0xff] }
  0xc8   :  { %1303 = vmatpush.bf16.msra.mxu0 %v2158_v53 }
  0xcc   :  { %1304 = vmatpush.bf16.msra.mxu0 %v2150_v59  ;;  %v2463_v59 = vld [vmem:[#allocation6 + $0xb4] sm:$0xf] }
  0xcd   :  { %v555_v28 = vpop.f32.mrf.mxu0  ;;  %v2202_v62 = vor.u32 %v2463_v59, %v2199_v61  ;;  %v2490_v59 = vld [vmem:[%s2778_s9 + $0x8] sm:$0xff] }
  0xce   :  { %v556_v29 = vadd.f32 %v555_v28, %v161_v27  ;;  %v568_v30 = vpop.f32.mrf.mxu1  ;;  %1069 = vmatmul.bf16.vlgmr.msrb.gmra.mxu1 %v603_v11  ;;  %v2135_v11 = vld [vmem:[#allocation6 + $0x38] sm:$0xf0]  ;;  %v2469_v27 = vld [vmem:[#allocation6 + $0xe4] sm:$0xf]  ;;  %v2223_v28 = vld [vmem:[#allocation6 + $0xe8] sm:$0xf0] }
  0xcf   :  { %v2138_v13 = vor.u32 %v2447_v10, %v2135_v11  ;;  %v2459_v10 = vld [vmem:[#allocation6 + $0x94] sm:$0xf] }
  0xd0   :  { %v569_v31 = vadd.f32 %v568_v30, %v556_v29  ;;  %1305 = vmatpush.bf16.msra.mxu0 %v2142_v2  ;;  %v2226_v30 = vor.u32 %v2469_v27, %v2223_v28  ;;  %v2479_v28 = vld [vmem:[%s2776_s7 + $0x30] sm:$0xff] }
  0xd2   :  { %v600_v33 = vmax.f32 %v569_v31, 0.0 }
  0xd4   :  { %v604_v34 = vpack.c.bf16 %v600_v33, %v600_v33  ;;  %1306 = vmatpush.bf16.msra.mxu0 %v2134_v8  ;;  %v2444_v33 = vld [vmem:[#allocation6 + $0x14] sm:$0xf0]  ;;  %v2181_v8 = vld [vmem:[#allocation6 + $0x90] sm:$0xf] }
  0xd5   :  { %v581_v35 = vpop.f32.mrf.mxu2  ;;  %v557_v37 = vpop.f32.mrf.mxu0  ;;  %v2182_v11 = vor.u32 %v2460_v9, %v2181_v8 }
  0xd6   :  { %v582_v36 = vadd.f32 %v581_v35, %v162_v32  ;;  %v594_v50 = vpop.f32.mrf.mxu3  ;;  %v570_v38 = vpop.f32.mrf.mxu1  ;;  %1030 = vmatmul.bf16.vlgmr.msra.gmra.mxu2 %v604_v34  ;;  %v2117_v32 = vld [vmem:[#allocation6 + $0x10] sm:$0xf]  ;;  %v2119_v37 = vld [vmem:[#allocation6 + $0x18] sm:$0xf0] }
  0xd7   :  { %1328 = vmatpush.bf16.msra.mxu2 %v2170_v49  ;;  %v2118_v35 = vor.u32 %v2444_v33, %v2117_v32  ;;  %v2114_v49 = vor.u32 %v2441_v46, %v2111_v47  ;;  %v2477_v46 = vld [vmem:[%s2776_s7 + $0x20] sm:$0xff]  ;;  %v2486_v47 = vld [vmem:[%s2776_s7 + $0x68] sm:$0xff] }
  0xd8   :  { %v595_v39 = vadd.f32 %v594_v50, %v582_v36  ;;  %1307 = vmatpush.bf16.msra.mxu0 %v2126_v21  ;;  %v2468_v36 = vld [vmem:[#allocation6 + $0xd4] sm:$0xf0]  ;;  %v2443_v50 = vld [vmem:[#allocation6 + $0x14] sm:$0xf]  ;;  %v2178_v21 = vor.u32 %v2457_v17, %v2175_v19  ;;  %v2491_v17 = vld [vmem:[%s2780_s11] sm:$0xff] }
  0xd9   :  { %v2499_v19 = vld [vmem:[%s2777_s8] ss:$0 sm:$0xff] }
  0xda   :  { %v601_v54 = vmax.f32 %v595_v39, 0.0  ;;  %v2122_v39 = vor.u32 %v2443_v50, %v2119_v37  ;;  %v673_v50 = vperm.slane %v670_v14, 1 }
  0xdb   :  { %1329 = vmatpush.bf16.msra.mxu2 %v2162_v55  ;;  %v2210_v55 = vor.u32 %v2465_v51, %v2207_v52  ;;  %v2475_v51 = vld [vmem:[%s2776_s7 + $0x10] sm:$0xff]  ;;  %v2484_v52 = vld [vmem:[%s2776_s7 + $0x58] sm:$0xff] }
  0xdc   :  { %v605_v40 = vpack.c.bf16 %v601_v54, %v601_v54  ;;  %v2467_v54 = vld [vmem:[#allocation6 + $0xd4] sm:$0xf]  ;;  %1308 = vmatpush.bf16.msra.mxu0 %v2118_v35 }
  0xdd   :  { %v583_v41 = vpop.f32.mrf.mxu2 }
  0xde   :  { %v596_v42 = vpop.f32.mrf.mxu3  ;;  %1043 = vmatmul.bf16.vlgmr.msra.gmra.mxu3 %v605_v40 }
  0xdf   :  { %1330 = vmatpush.bf16.msra.mxu2 %v2154_v63  ;;  %1341 = vmatpush.bf16.msra.mxu3 %v2234_v16  ;;  %v2109_v42 = vld [vmem:[#allocation6] sm:$0xf]  ;;  %v2458_v16 = vld [vmem:[#allocation6 + $0x84] sm:$0xf0] }
  0xe0   :  { %v2110_v45 = vor.u32 %v2442_v43, %v2109_v42  ;;  %v2189_v63 = vld [vmem:[#allocation6 + $0xa0] sm:$0xf]  ;;  %v2174_v18 = vor.u32 %v2458_v16, %v2173_v15 }
  0xe1   :  { %v2190_v2 = vor.u32 %v2462_v0, %v2189_v63  ;;  %v2489_v16 = vld [vmem:[%s2778_s9] sm:$0xff] }
  0xe2   :  { %1309 = vmatpush.bf16.msra.mxu0 %v2110_v45  ;;  %v2478_v45 = vld [vmem:[%s2776_s7 + $0x28] sm:$0xff] }
  0xe3   :  { %1331 = vmatpush.bf16.msra.mxu2 %v2146_v3  ;;  %1342 = vmatpush.bf16.msra.mxu3 %v2226_v30  ;;  %v2191_v3 = vld [vmem:[#allocation6 + $0xa8] sm:$0xf0] }
  0xe4   :  { %v2194_v4 = vor.u32 %v2461_v1, %v2191_v3 }
  0xe6   :  { %1082 = vmatmul.bf16.vlgmr.msrb.gmra.mxu2 %v604_v34  ;;  %v2213_v34 = vld [vmem:[#allocation6 + $0xd0] sm:$0xf]  ;;  %1490 = vmatpush.bf16.msrb.mxu0 %v2480_v24 }
  0xe7   :  { %1332 = vmatpush.bf16.msra.mxu2 %v2138_v13  ;;  %v2214_v38 = vor.u32 %v2468_v36, %v2213_v34  ;;  %v2186_v13 = vor.u32 %v2459_v10, %v2183_v12 }
  0xe9   :  { %1317 = vmatpush.bf16.msra.mxu1 %v2214_v38 }
  0xea   :  { %1491 = vmatpush.bf16.msrb.mxu0 %v2479_v28  ;;  %v2500_v28 = vld [vmem:[%s2779_s10] ss:$0 sm:$0xff] }
  0xeb   :  { %1333 = vmatpush.bf16.msra.mxu2 %v2130_v26 }
  0xed   :  { %1318 = vmatpush.bf16.msra.mxu1 %v2206_v48  ;;  %v2476_v48 = vld [vmem:[%s2776_s7 + $0x18] sm:$0xff] }
  0xee   :  { %1095 = vmatmul.bf16.vlgmr.msrb.gmra.mxu3 %v605_v40  ;;  %v2215_v40 = vld [vmem:[#allocation6 + $0xd8] sm:$0xf0]  ;;  %1492 = vmatpush.bf16.msrb.mxu0 %v2478_v45 }
  0xef   :  { %v2218_v41 = vor.u32 %v2467_v54, %v2215_v40  ;;  %1334 = vmatpush.bf16.msra.mxu2 %v2122_v39 }
  0xf1   :  { %1343 = vmatpush.bf16.msra.mxu3 %v2218_v41  ;;  %1319 = vmatpush.bf16.msra.mxu1 %v2198_v60 }
  0xf2   :  { %1493 = vmatpush.bf16.msrb.mxu0 %v2477_v46 }
  0xf3   :  { %1335 = vmatpush.bf16.msra.mxu2 %v2114_v49  ;;  %v2485_v49 = vld [vmem:[%s2776_s7 + $0x60] sm:$0xff] }
  0xf5   :  { %1344 = vmatpush.bf16.msra.mxu3 %v2210_v55  ;;  %1320 = vmatpush.bf16.msra.mxu1 %v2190_v2  ;;  %v2483_v55 = vld [vmem:[%s2776_s7 + $0x50] sm:$0xff] }
  0xf6   :  { %1494 = vmatpush.bf16.msrb.mxu0 %v2476_v48 }
  0xf7   :  { %1548 = vmatpush.bf16.msrb.mxu2 %v2490_v59 }
  0xf9   :  { %1345 = vmatpush.bf16.msra.mxu3 %v2202_v62  ;;  %1321 = vmatpush.bf16.msra.mxu1 %v2182_v11  ;;  %v1136_v62 = vld [vmem:[%s2775_s6] sm:$0x3] }
  0xfa   :  { %1495 = vmatpush.bf16.msrb.mxu0 %v2475_v51  ;;  %v1138_v0 = vperm.slane %v1136_v62, 0 }
  0xfb   :  { %1549 = vmatpush.bf16.msrb.mxu2 %v2489_v16 }
  0xfd   :  { %1346 = vmatpush.bf16.msra.mxu3 %v2194_v4  ;;  %1322 = vmatpush.bf16.msra.mxu1 %v2174_v18  ;;  %v1139_v4 = vperm.slane %v1136_v62, 1 }
 0x101   :  { %1347 = vmatpush.bf16.msra.mxu3 %v2186_v13  ;;  %1503 = vmatpush.bf16.msrb.mxu1 %v2488_v25 }
 0x105   :  { %1348 = vmatpush.bf16.msra.mxu3 %v2178_v21  ;;  %1504 = vmatpush.bf16.msrb.mxu1 %v2487_v20 }
 0x109   :  { %1505 = vmatpush.bf16.msrb.mxu1 %v2486_v47  ;;  %1580 = vmatpush.bf16.msrb.mxu3 %v2491_v17 }
 0x10d   :  { %1506 = vmatpush.bf16.msrb.mxu1 %v2485_v49 }
 0x111   :  { %1507 = vmatpush.bf16.msrb.mxu1 %v2484_v52 }
 0x115   :  { %1508 = vmatpush.bf16.msrb.mxu1 %v2483_v55 }
 0x119   :  { %1509 = vmatpush.bf16.msrb.mxu1 %v2482_v57 }
 0x11d   :  { %1510 = vmatpush.bf16.msrb.mxu1 %v2481_v58 }
 0x133   :  { %v2688_v7 = vpop.f32.mrf.mxu0 }
 0x134   :  { %v1006_v26 = vadd.f32 %v2688_v7, %v672_v22 }
 0x13b   :  { %v2690_v29 = vpop.f32.mrf.mxu1  ;;  %v1007_v31 = vpop.f32.mrf.mxu0 }
 0x13c   :  { %v1019_v30 = vadd.f32 %v2690_v29, %v1006_v26 }
 0x143   :  { %v1020_v53 = vpop.f32.mrf.mxu1  ;;  %v1057_v56 = vpop.f32.mrf.mxu0 }
 0x144   :  { %v1058_v38 = vadd.f32 %v1057_v56, %v673_v50  ;;  %v2474_v53 = vld [vmem:[%s2776_s7 + $0x8] sm:$0xff]  ;;  %v2473_v56 = vld [vmem:[%s2776_s7] sm:$0xff] }
 0x145   :  { %1496 = vmatpush.bf16.msrb.mxu0 %v2474_v53 }
 0x149   :  { %1497 = vmatpush.bf16.msrb.mxu0 %v2473_v56 }
 0x14b   :  { %v1070_v5 = vpop.f32.mrf.mxu1  ;;  %v1059_v6 = vpop.f32.mrf.mxu0 }
 0x14c   :  { %v1071_v39 = vadd.f32 %v1070_v5, %v1058_v38 }
 0x153   :  { %v1072_v23 = vpop.f32.mrf.mxu1 }
 0x159   :  { %v1031_v27 = vpop.f32.mrf.mxu2 }
 0x15a   :  { %v1032_v31 = vadd.f32 %v1031_v27, %v1019_v30 }
 0x161   :  { %v1044_v32 = vpop.f32.mrf.mxu3  ;;  %v1033_v34 = vpop.f32.mrf.mxu2 }
 0x162   :  { %v1045_v33 = vadd.f32 %v1044_v32, %v1032_v31 }
 0x164   :  { %v1100_v35 = vmax.f32 %v1045_v33, 0.0 }
 0x166   :  { %v1102_v36 = vpack.c.bf16 %v1100_v35, %v1100_v35  ;;  %v2501_v35 = vld [vmem:[%s2781_s12] ss:$0 sm:$0xff] }
 0x168   :  { %1310 = vmatmul.bf16.vlgmr.msra.gmra.mxu0 %v1102_v36  ;;  %1336 = vmatmul.bf16.vlgmr.msra.gmra.mxu2 %v1102_v36 }
 0x169   :  { %v1046_v7 = vpop.f32.mrf.mxu3  ;;  %v1083_v37 = vpop.f32.mrf.mxu2 }
 0x16a   :  { %v1084_v54 = vadd.f32 %v1083_v37, %v1071_v39 }
 0x171   :  { %v1096_v40 = vpop.f32.mrf.mxu3  ;;  %v1085_v42 = vpop.f32.mrf.mxu2 }
 0x172   :  { %v1097_v41 = vadd.f32 %v1096_v40, %v1084_v54 }
 0x174   :  { %v1101_v43 = vmax.f32 %v1097_v41, 0.0 }
 0x176   :  { %v1103_v29 = vpack.c.bf16 %v1101_v43, %v1101_v43 }
 0x178   :  { %1323 = vmatmul.bf16.vlgmr.msra.gmra.mxu1 %v1103_v29  ;;  %1349 = vmatmul.bf16.vlgmr.msra.gmra.mxu3 %v1103_v29 }
 0x179   :  { %v1098_v44 = vpop.f32.mrf.mxu3 }
 0x1e5   :  { %v1311_v60 = vpop.f32.mrf.mxu0 }
 0x1e6   :  { %v1312_v2 = vadd.f32 %v1311_v60, %v1138_v0 }
 0x1eb   :  { %v1337_v61 = vpop.f32.mrf.mxu2 }
 0x1ec   :  { %v1338_v8 = vadd.f32 %v1337_v61, %v1139_v4 }
 0x1ed   :  { %v1313_v63 = vpop.f32.mrf.mxu0 }
 0x1f3   :  { %v1339_v1 = vpop.f32.mrf.mxu2 }
 0x1f5   :  { %v1324_v3 = vpop.f32.mrf.mxu1 }
 0x1f6   :  { %v1325_v5 = vadd.f32 %v1324_v3, %v1312_v2 }
 0x1f8   :  { %v1354_v6 = vmax.f32 %v1325_v5, 0.0 }
 0x1fa   :  { %v1356_v9 = vpack.c.bf16 %v1354_v6, %v1354_v6 }
 0x1fb   :  { %v1350_v10 = vpop.f32.mrf.mxu3 }
 0x1fc   :  { %v1351_v11 = vadd.f32 %v1350_v10, %v1338_v8  ;;  %1498 = vmatmul.bf16.vlgmr.msrb.gmra.mxu0 %v1356_v9 }
 0x1fd   :  { %v1326_v12 = vpop.f32.mrf.mxu1 }
 0x1fe   :  { %v1355_v13 = vmax.f32 %v1351_v11, 0.0 }
 0x200   :  { %v1357_v14 = vpack.c.bf16 %v1355_v13, %v1355_v13 }
 0x202   :  { %1511 = vmatmul.bf16.vlgmr.msrb.gmra.mxu1 %v1357_v14 }
 0x203   :  { %v1352_v15 = vpop.f32.mrf.mxu3 }
 0x279   :  { %v1499_v18 = vpop.f32.mrf.mxu0 }
 0x27a   :  { %v1500_v21 = vadd.f32 %v2499_v19, %v1499_v18 }
 0x27f   :  { %v1512_v22 = vpop.f32.mrf.mxu1 }
 0x280   :  { %v1513_v23 = vadd.f32 %v1512_v22, %v1500_v21 }
 0x281   :  { %v1501_v24 = vpop.f32.mrf.mxu0 }
 0x282   :  { %v1516_v25 = vmax.f32 %v1513_v23, 0.0 }
 0x284   :  { %v1517_v26 = vpack.c.bf16 %v1516_v25, %v1516_v25 }
 0x286   :  { %2307 = vmatmul.msk.bf16.vlgmr.msrb.gmra.mxu2 %vm1538_vm0, %v1517_v26 }
 0x287   :  { %v1514_v27 = vpop.f32.mrf.mxu1 }
 0x309   :  { %v1551_v30 = vpop.f32.mrf.mxu2 }
 0x30a   :  { %v1552_v31 = vadd.f32 %v2500_v28, %v1551_v30 }
 0x30c   :  { %v1555_v32 = vmax.f32 %v1552_v31, 0.0 }
 0x30e   :  { %v1556_v33 = vpack.c.bf16 %v1555_v32, %v1555_v32 }
 0x310   :  { %2312 = vmatmul.msk.bf16.vlgmr.msrb.gmra.mxu3 %vm1569_vm1, %v1556_v33 }
 0x311   :  { %v1553_v34 = vpop.f32.mrf.mxu2 }
 0x393   :  { %v1582_v36 = vpop.f32.mrf.mxu3 }
 0x394   :  { %v1583_v50 = vadd.f32 %v2501_v35, %v1582_v36 }
 0x396   :  { %v1586_v7 = vmax.f32 %v1583_v50, 0.0 }
 0x398   :  { %1588 = vst.msk [vmem:[%s2782_s13] sm:$0xff] %vm1587_vm2, %v1586_v7 }
 0x39b   :  { %v1584_v37 = vpop.f32.mrf.mxu3 }
 0x39c   :  { %1593 = vsyncpa [#allocation3], 1 }
 0x39d   :  { %1594 = vsyncpa [#allocation5], 1 }

</bundles_post_ra>
